<compile_context>
chip_gen: v7x
topology: tpu7x:2x2x1
jax: 0.10.0
libtpu: 0.0.40
codegen_flags: <defaults>
</compile_context>

<pallas_src>
import jax
import jax.numpy as jnp
from jax.experimental import pallas as pl
from jax.experimental.pallas import tpu as pltpu

B = 2        # batch
L = 16       # sequence length
LB = L * B   # flattened time-major rows (row = t*B + b)
H = 64       # residual channels / LSTM hidden size
NL = 10      # LSTM layers
EPS = 1e-5   # BatchNorm eps


def _sigmoid(x):
    # exp -> EUP, approximate reciprocal -> EUP slot (keeps the VALU free)
    return pl.reciprocal(1.0 + jnp.exp(-x), approx=True)


def _conv1d(x, w, bias, k_size):
    """'same' 1-D convolution on the whole (L*B, Cin) time-major slab.
    w: (K*Cin, Cout) bf16 im2col weight, bias: (1, Cout) f32.
    The pad*B zero rows at both ends double as conv padding AND prevent any
    cross-batch leakage (rows of different batch elements are B apart)."""
    cin = x.shape[1]
    pad_rows = ((k_size - 1) // 2) * B
    z = jnp.zeros((pad_rows, cin), jnp.float32)
    xp = jnp.concatenate([z, x, z], axis=0)                        # (LB+2*pad*B, Cin)
    patches = jnp.concatenate(
        [xp[k * B:k * B + LB, :] for k in range(k_size)], axis=1)  # (LB, K*Cin)
    out = jnp.dot(patches.astype(jnp.bfloat16), w,
                  preferred_element_type=jnp.float32)
    return out + bias


def _bn_relu(x, gamma, beta):
    """Training-mode BatchNorm1d (batch statistics, biased variance) + ReLU
    over the (L*B, C) slab."""
    # TODO(synk): running-statistics update (training-mode side effect of
    # nn.BatchNorm1d) is not reproduced; only the forward output is.
    inv_n = 1.0 / x.shape[0]
    mean = jnp.sum(x, axis=0, keepdims=True) * inv_n
    xc = x - mean
    var = jnp.sum(xc * xc, axis=0, keepdims=True) * inv_n
    scale = jax.lax.rsqrt(var + EPS) * gamma
    return jnp.maximum(xc * scale + beta, 0.0)


def motif_kernel(x_ref, c1w_ref, c1b_ref, c2w_ref, c2b_ref,
                 rug_ref, rube_ref, ruw_ref, rub_ref,
                 wih_ref, whh_ref, lb_ref, ow_ref, ob_ref, o_ref):
    # ---- conv front-end: Conv1d(4->32,k5) ReLU, Conv1d(32->64,k5) ReLU ----
    x = x_ref[...].astype(jnp.float32)                                   # (LB, 4)
    h1 = jnp.maximum(_conv1d(x, c1w_ref[...], c1b_ref[...], 5), 0.0)     # (LB, 32)
    acts = jnp.maximum(_conv1d(h1, c2w_ref[...], c2b_ref[...], 5), 0.0)  # (LB, 64)

    # ---- three ResidualUnit(64, 64, 11) blocks ----
    for u in range(3):
        a1 = _bn_relu(acts, rug_ref[2 * u], rube_ref[2 * u])
        c1 = _conv1d(a1, ruw_ref[2 * u], rub_ref[2 * u], 11)
        a2 = _bn_relu(c1, rug_ref[2 * u + 1], rube_ref[2 * u + 1])
        c2 = _conv1d(a2, ruw_ref[2 * u + 1], rub_ref[2 * u + 1], 11)
        acts = c2 + acts                                      # + input_node

    # ---- 10-layer LSTM (PyTorch gate order i,f,g,o; zero initial h, c) ----
    # TODO(synk): on v7x the per-batch-independent LSTM could be split across
    # the 2 TensorCores; kept single-core so v5e/v6e (1 TC) are not serialized.
    def layer_body(layer, seq):
        w_i = wih_ref[layer]                                  # (H, 4H) bf16
        w_h = whh_ref[layer]                                  # (H, 4H) bf16
        bias = lb_ref[layer]                                  # (1, 4H) f32 = b_ih + b_hh
        # Input projection for the whole layer, hoisted out of the recurrence.
        gates_x = jnp.dot(seq.astype(jnp.bfloat16), w_i,
                          preferred_element_type=jnp.float32) + bias     # (LB, 4H)
        h = jnp.zeros((B, H), jnp.float32)
        c = jnp.zeros((B, H), jnp.float32)
        outs = []
        for t in range(L):                                    # fully unrolled
            gates = gates_x[t * B:(t + 1) * B, :] + jnp.dot(
                h.astype(jnp.bfloat16), w_h, preferred_element_type=jnp.float32)
            s = _sigmoid(gates)                               # i, f, _, o in one pass
            g = jnp.tanh(gates[:, 2 * H:3 * H])
            c = s[:, H:2 * H] * c + s[:, 0:H] * g
            h = s[:, 3 * H:4 * H] * jnp.tanh(c)
            outs.append(h)
        return jnp.concatenate(outs, axis=0)                  # (LB, H), time-major

    seq = jax.lax.fori_loop(0, NL, layer_body, acts)
    h_last = seq[(L - 1) * B:, :]          # rnn_output[-1, :, :]  -> (B, H)

    # ---- Linear(64 -> 2) + LogSoftmax(dim=1) ----
    logits = jnp.dot(h_last.astype(jnp.bfloat16), ow_ref[...],
                     preferred_element_type=jnp.float32) + ob_ref[...]
    m = jnp.max(logits, axis=1, keepdims=True)
    z = logits - m
    lse = jnp.log(jnp.sum(jnp.exp(z), axis=1, keepdims=True))
    o_ref[...] = (z - lse).astype(o_ref.dtype)


@jax.jit
def motif_forward(x, params):
    # (B, L, 4) -> time-major (L*B, 4) slab, row = t*B + b (layout plumbing only)
    x_tm = jnp.transpose(x, (1, 0, 2)).reshape(LB, 4)
    in_specs = [pl.BlockSpec(memory_space=pltpu.MemorySpace.VMEM)] * 14
    # TODO(synk): at realistic B/L move batch/length onto a Pallas grid with
    # BlockSpec tiling; at these toy sizes everything fits directly in VMEM.
    return pl.pallas_call(
        motif_kernel,
        out_shape=jax.ShapeDtypeStruct((B, 2), jnp.float32),
        in_specs=in_specs,
        out_specs=pl.BlockSpec(memory_space=pltpu.MemorySpace.VMEM),
    )(x_tm,
      params["c1w"], params["c1b"], params["c2w"], params["c2b"],
      params["rug"], params["rube"], params["ruw"], params["rub"],
      params["wih"], params["whh"], params["lstm_b"],
      params["ow"], params["ob"])


def init_params(key):
    ks = jax.random.split(key, 14)

    def nrm(k, shape, scale=0.1):
        return scale * jax.random.normal(k, shape, dtype=jnp.float32)

    bf16 = lambda a: a.astype(jnp.bfloat16)
    b_ih = nrm(ks[10], (NL, 1, 4 * H))
    b_hh = nrm(ks[11], (NL, 1, 4 * H))
    return {
        # conv1: Conv1d(4, 32, k=5) -> im2col weight (K*Cin, Cout), bf16
        "c1w": bf16(nrm(ks[0], (5 * 4, 32))),
        "c1b": nrm(ks[1], (1, 32)),
        # conv2: Conv1d(32, 64, k=5)
        "c2w": bf16(nrm(ks[2], (5 * 32, 64))),
        "c2b": nrm(ks[3], (1, 64)),
        # 3 residual units x 2 BatchNorms each -> 6 (gamma, beta)
        "rug": 1.0 + nrm(ks[4], (6, 1, 64)),
        "rube": nrm(ks[5], (6, 1, 64)),
        # 3 residual units x 2 Conv1d(64, 64, k=11) -> im2col weights
        "ruw": bf16(nrm(ks[6], (6, 11 * 64, 64), scale=0.05)),
        "rub": nrm(ks[7], (6, 1, 64)),
        # LSTM(64, 64, num_layers=10): weights (layer, H, 4H), gate order i,f,g,o
        "wih": bf16(nrm(ks[8], (NL, H, 4 * H))),
        "whh": bf16(nrm(ks[9], (NL, H, 4 * H))),
        # b_ih + b_hh folded into a single bias at init (PyTorch adds both)
        "lstm_b": b_ih + b_hh,
        # output Linear(64, 2), stored transposed
        "ow": bf16(nrm(ks[12], (H, 2))),
        "ob": nrm(ks[13], (1, 2)),
    }


if __name__ == "__main__":
    key = jax.random.PRNGKey(0)
    k_in, k_p = jax.random.split(key)
    # one-hot nucleotide sequence: (batch, length, 4), same layout the PyTorch
    # module expects before its internal transpose(1, 2)
    tokens = jax.random.randint(k_in, (B, L), 0, 4)
    x = jax.nn.one_hot(tokens, 4, dtype=jnp.float32)
    params = init_params(k_p)

    out = motif_forward(x, params)
    out = jax.block_until_ready(out)
    assert out.shape == (B, 2)
    assert bool(jnp.all(jnp.isfinite(out)))
    print("KERNEL_OK")
</pallas_src>

<mosaic_0001>
module attributes {stable_mosaic.version = 11 : i64} {
  func.func @motif_kernel(%arg0: memref<32x4xf32, #tpu.memory_space<vmem>>, %arg1: memref<20x32xbf16, #tpu.memory_space<vmem>>, %arg2: memref<1x32xf32, #tpu.memory_space<vmem>>, %arg3: memref<160x64xbf16, #tpu.memory_space<vmem>>, %arg4: memref<1x64xf32, #tpu.memory_space<vmem>>, %arg5: memref<6x1x64xf32, #tpu.memory_space<vmem>>, %arg6: memref<6x1x64xf32, #tpu.memory_space<vmem>>, %arg7: memref<6x704x64xbf16, #tpu.memory_space<vmem>>, %arg8: memref<6x1x64xf32, #tpu.memory_space<vmem>>, %arg9: memref<10x64x256xbf16, #tpu.memory_space<vmem>>, %arg10: memref<10x64x256xbf16, #tpu.memory_space<vmem>>, %arg11: memref<10x1x256xf32, #tpu.memory_space<vmem>>, %arg12: memref<64x2xbf16, #tpu.memory_space<vmem>>, %arg13: memref<1x2xf32, #tpu.memory_space<vmem>>, %arg14: memref<2x2xf32, #tpu.memory_space<vmem>>) attributes {dimension_semantics = [], scalar_prefetch = 0 : i64, scratch_operands = 0 : i64, tpu.core_type = #tpu.core_type<tc>} {
    %c0 = arith.constant 0 : index
    %c0_0 = arith.constant 0 : index
    %0 = vector.load %arg0[%c0, %c0_0] : memref<32x4xf32, #tpu.memory_space<vmem>>, vector<32x4xf32>
    %c0_1 = arith.constant 0 : index
    %c0_2 = arith.constant 0 : index
    %1 = vector.load %arg1[%c0_1, %c0_2] : memref<20x32xbf16, #tpu.memory_space<vmem>>, vector<20x32xbf16>
    %c0_3 = arith.constant 0 : index
    %c0_4 = arith.constant 0 : index
    %2 = vector.load %arg2[%c0_3, %c0_4] : memref<1x32xf32, #tpu.memory_space<vmem>>, vector<1x32xf32>
    %cst = arith.constant 0.000000e+00 : f32
    %3 = vector.broadcast %cst : f32 to vector<4x4xf32>
    %4 = tpu.concatenate %3, %0, %3 in 0 : vector<4x4xf32>, vector<32x4xf32>, vector<4x4xf32> -> vector<40x4xf32>
    %5 = vector.extract_strided_slice %4 {offsets = [0, 0], sizes = [32, 4], strides = [1, 1]} : vector<40x4xf32> to vector<32x4xf32>
    %6 = vector.extract_strided_slice %4 {offsets = [2, 0], sizes = [32, 4], strides = [1, 1]} : vector<40x4xf32> to vector<32x4xf32>
    %7 = vector.extract_strided_slice %4 {offsets = [4, 0], sizes = [32, 4], strides = [1, 1]} : vector<40x4xf32> to vector<32x4xf32>
    %8 = vector.extract_strided_slice %4 {offsets = [6, 0], sizes = [32, 4], strides = [1, 1]} : vector<40x4xf32> to vector<32x4xf32>
    %9 = vector.extract_strided_slice %4 {offsets = [8, 0], sizes = [32, 4], strides = [1, 1]} : vector<40x4xf32> to vector<32x4xf32>
    %10 = tpu.concatenate %5, %6, %7, %8, %9 in 1 : vector<32x4xf32>, vector<32x4xf32>, vector<32x4xf32>, vector<32x4xf32>, vector<32x4xf32> -> vector<32x20xf32>
    %11 = arith.truncf %10 : vector<32x20xf32> to vector<32x20xbf16>
    %cst_5 = arith.constant dense<0.000000e+00> : vector<32x32xf32>
    %12 = tpu.matmul %11, %1, %cst_5 {dimension_numbers = #tpu.dot_dimension_numbers<[1], [0], [0], [1], [0, 0, 1, 1], [], []>} : vector<32x20xbf16>, vector<20x32xbf16>, vector<32x32xf32> -> vector<32x32xf32>
    %13 = vector.broadcast %2 : vector<1x32xf32> to vector<32x32xf32>
    %14 = arith.addf %12, %13 : vector<32x32xf32>
    %cst_6 = arith.constant 0.000000e+00 : f32
    %15 = vector.broadcast %cst_6 : f32 to vector<32x32xf32>
    %16 = arith.maximumf %14, %15 : vector<32x32xf32>
    %c0_7 = arith.constant 0 : index
    %c0_8 = arith.constant 0 : index
    %17 = vector.load %arg3[%c0_7, %c0_8] : memref<160x64xbf16, #tpu.memory_space<vmem>>, vector<160x64xbf16>
    %c0_9 = arith.constant 0 : index
    %c0_10 = arith.constant 0 : index
    %18 = vector.load %arg4[%c0_9, %c0_10] : memref<1x64xf32, #tpu.memory_space<vmem>>, vector<1x64xf32>
    %cst_11 = arith.constant 0.000000e+00 : f32
    %19 = vector.broadcast %cst_11 : f32 to vector<4x32xf32>
    %20 = tpu.concatenate %19, %16, %19 in 0 : vector<4x32xf32>, vector<32x32xf32>, vector<4x32xf32> -> vector<40x32xf32>
    %21 = vector.extract_strided_slice %20 {offsets = [0, 0], sizes = [32, 32], strides = [1, 1]} : vector<40x32xf32> to vector<32x32xf32>
    %22 = vector.extract_strided_slice %20 {offsets = [2, 0], sizes = [32, 32], strides = [1, 1]} : vector<40x32xf32> to vector<32x32xf32>
    %23 = vector.extract_strided_slice %20 {offsets = [4, 0], sizes = [32, 32], strides = [1, 1]} : vector<40x32xf32> to vector<32x32xf32>
    %24 = vector.extract_strided_slice %20 {offsets = [6, 0], sizes = [32, 32], strides = [1, 1]} : vector<40x32xf32> to vector<32x32xf32>
    %25 = vector.extract_strided_slice %20 {offsets = [8, 0], sizes = [32, 32], strides = [1, 1]} : vector<40x32xf32> to vector<32x32xf32>
    %26 = tpu.concatenate %21, %22, %23, %24, %25 in 1 : vector<32x32xf32>, vector<32x32xf32>, vector<32x32xf32>, vector<32x32xf32>, vector<32x32xf32> -> vector<32x160xf32>
    %27 = arith.truncf %26 : vector<32x160xf32> to vector<32x160xbf16>
    %cst_12 = arith.constant dense<0.000000e+00> : vector<32x64xf32>
    %28 = tpu.matmul %27, %17, %cst_12 {dimension_numbers = #tpu.dot_dimension_numbers<[1], [0], [0], [1], [0, 0, 1, 1], [], []>} : vector<32x160xbf16>, vector<160x64xbf16>, vector<32x64xf32> -> vector<32x64xf32>
    %29 = vector.broadcast %18 : vector<1x64xf32> to vector<32x64xf32>
    %30 = arith.addf %28, %29 : vector<32x64xf32>
    %cst_13 = arith.constant 0.000000e+00 : f32
    %31 = vector.broadcast %cst_13 : f32 to vector<32x64xf32>
    %32 = arith.maximumf %30, %31 : vector<32x64xf32>
    %c0_14 = arith.constant 0 : index
    %c0_15 = arith.constant 0 : index
    %c0_16 = arith.constant 0 : index
    %33 = vector.load %arg5[%c0_14, %c0_15, %c0_16] : memref<6x1x64xf32, #tpu.memory_space<vmem>>, vector<1x1x64xf32>
    %34 = vector.shape_cast %33 : vector<1x1x64xf32> to vector<1x64xf32>
    %c0_17 = arith.constant 0 : index
    %c0_18 = arith.constant 0 : index
    %c0_19 = arith.constant 0 : index
    %35 = vector.load %arg6[%c0_17, %c0_18, %c0_19] : memref<6x1x64xf32, #tpu.memory_space<vmem>>, vector<1x1x64xf32>
    %36 = vector.shape_cast %35 : vector<1x1x64xf32> to vector<1x64xf32>
    %cst_20 = arith.constant dense<0.000000e+00> : vector<64xf32>
    %37 = vector.multi_reduction <add>, %32, %cst_20 [0] : vector<32x64xf32> to vector<64xf32>
    %38 = vector.shape_cast %37 : vector<64xf32> to vector<1x64xf32>
    %cst_21 = arith.constant 3.125000e-02 : f32
    %39 = vector.broadcast %cst_21 : f32 to vector<1x64xf32>
    %40 = arith.mulf %38, %39 : vector<1x64xf32>
    %41 = vector.broadcast %40 : vector<1x64xf32> to vector<32x64xf32>
    %42 = arith.subf %32, %41 : vector<32x64xf32>
    %43 = arith.mulf %42, %42 : vector<32x64xf32>
    %cst_22 = arith.constant dense<0.000000e+00> : vector<64xf32>
    %44 = vector.multi_reduction <add>, %43, %cst_22 [0] : vector<32x64xf32> to vector<64xf32>
    %45 = vector.shape_cast %44 : vector<64xf32> to vector<1x64xf32>
    %cst_23 = arith.constant 3.125000e-02 : f32
    %46 = vector.broadcast %cst_23 : f32 to vector<1x64xf32>
    %47 = arith.mulf %45, %46 : vector<1x64xf32>
    %cst_24 = arith.constant 9.99999974E-6 : f32
    %48 = vector.broadcast %cst_24 : f32 to vector<1x64xf32>
    %49 = arith.addf %47, %48 : vector<1x64xf32>
    %50 = math.rsqrt %49 : vector<1x64xf32>
    %51 = arith.mulf %50, %34 : vector<1x64xf32>
    %52 = vector.broadcast %51 : vector<1x64xf32> to vector<32x64xf32>
    %53 = arith.mulf %42, %52 : vector<32x64xf32>
    %54 = vector.broadcast %36 : vector<1x64xf32> to vector<32x64xf32>
    %55 = arith.addf %53, %54 : vector<32x64xf32>
    %cst_25 = arith.constant 0.000000e+00 : f32
    %56 = vector.broadcast %cst_25 : f32 to vector<32x64xf32>
    %57 = arith.maximumf %55, %56 : vector<32x64xf32>
    %c0_26 = arith.constant 0 : index
    %c0_27 = arith.constant 0 : index
    %c0_28 = arith.constant 0 : index
    %58 = vector.load %arg7[%c0_26, %c0_27, %c0_28] : memref<6x704x64xbf16, #tpu.memory_space<vmem>>, vector<1x704x64xbf16>
    %59 = vector.shape_cast %58 : vector<1x704x64xbf16> to vector<704x64xbf16>
    %c0_29 = arith.constant 0 : index
    %c0_30 = arith.constant 0 : index
    %c0_31 = arith.constant 0 : index
    %60 = vector.load %arg8[%c0_29, %c0_30, %c0_31] : memref<6x1x64xf32, #tpu.memory_space<vmem>>, vector<1x1x64xf32>
    %61 = vector.shape_cast %60 : vector<1x1x64xf32> to vector<1x64xf32>
    %cst_32 = arith.constant 0.000000e+00 : f32
    %62 = vector.broadcast %cst_32 : f32 to vector<10x64xf32>
    %63 = tpu.concatenate %62, %57, %62 in 0 : vector<10x64xf32>, vector<32x64xf32>, vector<10x64xf32> -> vector<52x64xf32>
    %64 = vector.extract_strided_slice %63 {offsets = [0, 0], sizes = [32, 64], strides = [1, 1]} : vector<52x64xf32> to vector<32x64xf32>
    %65 = vector.extract_strided_slice %63 {offsets = [2, 0], sizes = [32, 64], strides = [1, 1]} : vector<52x64xf32> to vector<32x64xf32>
    %66 = vector.extract_strided_slice %63 {offsets = [4, 0], sizes = [32, 64], strides = [1, 1]} : vector<52x64xf32> to vector<32x64xf32>
    %67 = vector.extract_strided_slice %63 {offsets = [6, 0], sizes = [32, 64], strides = [1, 1]} : vector<52x64xf32> to vector<32x64xf32>
    %68 = vector.extract_strided_slice %63 {offsets = [8, 0], sizes = [32, 64], strides = [1, 1]} : vector<52x64xf32> to vector<32x64xf32>
    %69 = vector.extract_strided_slice %63 {offsets = [10, 0], sizes = [32, 64], strides = [1, 1]} : vector<52x64xf32> to vector<32x64xf32>
    %70 = vector.extract_strided_slice %63 {offsets = [12, 0], sizes = [32, 64], strides = [1, 1]} : vector<52x64xf32> to vector<32x64xf32>
    %71 = vector.extract_strided_slice %63 {offsets = [14, 0], sizes = [32, 64], strides = [1, 1]} : vector<52x64xf32> to vector<32x64xf32>
    %72 = vector.extract_strided_slice %63 {offsets = [16, 0], sizes = [32, 64], strides = [1, 1]} : vector<52x64xf32> to vector<32x64xf32>
    %73 = vector.extract_strided_slice %63 {offsets = [18, 0], sizes = [32, 64], strides = [1, 1]} : vector<52x64xf32> to vector<32x64xf32>
    %74 = vector.extract_strided_slice %63 {offsets = [20, 0], sizes = [32, 64], strides = [1, 1]} : vector<52x64xf32> to vector<32x64xf32>
    %75 = tpu.concatenate %64, %65, %66, %67, %68, %69, %70, %71, %72, %73, %74 in 1 : vector<32x64xf32>, vector<32x64xf32>, vector<32x64xf32>, vector<32x64xf32>, vector<32x64xf32>, vector<32x64xf32>, vector<32x64xf32>, vector<32x64xf32>, vector<32x64xf32>, vector<32x64xf32>, vector<32x64xf32> -> vector<32x704xf32>
    %76 = arith.truncf %75 : vector<32x704xf32> to vector<32x704xbf16>
    %cst_33 = arith.constant dense<0.000000e+00> : vector<32x64xf32>
    %77 = tpu.matmul %76, %59, %cst_33 {dimension_numbers = #tpu.dot_dimension_numbers<[1], [0], [0], [1], [0, 0, 1, 1], [], []>} : vector<32x704xbf16>, vector<704x64xbf16>, vector<32x64xf32> -> vector<32x64xf32>
    %78 = vector.broadcast %61 : vector<1x64xf32> to vector<32x64xf32>
    %79 = arith.addf %77, %78 : vector<32x64xf32>
    %c1 = arith.constant 1 : index
    %c0_34 = arith.constant 0 : index
    %c0_35 = arith.constant 0 : index
    %80 = vector.load %arg5[%c1, %c0_34, %c0_35] : memref<6x1x64xf32, #tpu.memory_space<vmem>>, vector<1x1x64xf32>
    %81 = vector.shape_cast %80 : vector<1x1x64xf32> to vector<1x64xf32>
    %c1_36 = arith.constant 1 : index
    %c0_37 = arith.constant 0 : index
    %c0_38 = arith.constant 0 : index
    %82 = vector.load %arg6[%c1_36, %c0_37, %c0_38] : memref<6x1x64xf32, #tpu.memory_space<vmem>>, vector<1x1x64xf32>
    %83 = vector.shape_cast %82 : vector<1x1x64xf32> to vector<1x64xf32>
    %cst_39 = arith.constant dense<0.000000e+00> : vector<64xf32>
    %84 = vector.multi_reduction <add>, %79, %cst_39 [0] : vector<32x64xf32> to vector<64xf32>
    %85 = vector.shape_cast %84 : vector<64xf32> to vector<1x64xf32>
    %cst_40 = arith.constant 3.125000e-02 : f32
    %86 = vector.broadcast %cst_40 : f32 to vector<1x64xf32>
    %87 = arith.mulf %85, %86 : vector<1x64xf32>
    %88 = vector.broadcast %87 : vector<1x64xf32> to vector<32x64xf32>
    %89 = arith.subf %79, %88 : vector<32x64xf32>
    %90 = arith.mulf %89, %89 : vector<32x64xf32>
    %cst_41 = arith.constant dense<0.000000e+00> : vector<64xf32>
    %91 = vector.multi_reduction <add>, %90, %cst_41 [0] : vector<32x64xf32> to vector<64xf32>
    %92 = vector.shape_cast %91 : vector<64xf32> to vector<1x64xf32>
    %cst_42 = arith.constant 3.125000e-02 : f32
    %93 = vector.broadcast %cst_42 : f32 to vector<1x64xf32>
    %94 = arith.mulf %92, %93 : vector<1x64xf32>
    %cst_43 = arith.constant 9.99999974E-6 : f32
    %95 = vector.broadcast %cst_43 : f32 to vector<1x64xf32>
    %96 = arith.addf %94, %95 : vector<1x64xf32>
    %97 = math.rsqrt %96 : vector<1x64xf32>
    %98 = arith.mulf %97, %81 : vector<1x64xf32>
    %99 = vector.broadcast %98 : vector<1x64xf32> to vector<32x64xf32>
    %100 = arith.mulf %89, %99 : vector<32x64xf32>
    %101 = vector.broadcast %83 : vector<1x64xf32> to vector<32x64xf32>
    %102 = arith.addf %100, %101 : vector<32x64xf32>
    %cst_44 = arith.constant 0.000000e+00 : f32
    %103 = vector.broadcast %cst_44 : f32 to vector<32x64xf32>
    %104 = arith.maximumf %102, %103 : vector<32x64xf32>
    %c1_45 = arith.constant 1 : index
    %c0_46 = arith.constant 0 : index
    %c0_47 = arith.constant 0 : index
    %105 = vector.load %arg7[%c1_45, %c0_46, %c0_47] : memref<6x704x64xbf16, #tpu.memory_space<vmem>>, vector<1x704x64xbf16>
    %106 = vector.shape_cast %105 : vector<1x704x64xbf16> to vector<704x64xbf16>
    %c1_48 = arith.constant 1 : index
    %c0_49 = arith.constant 0 : index
    %c0_50 = arith.constant 0 : index
    %107 = vector.load %arg8[%c1_48, %c0_49, %c0_50] : memref<6x1x64xf32, #tpu.memory_space<vmem>>, vector<1x1x64xf32>
    %108 = vector.shape_cast %107 : vector<1x1x64xf32> to vector<1x64xf32>
    %cst_51 = arith.constant 0.000000e+00 : f32
    %109 = vector.broadcast %cst_51 : f32 to vector<10x64xf32>
    %110 = tpu.concatenate %109, %104, %109 in 0 : vector<10x64xf32>, vector<32x64xf32>, vector<10x64xf32> -> vector<52x64xf32>
    %111 = vector.extract_strided_slice %110 {offsets = [0, 0], sizes = [32, 64], strides = [1, 1]} : vector<52x64xf32> to vector<32x64xf32>
    %112 = vector.extract_strided_slice %110 {offsets = [2, 0], sizes = [32, 64], strides = [1, 1]} : vector<52x64xf32> to vector<32x64xf32>
    %113 = vector.extract_strided_slice %110 {offsets = [4, 0], sizes = [32, 64], strides = [1, 1]} : vector<52x64xf32> to vector<32x64xf32>
    %114 = vector.extract_strided_slice %110 {offsets = [6, 0], sizes = [32, 64], strides = [1, 1]} : vector<52x64xf32> to vector<32x64xf32>
    %115 = vector.extract_strided_slice %110 {offsets = [8, 0], sizes = [32, 64], strides = [1, 1]} : vector<52x64xf32> to vector<32x64xf32>
    %116 = vector.extract_strided_slice %110 {offsets = [10, 0], sizes = [32, 64], strides = [1, 1]} : vector<52x64xf32> to vector<32x64xf32>
    %117 = vector.extract_strided_slice %110 {offsets = [12, 0], sizes = [32, 64], strides = [1, 1]} : vector<52x64xf32> to vector<32x64xf32>
    %118 = vector.extract_strided_slice %110 {offsets = [14, 0], sizes = [32, 64], strides = [1, 1]} : vector<52x64xf32> to vector<32x64xf32>
    %119 = vector.extract_strided_slice %110 {offsets = [16, 0], sizes = [32, 64], strides = [1, 1]} : vector<52x64xf32> to vector<32x64xf32>
    %120 = vector.extract_strided_slice %110 {offsets = [18, 0], sizes = [32, 64], strides = [1, 1]} : vector<52x64xf32> to vector<32x64xf32>
    %121 = vector.extract_strided_slice %110 {offsets = [20, 0], sizes = [32, 64], strides = [1, 1]} : vector<52x64xf32> to vector<32x64xf32>
    %122 = tpu.concatenate %111, %112, %113, %114, %115, %116, %117, %118, %119, %120, %121 in 1 : vector<32x64xf32>, vector<32x64xf32>, vector<32x64xf32>, vector<32x64xf32>, vector<32x64xf32>, vector<32x64xf32>, vector<32x64xf32>, vector<32x64xf32>, vector<32x64xf32>, vector<32x64xf32>, vector<32x64xf32> -> vector<32x704xf32>
    %123 = arith.truncf %122 : vector<32x704xf32> to vector<32x704xbf16>
    %cst_52 = arith.constant dense<0.000000e+00> : vector<32x64xf32>
    %124 = tpu.matmul %123, %106, %cst_52 {dimension_numbers = #tpu.dot_dimension_numbers<[1], [0], [0], [1], [0, 0, 1, 1], [], []>} : vector<32x704xbf16>, vector<704x64xbf16>, vector<32x64xf32> -> vector<32x64xf32>
    %125 = vector.broadcast %108 : vector<1x64xf32> to vector<32x64xf32>
    %126 = arith.addf %124, %125 : vector<32x64xf32>
    %127 = arith.addf %126, %32 : vector<32x64xf32>
    %c2 = arith.constant 2 : index
    %c0_53 = arith.constant 0 : index
    %c0_54 = arith.constant 0 : index
    %128 = vector.load %arg5[%c2, %c0_53, %c0_54] : memref<6x1x64xf32, #tpu.memory_space<vmem>>, vector<1x1x64xf32>
    %129 = vector.shape_cast %128 : vector<1x1x64xf32> to vector<1x64xf32>
    %c2_55 = arith.constant 2 : index
    %c0_56 = arith.constant 0 : index
    %c0_57 = arith.constant 0 : index
    %130 = vector.load %arg6[%c2_55, %c0_56, %c0_57] : memref<6x1x64xf32, #tpu.memory_space<vmem>>, vector<1x1x64xf32>
    %131 = vector.shape_cast %130 : vector<1x1x64xf32> to vector<1x64xf32>
    %cst_58 = arith.constant dense<0.000000e+00> : vector<64xf32>
    %132 = vector.multi_reduction <add>, %127, %cst_58 [0] : vector<32x64xf32> to vector<64xf32>
    %133 = vector.shape_cast %132 : vector<64xf32> to vector<1x64xf32>
    %cst_59 = arith.constant 3.125000e-02 : f32
    %134 = vector.broadcast %cst_59 : f32 to vector<1x64xf32>
    %135 = arith.mulf %133, %134 : vector<1x64xf32>
    %136 = vector.broadcast %135 : vector<1x64xf32> to vector<32x64xf32>
    %137 = arith.subf %127, %136 : vector<32x64xf32>
    %138 = arith.mulf %137, %137 : vector<32x64xf32>
    %cst_60 = arith.constant dense<0.000000e+00> : vector<64xf32>
    %139 = vector.multi_reduction <add>, %138, %cst_60 [0] : vector<32x64xf32> to vector<64xf32>
    %140 = vector.shape_cast %139 : vector<64xf32> to vector<1x64xf32>
    %cst_61 = arith.constant 3.125000e-02 : f32
    %141 = vector.broadcast %cst_61 : f32 to vector<1x64xf32>
    %142 = arith.mulf %140, %141 : vector<1x64xf32>
    %cst_62 = arith.constant 9.99999974E-6 : f32
    %143 = vector.broadcast %cst_62 : f32 to vector<1x64xf32>
    %144 = arith.addf %142, %143 : vector<1x64xf32>
    %145 = math.rsqrt %144 : vector<1x64xf32>
    %146 = arith.mulf %145, %129 : vector<1x64xf32>
    %147 = vector.broadcast %146 : vector<1x64xf32> to vector<32x64xf32>
    %148 = arith.mulf %137, %147 : vector<32x64xf32>
    %149 = vector.broadcast %131 : vector<1x64xf32> to vector<32x64xf32>
    %150 = arith.addf %148, %149 : vector<32x64xf32>
    %cst_63 = arith.constant 0.000000e+00 : f32
    %151 = vector.broadcast %cst_63 : f32 to vector<32x64xf32>
    %152 = arith.maximumf %150, %151 : vector<32x64xf32>
    %c2_64 = arith.constant 2 : index
    %c0_65 = arith.constant 0 : index
    %c0_66 = arith.constant 0 : index
    %153 = vector.load %arg7[%c2_64, %c0_65, %c0_66] : memref<6x704x64xbf16, #tpu.memory_space<vmem>>, vector<1x704x64xbf16>
    %154 = vector.shape_cast %153 : vector<1x704x64xbf16> to vector<704x64xbf16>
    %c2_67 = arith.constant 2 : index
    %c0_68 = arith.constant 0 : index
    %c0_69 = arith.constant 0 : index
    %155 = vector.load %arg8[%c2_67, %c0_68, %c0_69] : memref<6x1x64xf32, #tpu.memory_space<vmem>>, vector<1x1x64xf32>
    %156 = vector.shape_cast %155 : vector<1x1x64xf32> to vector<1x64xf32>
    %cst_70 = arith.constant 0.000000e+00 : f32
    %157 = vector.broadcast %cst_70 : f32 to vector<10x64xf32>
    %158 = tpu.concatenate %157, %152, %157 in 0 : vector<10x64xf32>, vector<32x64xf32>, vector<10x64xf32> -> vector<52x64xf32>
    %159 = vector.extract_strided_slice %158 {offsets = [0, 0], sizes = [32, 64], strides = [1, 1]} : vector<52x64xf32> to vector<32x64xf32>
    %160 = vector.extract_strided_slice %158 {offsets = [2, 0], sizes = [32, 64], strides = [1, 1]} : vector<52x64xf32> to vector<32x64xf32>
    %161 = vector.extract_strided_slice %158 {offsets = [4, 0], sizes = [32, 64], strides = [1, 1]} : vector<52x64xf32> to vector<32x64xf32>
    %162 = vector.extract_strided_slice %158 {offsets = [6, 0], sizes = [32, 64], strides = [1, 1]} : vector<52x64xf32> to vector<32x64xf32>
    %163 = vector.extract_strided_slice %158 {offsets = [8, 0], sizes = [32, 64], strides = [1, 1]} : vector<52x64xf32> to vector<32x64xf32>
    %164 = vector.extract_strided_slice %158 {offsets = [10, 0], sizes = [32, 64], strides = [1, 1]} : vector<52x64xf32> to vector<32x64xf32>
    %165 = vector.extract_strided_slice %158 {offsets = [12, 0], sizes = [32, 64], strides = [1, 1]} : vector<52x64xf32> to vector<32x64xf32>
    %166 = vector.extract_strided_slice %158 {offsets = [14, 0], sizes = [32, 64], strides = [1, 1]} : vector<52x64xf32> to vector<32x64xf32>
    %167 = vector.extract_strided_slice %158 {offsets = [16, 0], sizes = [32, 64], strides = [1, 1]} : vector<52x64xf32> to vector<32x64xf32>
    %168 = vector.extract_strided_slice %158 {offsets = [18, 0], sizes = [32, 64], strides = [1, 1]} : vector<52x64xf32> to vector<32x64xf32>
    %169 = vector.extract_strided_slice %158 {offsets = [20, 0], sizes = [32, 64], strides = [1, 1]} : vector<52x64xf32> to vector<32x64xf32>
    %170 = tpu.concatenate %159, %160, %161, %162, %163, %164, %165, %166, %167, %168, %169 in 1 : vector<32x64xf32>, vector<32x64xf32>, vector<32x64xf32>, vector<32x64xf32>, vector<32x64xf32>, vector<32x64xf32>, vector<32x64xf32>, vector<32x64xf32>, vector<32x64xf32>, vector<32x64xf32>, vector<32x64xf32> -> vector<32x704xf32>
    %171 = arith.truncf %170 : vector<32x704xf32> to vector<32x704xbf16>
    %cst_71 = arith.constant dense<0.000000e+00> : vector<32x64xf32>
    %172 = tpu.matmul %171, %154, %cst_71 {dimension_numbers = #tpu.dot_dimension_numbers<[1], [0], [0], [1], [0, 0, 1, 1], [], []>} : vector<32x704xbf16>, vector<704x64xbf16>, vector<32x64xf32> -> vector<32x64xf32>
    %173 = vector.broadcast %156 : vector<1x64xf32> to vector<32x64xf32>
    %174 = arith.addf %172, %173 : vector<32x64xf32>
    %c3 = arith.constant 3 : index
    %c0_72 = arith.constant 0 : index
    %c0_73 = arith.constant 0 : index
    %175 = vector.load %arg5[%c3, %c0_72, %c0_73] : memref<6x1x64xf32, #tpu.memory_space<vmem>>, vector<1x1x64xf32>
    %176 = vector.shape_cast %175 : vector<1x1x64xf32> to vector<1x64xf32>
    %c3_74 = arith.constant 3 : index
    %c0_75 = arith.constant 0 : index
    %c0_76 = arith.constant 0 : index
    %177 = vector.load %arg6[%c3_74, %c0_75, %c0_76] : memref<6x1x64xf32, #tpu.memory_space<vmem>>, vector<1x1x64xf32>
    %178 = vector.shape_cast %177 : vector<1x1x64xf32> to vector<1x64xf32>
    %cst_77 = arith.constant dense<0.000000e+00> : vector<64xf32>
    %179 = vector.multi_reduction <add>, %174, %cst_77 [0] : vector<32x64xf32> to vector<64xf32>
    %180 = vector.shape_cast %179 : vector<64xf32> to vector<1x64xf32>
    %cst_78 = arith.constant 3.125000e-02 : f32
    %181 = vector.broadcast %cst_78 : f32 to vector<1x64xf32>
    %182 = arith.mulf %180, %181 : vector<1x64xf32>
    %183 = vector.broadcast %182 : vector<1x64xf32> to vector<32x64xf32>
    %184 = arith.subf %174, %183 : vector<32x64xf32>
    %185 = arith.mulf %184, %184 : vector<32x64xf32>
    %cst_79 = arith.constant dense<0.000000e+00> : vector<64xf32>
    %186 = vector.multi_reduction <add>, %185, %cst_79 [0] : vector<32x64xf32> to vector<64xf32>
    %187 = vector.shape_cast %186 : vector<64xf32> to vector<1x64xf32>
    %cst_80 = arith.constant 3.125000e-02 : f32
    %188 = vector.broadcast %cst_80 : f32 to vector<1x64xf32>
    %189 = arith.mulf %187, %188 : vector<1x64xf32>
    %cst_81 = arith.constant 9.99999974E-6 : f32
    %190 = vector.broadcast %cst_81 : f32 to vector<1x64xf32>
    %191 = arith.addf %189, %190 : vector<1x64xf32>
    %192 = math.rsqrt %191 : vector<1x64xf32>
    %193 = arith.mulf %192, %176 : vector<1x64xf32>
    %194 = vector.broadcast %193 : vector<1x64xf32> to vector<32x64xf32>
    %195 = arith.mulf %184, %194 : vector<32x64xf32>
    %196 = vector.broadcast %178 : vector<1x64xf32> to vector<32x64xf32>
    %197 = arith.addf %195, %196 : vector<32x64xf32>
    %cst_82 = arith.constant 0.000000e+00 : f32
    %198 = vector.broadcast %cst_82 : f32 to vector<32x64xf32>
    %199 = arith.maximumf %197, %198 : vector<32x64xf32>
    %c3_83 = arith.constant 3 : index
    %c0_84 = arith.constant 0 : index
    %c0_85 = arith.constant 0 : index
    %200 = vector.load %arg7[%c3_83, %c0_84, %c0_85] : memref<6x704x64xbf16, #tpu.memory_space<vmem>>, vector<1x704x64xbf16>
    %201 = vector.shape_cast %200 : vector<1x704x64xbf16> to vector<704x64xbf16>
    %c3_86 = arith.constant 3 : index
    %c0_87 = arith.constant 0 : index
    %c0_88 = arith.constant 0 : index
    %202 = vector.load %arg8[%c3_86, %c0_87, %c0_88] : memref<6x1x64xf32, #tpu.memory_space<vmem>>, vector<1x1x64xf32>
    %203 = vector.shape_cast %202 : vector<1x1x64xf32> to vector<1x64xf32>
    %cst_89 = arith.constant 0.000000e+00 : f32
    %204 = vector.broadcast %cst_89 : f32 to vector<10x64xf32>
    %205 = tpu.concatenate %204, %199, %204 in 0 : vector<10x64xf32>, vector<32x64xf32>, vector<10x64xf32> -> vector<52x64xf32>
    %206 = vector.extract_strided_slice %205 {offsets = [0, 0], sizes = [32, 64], strides = [1, 1]} : vector<52x64xf32> to vector<32x64xf32>
    %207 = vector.extract_strided_slice %205 {offsets = [2, 0], sizes = [32, 64], strides = [1, 1]} : vector<52x64xf32> to vector<32x64xf32>
    %208 = vector.extract_strided_slice %205 {offsets = [4, 0], sizes = [32, 64], strides = [1, 1]} : vector<52x64xf32> to vector<32x64xf32>
    %209 = vector.extract_strided_slice %205 {offsets = [6, 0], sizes = [32, 64], strides = [1, 1]} : vector<52x64xf32> to vector<32x64xf32>
    %210 = vector.extract_strided_slice %205 {offsets = [8, 0], sizes = [32, 64], strides = [1, 1]} : vector<52x64xf32> to vector<32x64xf32>
    %211 = vector.extract_strided_slice %205 {offsets = [10, 0], sizes = [32, 64], strides = [1, 1]} : vector<52x64xf32> to vector<32x64xf32>
    %212 = vector.extract_strided_slice %205 {offsets = [12, 0], sizes = [32, 64], strides = [1, 1]} : vector<52x64xf32> to vector<32x64xf32>
    %213 = vector.extract_strided_slice %205 {offsets = [14, 0], sizes = [32, 64], strides = [1, 1]} : vector<52x64xf32> to vector<32x64xf32>
    %214 = vector.extract_strided_slice %205 {offsets = [16, 0], sizes = [32, 64], strides = [1, 1]} : vector<52x64xf32> to vector<32x64xf32>
    %215 = vector.extract_strided_slice %205 {offsets = [18, 0], sizes = [32, 64], strides = [1, 1]} : vector<52x64xf32> to vector<32x64xf32>
    %216 = vector.extract_strided_slice %205 {offsets = [20, 0], sizes = [32, 64], strides = [1, 1]} : vector<52x64xf32> to vector<32x64xf32>
    %217 = tpu.concatenate %206, %207, %208, %209, %210, %211, %212, %213, %214, %215, %216 in 1 : vector<32x64xf32>, vector<32x64xf32>, vector<32x64xf32>, vector<32x64xf32>, vector<32x64xf32>, vector<32x64xf32>, vector<32x64xf32>, vector<32x64xf32>, vector<32x64xf32>, vector<32x64xf32>, vector<32x64xf32> -> vector<32x704xf32>
    %218 = arith.truncf %217 : vector<32x704xf32> to vector<32x704xbf16>
    %cst_90 = arith.constant dense<0.000000e+00> : vector<32x64xf32>
    %219 = tpu.matmul %218, %201, %cst_90 {dimension_numbers = #tpu.dot_dimension_numbers<[1], [0], [0], [1], [0, 0, 1, 1], [], []>} : vector<32x704xbf16>, vector<704x64xbf16>, vector<32x64xf32> -> vector<32x64xf32>
    %220 = vector.broadcast %203 : vector<1x64xf32> to vector<32x64xf32>
    %221 = arith.addf %219, %220 : vector<32x64xf32>
    %222 = arith.addf %221, %127 : vector<32x64xf32>
    %c4 = arith.constant 4 : index
    %c0_91 = arith.constant 0 : index
    %c0_92 = arith.constant 0 : index
    %223 = vector.load %arg5[%c4, %c0_91, %c0_92] : memref<6x1x64xf32, #tpu.memory_space<vmem>>, vector<1x1x64xf32>
    %224 = vector.shape_cast %223 : vector<1x1x64xf32> to vector<1x64xf32>
    %c4_93 = arith.constant 4 : index
    %c0_94 = arith.constant 0 : index
    %c0_95 = arith.constant 0 : index
    %225 = vector.load %arg6[%c4_93, %c0_94, %c0_95] : memref<6x1x64xf32, #tpu.memory_space<vmem>>, vector<1x1x64xf32>
    %226 = vector.shape_cast %225 : vector<1x1x64xf32> to vector<1x64xf32>
    %cst_96 = arith.constant dense<0.000000e+00> : vector<64xf32>
    %227 = vector.multi_reduction <add>, %222, %cst_96 [0] : vector<32x64xf32> to vector<64xf32>
    %228 = vector.shape_cast %227 : vector<64xf32> to vector<1x64xf32>
    %cst_97 = arith.constant 3.125000e-02 : f32
    %229 = vector.broadcast %cst_97 : f32 to vector<1x64xf32>
    %230 = arith.mulf %228, %229 : vector<1x64xf32>
    %231 = vector.broadcast %230 : vector<1x64xf32> to vector<32x64xf32>
    %232 = arith.subf %222, %231 : vector<32x64xf32>
    %233 = arith.mulf %232, %232 : vector<32x64xf32>
    %cst_98 = arith.constant dense<0.000000e+00> : vector<64xf32>
    %234 = vector.multi_reduction <add>, %233, %cst_98 [0] : vector<32x64xf32> to vector<64xf32>
    %235 = vector.shape_cast %234 : vector<64xf32> to vector<1x64xf32>
    %cst_99 = arith.constant 3.125000e-02 : f32
    %236 = vector.broadcast %cst_99 : f32 to vector<1x64xf32>
    %237 = arith.mulf %235, %236 : vector<1x64xf32>
    %cst_100 = arith.constant 9.99999974E-6 : f32
    %238 = vector.broadcast %cst_100 : f32 to vector<1x64xf32>
    %239 = arith.addf %237, %238 : vector<1x64xf32>
    %240 = math.rsqrt %239 : vector<1x64xf32>
    %241 = arith.mulf %240, %224 : vector<1x64xf32>
    %242 = vector.broadcast %241 : vector<1x64xf32> to vector<32x64xf32>
    %243 = arith.mulf %232, %242 : vector<32x64xf32>
    %244 = vector.broadcast %226 : vector<1x64xf32> to vector<32x64xf32>
    %245 = arith.addf %243, %244 : vector<32x64xf32>
    %cst_101 = arith.constant 0.000000e+00 : f32
    %246 = vector.broadcast %cst_101 : f32 to vector<32x64xf32>
    %247 = arith.maximumf %245, %246 : vector<32x64xf32>
    %c4_102 = arith.constant 4 : index
    %c0_103 = arith.constant 0 : index
    %c0_104 = arith.constant 0 : index
    %248 = vector.load %arg7[%c4_102, %c0_103, %c0_104] : memref<6x704x64xbf16, #tpu.memory_space<vmem>>, vector<1x704x64xbf16>
    %249 = vector.shape_cast %248 : vector<1x704x64xbf16> to vector<704x64xbf16>
    %c4_105 = arith.constant 4 : index
    %c0_106 = arith.constant 0 : index
    %c0_107 = arith.constant 0 : index
    %250 = vector.load %arg8[%c4_105, %c0_106, %c0_107] : memref<6x1x64xf32, #tpu.memory_space<vmem>>, vector<1x1x64xf32>
    %251 = vector.shape_cast %250 : vector<1x1x64xf32> to vector<1x64xf32>
    %cst_108 = arith.constant 0.000000e+00 : f32
    %252 = vector.broadcast %cst_108 : f32 to vector<10x64xf32>
    %253 = tpu.concatenate %252, %247, %252 in 0 : vector<10x64xf32>, vector<32x64xf32>, vector<10x64xf32> -> vector<52x64xf32>
    %254 = vector.extract_strided_slice %253 {offsets = [0, 0], sizes = [32, 64], strides = [1, 1]} : vector<52x64xf32> to vector<32x64xf32>
    %255 = vector.extract_strided_slice %253 {offsets = [2, 0], sizes = [32, 64], strides = [1, 1]} : vector<52x64xf32> to vector<32x64xf32>
    %256 = vector.extract_strided_slice %253 {offsets = [4, 0], sizes = [32, 64], strides = [1, 1]} : vector<52x64xf32> to vector<32x64xf32>
    %257 = vector.extract_strided_slice %253 {offsets = [6, 0], sizes = [32, 64], strides = [1, 1]} : vector<52x64xf32> to vector<32x64xf32>
    %258 = vector.extract_strided_slice %253 {offsets = [8, 0], sizes = [32, 64], strides = [1, 1]} : vector<52x64xf32> to vector<32x64xf32>
    %259 = vector.extract_strided_slice %253 {offsets = [10, 0], sizes = [32, 64], strides = [1, 1]} : vector<52x64xf32> to vector<32x64xf32>
    %260 = vector.extract_strided_slice %253 {offsets = [12, 0], sizes = [32, 64], strides = [1, 1]} : vector<52x64xf32> to vector<32x64xf32>
    %261 = vector.extract_strided_slice %253 {offsets = [14, 0], sizes = [32, 64], strides = [1, 1]} : vector<52x64xf32> to vector<32x64xf32>
    %262 = vector.extract_strided_slice %253 {offsets = [16, 0], sizes = [32, 64], strides = [1, 1]} : vector<52x64xf32> to vector<32x64xf32>
    %263 = vector.extract_strided_slice %253 {offsets = [18, 0], sizes = [32, 64], strides = [1, 1]} : vector<52x64xf32> to vector<32x64xf32>
    %264 = vector.extract_strided_slice %253 {offsets = [20, 0], sizes = [32, 64], strides = [1, 1]} : vector<52x64xf32> to vector<32x64xf32>
    %265 = tpu.concatenate %254, %255, %256, %257, %258, %259, %260, %261, %262, %263, %264 in 1 : vector<32x64xf32>, vector<32x64xf32>, vector<32x64xf32>, vector<32x64xf32>, vector<32x64xf32>, vector<32x64xf32>, vector<32x64xf32>, vector<32x64xf32>, vector<32x64xf32>, vector<32x64xf32>, vector<32x64xf32> -> vector<32x704xf32>
    %266 = arith.truncf %265 : vector<32x704xf32> to vector<32x704xbf16>
    %cst_109 = arith.constant dense<0.000000e+00> : vector<32x64xf32>
    %267 = tpu.matmul %266, %249, %cst_109 {dimension_numbers = #tpu.dot_dimension_numbers<[1], [0], [0], [1], [0, 0, 1, 1], [], []>} : vector<32x704xbf16>, vector<704x64xbf16>, vector<32x64xf32> -> vector<32x64xf32>
    %268 = vector.broadcast %251 : vector<1x64xf32> to vector<32x64xf32>
    %269 = arith.addf %267, %268 : vector<32x64xf32>
    %c5 = arith.constant 5 : index
    %c0_110 = arith.constant 0 : index
    %c0_111 = arith.constant 0 : index
    %270 = vector.load %arg5[%c5, %c0_110, %c0_111] : memref<6x1x64xf32, #tpu.memory_space<vmem>>, vector<1x1x64xf32>
    %271 = vector.shape_cast %270 : vector<1x1x64xf32> to vector<1x64xf32>
    %c5_112 = arith.constant 5 : index
    %c0_113 = arith.constant 0 : index
    %c0_114 = arith.constant 0 : index
    %272 = vector.load %arg6[%c5_112, %c0_113, %c0_114] : memref<6x1x64xf32, #tpu.memory_space<vmem>>, vector<1x1x64xf32>
    %273 = vector.shape_cast %272 : vector<1x1x64xf32> to vector<1x64xf32>
    %cst_115 = arith.constant dense<0.000000e+00> : vector<64xf32>
    %274 = vector.multi_reduction <add>, %269, %cst_115 [0] : vector<32x64xf32> to vector<64xf32>
    %275 = vector.shape_cast %274 : vector<64xf32> to vector<1x64xf32>
    %cst_116 = arith.constant 3.125000e-02 : f32
    %276 = vector.broadcast %cst_116 : f32 to vector<1x64xf32>
    %277 = arith.mulf %275, %276 : vector<1x64xf32>
    %278 = vector.broadcast %277 : vector<1x64xf32> to vector<32x64xf32>
    %279 = arith.subf %269, %278 : vector<32x64xf32>
    %280 = arith.mulf %279, %279 : vector<32x64xf32>
    %cst_117 = arith.constant dense<0.000000e+00> : vector<64xf32>
    %281 = vector.multi_reduction <add>, %280, %cst_117 [0] : vector<32x64xf32> to vector<64xf32>
    %282 = vector.shape_cast %281 : vector<64xf32> to vector<1x64xf32>
    %cst_118 = arith.constant 3.125000e-02 : f32
    %283 = vector.broadcast %cst_118 : f32 to vector<1x64xf32>
    %284 = arith.mulf %282, %283 : vector<1x64xf32>
    %cst_119 = arith.constant 9.99999974E-6 : f32
    %285 = vector.broadcast %cst_119 : f32 to vector<1x64xf32>
    %286 = arith.addf %284, %285 : vector<1x64xf32>
    %287 = math.rsqrt %286 : vector<1x64xf32>
    %288 = arith.mulf %287, %271 : vector<1x64xf32>
    %289 = vector.broadcast %288 : vector<1x64xf32> to vector<32x64xf32>
    %290 = arith.mulf %279, %289 : vector<32x64xf32>
    %291 = vector.broadcast %273 : vector<1x64xf32> to vector<32x64xf32>
    %292 = arith.addf %290, %291 : vector<32x64xf32>
    %cst_120 = arith.constant 0.000000e+00 : f32
    %293 = vector.broadcast %cst_120 : f32 to vector<32x64xf32>
    %294 = arith.maximumf %292, %293 : vector<32x64xf32>
    %c5_121 = arith.constant 5 : index
    %c0_122 = arith.constant 0 : index
    %c0_123 = arith.constant 0 : index
    %295 = vector.load %arg7[%c5_121, %c0_122, %c0_123] : memref<6x704x64xbf16, #tpu.memory_space<vmem>>, vector<1x704x64xbf16>
    %296 = vector.shape_cast %295 : vector<1x704x64xbf16> to vector<704x64xbf16>
    %c5_124 = arith.constant 5 : index
    %c0_125 = arith.constant 0 : index
    %c0_126 = arith.constant 0 : index
    %297 = vector.load %arg8[%c5_124, %c0_125, %c0_126] : memref<6x1x64xf32, #tpu.memory_space<vmem>>, vector<1x1x64xf32>
    %298 = vector.shape_cast %297 : vector<1x1x64xf32> to vector<1x64xf32>
    %cst_127 = arith.constant 0.000000e+00 : f32
    %299 = vector.broadcast %cst_127 : f32 to vector<10x64xf32>
    %300 = tpu.concatenate %299, %294, %299 in 0 : vector<10x64xf32>, vector<32x64xf32>, vector<10x64xf32> -> vector<52x64xf32>
    %301 = vector.extract_strided_slice %300 {offsets = [0, 0], sizes = [32, 64], strides = [1, 1]} : vector<52x64xf32> to vector<32x64xf32>
    %302 = vector.extract_strided_slice %300 {offsets = [2, 0], sizes = [32, 64], strides = [1, 1]} : vector<52x64xf32> to vector<32x64xf32>
    %303 = vector.extract_strided_slice %300 {offsets = [4, 0], sizes = [32, 64], strides = [1, 1]} : vector<52x64xf32> to vector<32x64xf32>
    %304 = vector.extract_strided_slice %300 {offsets = [6, 0], sizes = [32, 64], strides = [1, 1]} : vector<52x64xf32> to vector<32x64xf32>
    %305 = vector.extract_strided_slice %300 {offsets = [8, 0], sizes = [32, 64], strides = [1, 1]} : vector<52x64xf32> to vector<32x64xf32>
    %306 = vector.extract_strided_slice %300 {offsets = [10, 0], sizes = [32, 64], strides = [1, 1]} : vector<52x64xf32> to vector<32x64xf32>
    %307 = vector.extract_strided_slice %300 {offsets = [12, 0], sizes = [32, 64], strides = [1, 1]} : vector<52x64xf32> to vector<32x64xf32>
    %308 = vector.extract_strided_slice %300 {offsets = [14, 0], sizes = [32, 64], strides = [1, 1]} : vector<52x64xf32> to vector<32x64xf32>
    %309 = vector.extract_strided_slice %300 {offsets = [16, 0], sizes = [32, 64], strides = [1, 1]} : vector<52x64xf32> to vector<32x64xf32>
    %310 = vector.extract_strided_slice %300 {offsets = [18, 0], sizes = [32, 64], strides = [1, 1]} : vector<52x64xf32> to vector<32x64xf32>
    %311 = vector.extract_strided_slice %300 {offsets = [20, 0], sizes = [32, 64], strides = [1, 1]} : vector<52x64xf32> to vector<32x64xf32>
    %312 = tpu.concatenate %301, %302, %303, %304, %305, %306, %307, %308, %309, %310, %311 in 1 : vector<32x64xf32>, vector<32x64xf32>, vector<32x64xf32>, vector<32x64xf32>, vector<32x64xf32>, vector<32x64xf32>, vector<32x64xf32>, vector<32x64xf32>, vector<32x64xf32>, vector<32x64xf32>, vector<32x64xf32> -> vector<32x704xf32>
    %313 = arith.truncf %312 : vector<32x704xf32> to vector<32x704xbf16>
    %cst_128 = arith.constant dense<0.000000e+00> : vector<32x64xf32>
    %314 = tpu.matmul %313, %296, %cst_128 {dimension_numbers = #tpu.dot_dimension_numbers<[1], [0], [0], [1], [0, 0, 1, 1], [], []>} : vector<32x704xbf16>, vector<704x64xbf16>, vector<32x64xf32> -> vector<32x64xf32>
    %315 = vector.broadcast %298 : vector<1x64xf32> to vector<32x64xf32>
    %316 = arith.addf %314, %315 : vector<32x64xf32>
    %317 = arith.addf %316, %222 : vector<32x64xf32>
    %c0_i32 = arith.constant 0 : i32
    %c10_i32 = arith.constant 10 : i32
    %318 = arith.addi %c0_i32, %c10_i32 : i32
    %c1_i32 = arith.constant 1 : i32
    %319 = scf.for %arg15 = %c0_i32 to %318 step %c1_i32 iter_args(%arg16 = %317) -> (vector<32x64xf32>)  : i32 {
      %338 = arith.index_cast %arg15 : i32 to index
      %c0_139 = arith.constant 0 : index
      %c0_140 = arith.constant 0 : index
      %339 = vector.load %arg9[%338, %c0_139, %c0_140] : memref<10x64x256xbf16, #tpu.memory_space<vmem>>, vector<1x64x256xbf16>
      %340 = vector.shape_cast %339 : vector<1x64x256xbf16> to vector<64x256xbf16>
      %341 = arith.index_cast %arg15 : i32 to index
      %c0_141 = arith.constant 0 : index
      %c0_142 = arith.constant 0 : index
      %342 = vector.load %arg10[%341, %c0_141, %c0_142] : memref<10x64x256xbf16, #tpu.memory_space<vmem>>, vector<1x64x256xbf16>
      %343 = vector.shape_cast %342 : vector<1x64x256xbf16> to vector<64x256xbf16>
      %344 = arith.index_cast %arg15 : i32 to index
      %c0_143 = arith.constant 0 : index
      %c0_144 = arith.constant 0 : index
      %345 = vector.load %arg11[%344, %c0_143, %c0_144] : memref<10x1x256xf32, #tpu.memory_space<vmem>>, vector<1x1x256xf32>
      %346 = vector.shape_cast %345 : vector<1x1x256xf32> to vector<1x256xf32>
      %347 = arith.truncf %arg16 : vector<32x64xf32> to vector<32x64xbf16>
      %cst_145 = arith.constant dense<0.000000e+00> : vector<32x256xf32>
      %348 = tpu.matmul %347, %340, %cst_145 {dimension_numbers = #tpu.dot_dimension_numbers<[1], [0], [0], [1], [0, 0, 1, 1], [], []>} : vector<32x64xbf16>, vector<64x256xbf16>, vector<32x256xf32> -> vector<32x256xf32>
      %349 = vector.broadcast %346 : vector<1x256xf32> to vector<32x256xf32>
      %350 = arith.addf %348, %349 : vector<32x256xf32>
      %cst_146 = arith.constant 0.000000e+00 : f32
      %351 = vector.broadcast %cst_146 : f32 to vector<2x64xf32>
      %cst_147 = arith.constant 0.000000e+00 : f32
      %352 = vector.broadcast %cst_147 : f32 to vector<2x64xf32>
      %353 = vector.extract_strided_slice %350 {offsets = [0, 0], sizes = [2, 256], strides = [1, 1]} : vector<32x256xf32> to vector<2x256xf32>
      %354 = arith.truncf %351 : vector<2x64xf32> to vector<2x64xbf16>
      %cst_148 = arith.constant dense<0.000000e+00> : vector<2x256xf32>
      %355 = tpu.matmul %354, %343, %cst_148 {dimension_numbers = #tpu.dot_dimension_numbers<[1], [0], [0], [1], [0, 0, 1, 1], [], []>} : vector<2x64xbf16>, vector<64x256xbf16>, vector<2x256xf32> -> vector<2x256xf32>
      %356 = arith.addf %353, %355 : vector<2x256xf32>
      %cst_149 = arith.constant 0.000000e+00 : f32
      %357 = vector.broadcast %cst_149 : f32 to vector<2x256xf32>
      %358 = arith.subf %357, %356 : vector<2x256xf32>
      %359 = math.exp %358 : vector<2x256xf32>
      %cst_150 = arith.constant 1.000000e+00 : f32
      %360 = vector.broadcast %cst_150 : f32 to vector<2x256xf32>
      %361 = arith.addf %360, %359 : vector<2x256xf32>
      %362 = tpu.reciprocal %361 {approx = true} : vector<2x256xf32> -> vector<2x256xf32>
      %363 = vector.extract_strided_slice %356 {offsets = [0, 128], sizes = [2, 64], strides = [1, 1]} : vector<2x256xf32> to vector<2x64xf32>
      %364 = math.tanh %363 : vector<2x64xf32>
      %365 = vector.extract_strided_slice %362 {offsets = [0, 64], sizes = [2, 64], strides = [1, 1]} : vector<2x256xf32> to vector<2x64xf32>
      %366 = arith.mulf %365, %352 : vector<2x64xf32>
      %367 = vector.extract_strided_slice %362 {offsets = [0, 0], sizes = [2, 64], strides = [1, 1]} : vector<2x256xf32> to vector<2x64xf32>
      %368 = arith.mulf %367, %364 : vector<2x64xf32>
      %369 = arith.addf %366, %368 : vector<2x64xf32>
      %370 = vector.extract_strided_slice %362 {offsets = [0, 192], sizes = [2, 64], strides = [1, 1]} : vector<2x256xf32> to vector<2x64xf32>
      %371 = math.tanh %369 : vector<2x64xf32>
      %372 = arith.mulf %370, %371 : vector<2x64xf32>
      %373 = vector.extract_strided_slice %350 {offsets = [2, 0], sizes = [2, 256], strides = [1, 1]} : vector<32x256xf32> to vector<2x256xf32>
      %374 = arith.truncf %372 : vector<2x64xf32> to vector<2x64xbf16>
      %cst_151 = arith.constant dense<0.000000e+00> : vector<2x256xf32>
      %375 = tpu.matmul %374, %343, %cst_151 {dimension_numbers = #tpu.dot_dimension_numbers<[1], [0], [0], [1], [0, 0, 1, 1], [], []>} : vector<2x64xbf16>, vector<64x256xbf16>, vector<2x256xf32> -> vector<2x256xf32>
      %376 = arith.addf %373, %375 : vector<2x256xf32>
      %cst_152 = arith.constant 0.000000e+00 : f32
      %377 = vector.broadcast %cst_152 : f32 to vector<2x256xf32>
      %378 = arith.subf %377, %376 : vector<2x256xf32>
      %379 = math.exp %378 : vector<2x256xf32>
      %cst_153 = arith.constant 1.000000e+00 : f32
      %380 = vector.broadcast %cst_153 : f32 to vector<2x256xf32>
      %381 = arith.addf %380, %379 : vector<2x256xf32>
      %382 = tpu.reciprocal %381 {approx = true} : vector<2x256xf32> -> vector<2x256xf32>
      %383 = vector.extract_strided_slice %376 {offsets = [0, 128], sizes = [2, 64], strides = [1, 1]} : vector<2x256xf32> to vector<2x64xf32>
      %384 = math.tanh %383 : vector<2x64xf32>
      %385 = vector.extract_strided_slice %382 {offsets = [0, 64], sizes = [2, 64], strides = [1, 1]} : vector<2x256xf32> to vector<2x64xf32>
      %386 = arith.mulf %385, %369 : vector<2x64xf32>
      %387 = vector.extract_strided_slice %382 {offsets = [0, 0], sizes = [2, 64], strides = [1, 1]} : vector<2x256xf32> to vector<2x64xf32>
      %388 = arith.mulf %387, %384 : vector<2x64xf32>
      %389 = arith.addf %386, %388 : vector<2x64xf32>
      %390 = vector.extract_strided_slice %382 {offsets = [0, 192], sizes = [2, 64], strides = [1, 1]} : vector<2x256xf32> to vector<2x64xf32>
      %391 = math.tanh %389 : vector<2x64xf32>
      %392 = arith.mulf %390, %391 : vector<2x64xf32>
      %393 = vector.extract_strided_slice %350 {offsets = [4, 0], sizes = [2, 256], strides = [1, 1]} : vector<32x256xf32> to vector<2x256xf32>
      %394 = arith.truncf %392 : vector<2x64xf32> to vector<2x64xbf16>
      %cst_154 = arith.constant dense<0.000000e+00> : vector<2x256xf32>
      %395 = tpu.matmul %394, %343, %cst_154 {dimension_numbers = #tpu.dot_dimension_numbers<[1], [0], [0], [1], [0, 0, 1, 1], [], []>} : vector<2x64xbf16>, vector<64x256xbf16>, vector<2x256xf32> -> vector<2x256xf32>
      %396 = arith.addf %393, %395 : vector<2x256xf32>
      %cst_155 = arith.constant 0.000000e+00 : f32
      %397 = vector.broadcast %cst_155 : f32 to vector<2x256xf32>
      %398 = arith.subf %397, %396 : vector<2x256xf32>
      %399 = math.exp %398 : vector<2x256xf32>
      %cst_156 = arith.constant 1.000000e+00 : f32
      %400 = vector.broadcast %cst_156 : f32 to vector<2x256xf32>
      %401 = arith.addf %400, %399 : vector<2x256xf32>
      %402 = tpu.reciprocal %401 {approx = true} : vector<2x256xf32> -> vector<2x256xf32>
      %403 = vector.extract_strided_slice %396 {offsets = [0, 128], sizes = [2, 64], strides = [1, 1]} : vector<2x256xf32> to vector<2x64xf32>
      %404 = math.tanh %403 : vector<2x64xf32>
      %405 = vector.extract_strided_slice %402 {offsets = [0, 64], sizes = [2, 64], strides = [1, 1]} : vector<2x256xf32> to vector<2x64xf32>
      %406 = arith.mulf %405, %389 : vector<2x64xf32>
      %407 = vector.extract_strided_slice %402 {offsets = [0, 0], sizes = [2, 64], strides = [1, 1]} : vector<2x256xf32> to vector<2x64xf32>
      %408 = arith.mulf %407, %404 : vector<2x64xf32>
      %409 = arith.addf %406, %408 : vector<2x64xf32>
      %410 = vector.extract_strided_slice %402 {offsets = [0, 192], sizes = [2, 64], strides = [1, 1]} : vector<2x256xf32> to vector<2x64xf32>
      %411 = math.tanh %409 : vector<2x64xf32>
      %412 = arith.mulf %410, %411 : vector<2x64xf32>
      %413 = vector.extract_strided_slice %350 {offsets = [6, 0], sizes = [2, 256], strides = [1, 1]} : vector<32x256xf32> to vector<2x256xf32>
      %414 = arith.truncf %412 : vector<2x64xf32> to vector<2x64xbf16>
      %cst_157 = arith.constant dense<0.000000e+00> : vector<2x256xf32>
      %415 = tpu.matmul %414, %343, %cst_157 {dimension_numbers = #tpu.dot_dimension_numbers<[1], [0], [0], [1], [0, 0, 1, 1], [], []>} : vector<2x64xbf16>, vector<64x256xbf16>, vector<2x256xf32> -> vector<2x256xf32>
      %416 = arith.addf %413, %415 : vector<2x256xf32>
      %cst_158 = arith.constant 0.000000e+00 : f32
      %417 = vector.broadcast %cst_158 : f32 to vector<2x256xf32>
      %418 = arith.subf %417, %416 : vector<2x256xf32>
      %419 = math.exp %418 : vector<2x256xf32>
      %cst_159 = arith.constant 1.000000e+00 : f32
      %420 = vector.broadcast %cst_159 : f32 to vector<2x256xf32>
      %421 = arith.addf %420, %419 : vector<2x256xf32>
      %422 = tpu.reciprocal %421 {approx = true} : vector<2x256xf32> -> vector<2x256xf32>
      %423 = vector.extract_strided_slice %416 {offsets = [0, 128], sizes = [2, 64], strides = [1, 1]} : vector<2x256xf32> to vector<2x64xf32>
      %424 = math.tanh %423 : vector<2x64xf32>
      %425 = vector.extract_strided_slice %422 {offsets = [0, 64], sizes = [2, 64], strides = [1, 1]} : vector<2x256xf32> to vector<2x64xf32>
      %426 = arith.mulf %425, %409 : vector<2x64xf32>
      %427 = vector.extract_strided_slice %422 {offsets = [0, 0], sizes = [2, 64], strides = [1, 1]} : vector<2x256xf32> to vector<2x64xf32>
      %428 = arith.mulf %427, %424 : vector<2x64xf32>
      %429 = arith.addf %426, %428 : vector<2x64xf32>
      %430 = vector.extract_strided_slice %422 {offsets = [0, 192], sizes = [2, 64], strides = [1, 1]} : vector<2x256xf32> to vector<2x64xf32>
      %431 = math.tanh %429 : vector<2x64xf32>
      %432 = arith.mulf %430, %431 : vector<2x64xf32>
      %433 = vector.extract_strided_slice %350 {offsets = [8, 0], sizes = [2, 256], strides = [1, 1]} : vector<32x256xf32> to vector<2x256xf32>
      %434 = arith.truncf %432 : vector<2x64xf32> to vector<2x64xbf16>
      %cst_160 = arith.constant dense<0.000000e+00> : vector<2x256xf32>
      %435 = tpu.matmul %434, %343, %cst_160 {dimension_numbers = #tpu.dot_dimension_numbers<[1], [0], [0], [1], [0, 0, 1, 1], [], []>} : vector<2x64xbf16>, vector<64x256xbf16>, vector<2x256xf32> -> vector<2x256xf32>
      %436 = arith.addf %433, %435 : vector<2x256xf32>
      %cst_161 = arith.constant 0.000000e+00 : f32
      %437 = vector.broadcast %cst_161 : f32 to vector<2x256xf32>
      %438 = arith.subf %437, %436 : vector<2x256xf32>
      %439 = math.exp %438 : vector<2x256xf32>
      %cst_162 = arith.constant 1.000000e+00 : f32
      %440 = vector.broadcast %cst_162 : f32 to vector<2x256xf32>
      %441 = arith.addf %440, %439 : vector<2x256xf32>
      %442 = tpu.reciprocal %441 {approx = true} : vector<2x256xf32> -> vector<2x256xf32>
      %443 = vector.extract_strided_slice %436 {offsets = [0, 128], sizes = [2, 64], strides = [1, 1]} : vector<2x256xf32> to vector<2x64xf32>
      %444 = math.tanh %443 : vector<2x64xf32>
      %445 = vector.extract_strided_slice %442 {offsets = [0, 64], sizes = [2, 64], strides = [1, 1]} : vector<2x256xf32> to vector<2x64xf32>
      %446 = arith.mulf %445, %429 : vector<2x64xf32>
      %447 = vector.extract_strided_slice %442 {offsets = [0, 0], sizes = [2, 64], strides = [1, 1]} : vector<2x256xf32> to vector<2x64xf32>
      %448 = arith.mulf %447, %444 : vector<2x64xf32>
      %449 = arith.addf %446, %448 : vector<2x64xf32>
      %450 = vector.extract_strided_slice %442 {offsets = [0, 192], sizes = [2, 64], strides = [1, 1]} : vector<2x256xf32> to vector<2x64xf32>
      %451 = math.tanh %449 : vector<2x64xf32>
      %452 = arith.mulf %450, %451 : vector<2x64xf32>
      %453 = vector.extract_strided_slice %350 {offsets = [10, 0], sizes = [2, 256], strides = [1, 1]} : vector<32x256xf32> to vector<2x256xf32>
      %454 = arith.truncf %452 : vector<2x64xf32> to vector<2x64xbf16>
      %cst_163 = arith.constant dense<0.000000e+00> : vector<2x256xf32>
      %455 = tpu.matmul %454, %343, %cst_163 {dimension_numbers = #tpu.dot_dimension_numbers<[1], [0], [0], [1], [0, 0, 1, 1], [], []>} : vector<2x64xbf16>, vector<64x256xbf16>, vector<2x256xf32> -> vector<2x256xf32>
      %456 = arith.addf %453, %455 : vector<2x256xf32>
      %cst_164 = arith.constant 0.000000e+00 : f32
      %457 = vector.broadcast %cst_164 : f32 to vector<2x256xf32>
      %458 = arith.subf %457, %456 : vector<2x256xf32>
      %459 = math.exp %458 : vector<2x256xf32>
      %cst_165 = arith.constant 1.000000e+00 : f32
      %460 = vector.broadcast %cst_165 : f32 to vector<2x256xf32>
      %461 = arith.addf %460, %459 : vector<2x256xf32>
      %462 = tpu.reciprocal %461 {approx = true} : vector<2x256xf32> -> vector<2x256xf32>
      %463 = vector.extract_strided_slice %456 {offsets = [0, 128], sizes = [2, 64], strides = [1, 1]} : vector<2x256xf32> to vector<2x64xf32>
      %464 = math.tanh %463 : vector<2x64xf32>
      %465 = vector.extract_strided_slice %462 {offsets = [0, 64], sizes = [2, 64], strides = [1, 1]} : vector<2x256xf32> to vector<2x64xf32>
      %466 = arith.mulf %465, %449 : vector<2x64xf32>
      %467 = vector.extract_strided_slice %462 {offsets = [0, 0], sizes = [2, 64], strides = [1, 1]} : vector<2x256xf32> to vector<2x64xf32>
      %468 = arith.mulf %467, %464 : vector<2x64xf32>
      %469 = arith.addf %466, %468 : vector<2x64xf32>
      %470 = vector.extract_strided_slice %462 {offsets = [0, 192], sizes = [2, 64], strides = [1, 1]} : vector<2x256xf32> to vector<2x64xf32>
      %471 = math.tanh %469 : vector<2x64xf32>
      %472 = arith.mulf %470, %471 : vector<2x64xf32>
      %473 = vector.extract_strided_slice %350 {offsets = [12, 0], sizes = [2, 256], strides = [1, 1]} : vector<32x256xf32> to vector<2x256xf32>
      %474 = arith.truncf %472 : vector<2x64xf32> to vector<2x64xbf16>
      %cst_166 = arith.constant dense<0.000000e+00> : vector<2x256xf32>
      %475 = tpu.matmul %474, %343, %cst_166 {dimension_numbers = #tpu.dot_dimension_numbers<[1], [0], [0], [1], [0, 0, 1, 1], [], []>} : vector<2x64xbf16>, vector<64x256xbf16>, vector<2x256xf32> -> vector<2x256xf32>
      %476 = arith.addf %473, %475 : vector<2x256xf32>
      %cst_167 = arith.constant 0.000000e+00 : f32
      %477 = vector.broadcast %cst_167 : f32 to vector<2x256xf32>
      %478 = arith.subf %477, %476 : vector<2x256xf32>
      %479 = math.exp %478 : vector<2x256xf32>
      %cst_168 = arith.constant 1.000000e+00 : f32
      %480 = vector.broadcast %cst_168 : f32 to vector<2x256xf32>
      %481 = arith.addf %480, %479 : vector<2x256xf32>
      %482 = tpu.reciprocal %481 {approx = true} : vector<2x256xf32> -> vector<2x256xf32>
      %483 = vector.extract_strided_slice %476 {offsets = [0, 128], sizes = [2, 64], strides = [1, 1]} : vector<2x256xf32> to vector<2x64xf32>
      %484 = math.tanh %483 : vector<2x64xf32>
      %485 = vector.extract_strided_slice %482 {offsets = [0, 64], sizes = [2, 64], strides = [1, 1]} : vector<2x256xf32> to vector<2x64xf32>
      %486 = arith.mulf %485, %469 : vector<2x64xf32>
      %487 = vector.extract_strided_slice %482 {offsets = [0, 0], sizes = [2, 64], strides = [1, 1]} : vector<2x256xf32> to vector<2x64xf32>
      %488 = arith.mulf %487, %484 : vector<2x64xf32>
      %489 = arith.addf %486, %488 : vector<2x64xf32>
      %490 = vector.extract_strided_slice %482 {offsets = [0, 192], sizes = [2, 64], strides = [1, 1]} : vector<2x256xf32> to vector<2x64xf32>
      %491 = math.tanh %489 : vector<2x64xf32>
      %492 = arith.mulf %490, %491 : vector<2x64xf32>
      %493 = vector.extract_strided_slice %350 {offsets = [14, 0], sizes = [2, 256], strides = [1, 1]} : vector<32x256xf32> to vector<2x256xf32>
      %494 = arith.truncf %492 : vector<2x64xf32> to vector<2x64xbf16>
      %cst_169 = arith.constant dense<0.000000e+00> : vector<2x256xf32>
      %495 = tpu.matmul %494, %343, %cst_169 {dimension_numbers = #tpu.dot_dimension_numbers<[1], [0], [0], [1], [0, 0, 1, 1], [], []>} : vector<2x64xbf16>, vector<64x256xbf16>, vector<2x256xf32> -> vector<2x256xf32>
      %496 = arith.addf %493, %495 : vector<2x256xf32>
      %cst_170 = arith.constant 0.000000e+00 : f32
      %497 = vector.broadcast %cst_170 : f32 to vector<2x256xf32>
      %498 = arith.subf %497, %496 : vector<2x256xf32>
      %499 = math.exp %498 : vector<2x256xf32>
      %cst_171 = arith.constant 1.000000e+00 : f32
      %500 = vector.broadcast %cst_171 : f32 to vector<2x256xf32>
      %501 = arith.addf %500, %499 : vector<2x256xf32>
      %502 = tpu.reciprocal %501 {approx = true} : vector<2x256xf32> -> vector<2x256xf32>
      %503 = vector.extract_strided_slice %496 {offsets = [0, 128], sizes = [2, 64], strides = [1, 1]} : vector<2x256xf32> to vector<2x64xf32>
      %504 = math.tanh %503 : vector<2x64xf32>
      %505 = vector.extract_strided_slice %502 {offsets = [0, 64], sizes = [2, 64], strides = [1, 1]} : vector<2x256xf32> to vector<2x64xf32>
      %506 = arith.mulf %505, %489 : vector<2x64xf32>
      %507 = vector.extract_strided_slice %502 {offsets = [0, 0], sizes = [2, 64], strides = [1, 1]} : vector<2x256xf32> to vector<2x64xf32>
      %508 = arith.mulf %507, %504 : vector<2x64xf32>
      %509 = arith.addf %506, %508 : vector<2x64xf32>
      %510 = vector.extract_strided_slice %502 {offsets = [0, 192], sizes = [2, 64], strides = [1, 1]} : vector<2x256xf32> to vector<2x64xf32>
      %511 = math.tanh %509 : vector<2x64xf32>
      %512 = arith.mulf %510, %511 : vector<2x64xf32>
      %513 = vector.extract_strided_slice %350 {offsets = [16, 0], sizes = [2, 256], strides = [1, 1]} : vector<32x256xf32> to vector<2x256xf32>
      %514 = arith.truncf %512 : vector<2x64xf32> to vector<2x64xbf16>
      %cst_172 = arith.constant dense<0.000000e+00> : vector<2x256xf32>
      %515 = tpu.matmul %514, %343, %cst_172 {dimension_numbers = #tpu.dot_dimension_numbers<[1], [0], [0], [1], [0, 0, 1, 1], [], []>} : vector<2x64xbf16>, vector<64x256xbf16>, vector<2x256xf32> -> vector<2x256xf32>
      %516 = arith.addf %513, %515 : vector<2x256xf32>
      %cst_173 = arith.constant 0.000000e+00 : f32
      %517 = vector.broadcast %cst_173 : f32 to vector<2x256xf32>
      %518 = arith.subf %517, %516 : vector<2x256xf32>
      %519 = math.exp %518 : vector<2x256xf32>
      %cst_174 = arith.constant 1.000000e+00 : f32
      %520 = vector.broadcast %cst_174 : f32 to vector<2x256xf32>
      %521 = arith.addf %520, %519 : vector<2x256xf32>
      %522 = tpu.reciprocal %521 {approx = true} : vector<2x256xf32> -> vector<2x256xf32>
      %523 = vector.extract_strided_slice %516 {offsets = [0, 128], sizes = [2, 64], strides = [1, 1]} : vector<2x256xf32> to vector<2x64xf32>
      %524 = math.tanh %523 : vector<2x64xf32>
      %525 = vector.extract_strided_slice %522 {offsets = [0, 64], sizes = [2, 64], strides = [1, 1]} : vector<2x256xf32> to vector<2x64xf32>
      %526 = arith.mulf %525, %509 : vector<2x64xf32>
      %527 = vector.extract_strided_slice %522 {offsets = [0, 0], sizes = [2, 64], strides = [1, 1]} : vector<2x256xf32> to vector<2x64xf32>
      %528 = arith.mulf %527, %524 : vector<2x64xf32>
      %529 = arith.addf %526, %528 : vector<2x64xf32>
      %530 = vector.extract_strided_slice %522 {offsets = [0, 192], sizes = [2, 64], strides = [1, 1]} : vector<2x256xf32> to vector<2x64xf32>
      %531 = math.tanh %529 : vector<2x64xf32>
      %532 = arith.mulf %530, %531 : vector<2x64xf32>
      %533 = vector.extract_strided_slice %350 {offsets = [18, 0], sizes = [2, 256], strides = [1, 1]} : vector<32x256xf32> to vector<2x256xf32>
      %534 = arith.truncf %532 : vector<2x64xf32> to vector<2x64xbf16>
      %cst_175 = arith.constant dense<0.000000e+00> : vector<2x256xf32>
      %535 = tpu.matmul %534, %343, %cst_175 {dimension_numbers = #tpu.dot_dimension_numbers<[1], [0], [0], [1], [0, 0, 1, 1], [], []>} : vector<2x64xbf16>, vector<64x256xbf16>, vector<2x256xf32> -> vector<2x256xf32>
      %536 = arith.addf %533, %535 : vector<2x256xf32>
      %cst_176 = arith.constant 0.000000e+00 : f32
      %537 = vector.broadcast %cst_176 : f32 to vector<2x256xf32>
      %538 = arith.subf %537, %536 : vector<2x256xf32>
      %539 = math.exp %538 : vector<2x256xf32>
      %cst_177 = arith.constant 1.000000e+00 : f32
      %540 = vector.broadcast %cst_177 : f32 to vector<2x256xf32>
      %541 = arith.addf %540, %539 : vector<2x256xf32>
      %542 = tpu.reciprocal %541 {approx = true} : vector<2x256xf32> -> vector<2x256xf32>
      %543 = vector.extract_strided_slice %536 {offsets = [0, 128], sizes = [2, 64], strides = [1, 1]} : vector<2x256xf32> to vector<2x64xf32>
      %544 = math.tanh %543 : vector<2x64xf32>
      %545 = vector.extract_strided_slice %542 {offsets = [0, 64], sizes = [2, 64], strides = [1, 1]} : vector<2x256xf32> to vector<2x64xf32>
      %546 = arith.mulf %545, %529 : vector<2x64xf32>
      %547 = vector.extract_strided_slice %542 {offsets = [0, 0], sizes = [2, 64], strides = [1, 1]} : vector<2x256xf32> to vector<2x64xf32>
      %548 = arith.mulf %547, %544 : vector<2x64xf32>
      %549 = arith.addf %546, %548 : vector<2x64xf32>
      %550 = vector.extract_strided_slice %542 {offsets = [0, 192], sizes = [2, 64], strides = [1, 1]} : vector<2x256xf32> to vector<2x64xf32>
      %551 = math.tanh %549 : vector<2x64xf32>
      %552 = arith.mulf %550, %551 : vector<2x64xf32>
      %553 = vector.extract_strided_slice %350 {offsets = [20, 0], sizes = [2, 256], strides = [1, 1]} : vector<32x256xf32> to vector<2x256xf32>
      %554 = arith.truncf %552 : vector<2x64xf32> to vector<2x64xbf16>
      %cst_178 = arith.constant dense<0.000000e+00> : vector<2x256xf32>
      %555 = tpu.matmul %554, %343, %cst_178 {dimension_numbers = #tpu.dot_dimension_numbers<[1], [0], [0], [1], [0, 0, 1, 1], [], []>} : vector<2x64xbf16>, vector<64x256xbf16>, vector<2x256xf32> -> vector<2x256xf32>
      %556 = arith.addf %553, %555 : vector<2x256xf32>
      %cst_179 = arith.constant 0.000000e+00 : f32
      %557 = vector.broadcast %cst_179 : f32 to vector<2x256xf32>
      %558 = arith.subf %557, %556 : vector<2x256xf32>
      %559 = math.exp %558 : vector<2x256xf32>
      %cst_180 = arith.constant 1.000000e+00 : f32
      %560 = vector.broadcast %cst_180 : f32 to vector<2x256xf32>
      %561 = arith.addf %560, %559 : vector<2x256xf32>
      %562 = tpu.reciprocal %561 {approx = true} : vector<2x256xf32> -> vector<2x256xf32>
      %563 = vector.extract_strided_slice %556 {offsets = [0, 128], sizes = [2, 64], strides = [1, 1]} : vector<2x256xf32> to vector<2x64xf32>
      %564 = math.tanh %563 : vector<2x64xf32>
      %565 = vector.extract_strided_slice %562 {offsets = [0, 64], sizes = [2, 64], strides = [1, 1]} : vector<2x256xf32> to vector<2x64xf32>
      %566 = arith.mulf %565, %549 : vector<2x64xf32>
      %567 = vector.extract_strided_slice %562 {offsets = [0, 0], sizes = [2, 64], strides = [1, 1]} : vector<2x256xf32> to vector<2x64xf32>
      %568 = arith.mulf %567, %564 : vector<2x64xf32>
      %569 = arith.addf %566, %568 : vector<2x64xf32>
      %570 = vector.extract_strided_slice %562 {offsets = [0, 192], sizes = [2, 64], strides = [1, 1]} : vector<2x256xf32> to vector<2x64xf32>
      %571 = math.tanh %569 : vector<2x64xf32>
      %572 = arith.mulf %570, %571 : vector<2x64xf32>
      %573 = vector.extract_strided_slice %350 {offsets = [22, 0], sizes = [2, 256], strides = [1, 1]} : vector<32x256xf32> to vector<2x256xf32>
      %574 = arith.truncf %572 : vector<2x64xf32> to vector<2x64xbf16>
      %cst_181 = arith.constant dense<0.000000e+00> : vector<2x256xf32>
      %575 = tpu.matmul %574, %343, %cst_181 {dimension_numbers = #tpu.dot_dimension_numbers<[1], [0], [0], [1], [0, 0, 1, 1], [], []>} : vector<2x64xbf16>, vector<64x256xbf16>, vector<2x256xf32> -> vector<2x256xf32>
      %576 = arith.addf %573, %575 : vector<2x256xf32>
      %cst_182 = arith.constant 0.000000e+00 : f32
      %577 = vector.broadcast %cst_182 : f32 to vector<2x256xf32>
      %578 = arith.subf %577, %576 : vector<2x256xf32>
      %579 = math.exp %578 : vector<2x256xf32>
      %cst_183 = arith.constant 1.000000e+00 : f32
      %580 = vector.broadcast %cst_183 : f32 to vector<2x256xf32>
      %581 = arith.addf %580, %579 : vector<2x256xf32>
      %582 = tpu.reciprocal %581 {approx = true} : vector<2x256xf32> -> vector<2x256xf32>
      %583 = vector.extract_strided_slice %576 {offsets = [0, 128], sizes = [2, 64], strides = [1, 1]} : vector<2x256xf32> to vector<2x64xf32>
      %584 = math.tanh %583 : vector<2x64xf32>
      %585 = vector.extract_strided_slice %582 {offsets = [0, 64], sizes = [2, 64], strides = [1, 1]} : vector<2x256xf32> to vector<2x64xf32>
      %586 = arith.mulf %585, %569 : vector<2x64xf32>
      %587 = vector.extract_strided_slice %582 {offsets = [0, 0], sizes = [2, 64], strides = [1, 1]} : vector<2x256xf32> to vector<2x64xf32>
      %588 = arith.mulf %587, %584 : vector<2x64xf32>
      %589 = arith.addf %586, %588 : vector<2x64xf32>
      %590 = vector.extract_strided_slice %582 {offsets = [0, 192], sizes = [2, 64], strides = [1, 1]} : vector<2x256xf32> to vector<2x64xf32>
      %591 = math.tanh %589 : vector<2x64xf32>
      %592 = arith.mulf %590, %591 : vector<2x64xf32>
      %593 = vector.extract_strided_slice %350 {offsets = [24, 0], sizes = [2, 256], strides = [1, 1]} : vector<32x256xf32> to vector<2x256xf32>
      %594 = arith.truncf %592 : vector<2x64xf32> to vector<2x64xbf16>
      %cst_184 = arith.constant dense<0.000000e+00> : vector<2x256xf32>
      %595 = tpu.matmul %594, %343, %cst_184 {dimension_numbers = #tpu.dot_dimension_numbers<[1], [0], [0], [1], [0, 0, 1, 1], [], []>} : vector<2x64xbf16>, vector<64x256xbf16>, vector<2x256xf32> -> vector<2x256xf32>
      %596 = arith.addf %593, %595 : vector<2x256xf32>
      %cst_185 = arith.constant 0.000000e+00 : f32
      %597 = vector.broadcast %cst_185 : f32 to vector<2x256xf32>
      %598 = arith.subf %597, %596 : vector<2x256xf32>
      %599 = math.exp %598 : vector<2x256xf32>
      %cst_186 = arith.constant 1.000000e+00 : f32
      %600 = vector.broadcast %cst_186 : f32 to vector<2x256xf32>
      %601 = arith.addf %600, %599 : vector<2x256xf32>
      %602 = tpu.reciprocal %601 {approx = true} : vector<2x256xf32> -> vector<2x256xf32>
      %603 = vector.extract_strided_slice %596 {offsets = [0, 128], sizes = [2, 64], strides = [1, 1]} : vector<2x256xf32> to vector<2x64xf32>
      %604 = math.tanh %603 : vector<2x64xf32>
      %605 = vector.extract_strided_slice %602 {offsets = [0, 64], sizes = [2, 64], strides = [1, 1]} : vector<2x256xf32> to vector<2x64xf32>
      %606 = arith.mulf %605, %589 : vector<2x64xf32>
      %607 = vector.extract_strided_slice %602 {offsets = [0, 0], sizes = [2, 64], strides = [1, 1]} : vector<2x256xf32> to vector<2x64xf32>
      %608 = arith.mulf %607, %604 : vector<2x64xf32>
      %609 = arith.addf %606, %608 : vector<2x64xf32>
      %610 = vector.extract_strided_slice %602 {offsets = [0, 192], sizes = [2, 64], strides = [1, 1]} : vector<2x256xf32> to vector<2x64xf32>
      %611 = math.tanh %609 : vector<2x64xf32>
      %612 = arith.mulf %610, %611 : vector<2x64xf32>
      %613 = vector.extract_strided_slice %350 {offsets = [26, 0], sizes = [2, 256], strides = [1, 1]} : vector<32x256xf32> to vector<2x256xf32>
      %614 = arith.truncf %612 : vector<2x64xf32> to vector<2x64xbf16>
      %cst_187 = arith.constant dense<0.000000e+00> : vector<2x256xf32>
      %615 = tpu.matmul %614, %343, %cst_187 {dimension_numbers = #tpu.dot_dimension_numbers<[1], [0], [0], [1], [0, 0, 1, 1], [], []>} : vector<2x64xbf16>, vector<64x256xbf16>, vector<2x256xf32> -> vector<2x256xf32>
      %616 = arith.addf %613, %615 : vector<2x256xf32>
      %cst_188 = arith.constant 0.000000e+00 : f32
      %617 = vector.broadcast %cst_188 : f32 to vector<2x256xf32>
      %618 = arith.subf %617, %616 : vector<2x256xf32>
      %619 = math.exp %618 : vector<2x256xf32>
      %cst_189 = arith.constant 1.000000e+00 : f32
      %620 = vector.broadcast %cst_189 : f32 to vector<2x256xf32>
      %621 = arith.addf %620, %619 : vector<2x256xf32>
      %622 = tpu.reciprocal %621 {approx = true} : vector<2x256xf32> -> vector<2x256xf32>
      %623 = vector.extract_strided_slice %616 {offsets = [0, 128], sizes = [2, 64], strides = [1, 1]} : vector<2x256xf32> to vector<2x64xf32>
      %624 = math.tanh %623 : vector<2x64xf32>
      %625 = vector.extract_strided_slice %622 {offsets = [0, 64], sizes = [2, 64], strides = [1, 1]} : vector<2x256xf32> to vector<2x64xf32>
      %626 = arith.mulf %625, %609 : vector<2x64xf32>
      %627 = vector.extract_strided_slice %622 {offsets = [0, 0], sizes = [2, 64], strides = [1, 1]} : vector<2x256xf32> to vector<2x64xf32>
      %628 = arith.mulf %627, %624 : vector<2x64xf32>
      %629 = arith.addf %626, %628 : vector<2x64xf32>
      %630 = vector.extract_strided_slice %622 {offsets = [0, 192], sizes = [2, 64], strides = [1, 1]} : vector<2x256xf32> to vector<2x64xf32>
      %631 = math.tanh %629 : vector<2x64xf32>
      %632 = arith.mulf %630, %631 : vector<2x64xf32>
      %633 = vector.extract_strided_slice %350 {offsets = [28, 0], sizes = [2, 256], strides = [1, 1]} : vector<32x256xf32> to vector<2x256xf32>
      %634 = arith.truncf %632 : vector<2x64xf32> to vector<2x64xbf16>
      %cst_190 = arith.constant dense<0.000000e+00> : vector<2x256xf32>
      %635 = tpu.matmul %634, %343, %cst_190 {dimension_numbers = #tpu.dot_dimension_numbers<[1], [0], [0], [1], [0, 0, 1, 1], [], []>} : vector<2x64xbf16>, vector<64x256xbf16>, vector<2x256xf32> -> vector<2x256xf32>
      %636 = arith.addf %633, %635 : vector<2x256xf32>
      %cst_191 = arith.constant 0.000000e+00 : f32
      %637 = vector.broadcast %cst_191 : f32 to vector<2x256xf32>
      %638 = arith.subf %637, %636 : vector<2x256xf32>
      %639 = math.exp %638 : vector<2x256xf32>
      %cst_192 = arith.constant 1.000000e+00 : f32
      %640 = vector.broadcast %cst_192 : f32 to vector<2x256xf32>
      %641 = arith.addf %640, %639 : vector<2x256xf32>
      %642 = tpu.reciprocal %641 {approx = true} : vector<2x256xf32> -> vector<2x256xf32>
      %643 = vector.extract_strided_slice %636 {offsets = [0, 128], sizes = [2, 64], strides = [1, 1]} : vector<2x256xf32> to vector<2x64xf32>
      %644 = math.tanh %643 : vector<2x64xf32>
      %645 = vector.extract_strided_slice %642 {offsets = [0, 64], sizes = [2, 64], strides = [1, 1]} : vector<2x256xf32> to vector<2x64xf32>
      %646 = arith.mulf %645, %629 : vector<2x64xf32>
      %647 = vector.extract_strided_slice %642 {offsets = [0, 0], sizes = [2, 64], strides = [1, 1]} : vector<2x256xf32> to vector<2x64xf32>
      %648 = arith.mulf %647, %644 : vector<2x64xf32>
      %649 = arith.addf %646, %648 : vector<2x64xf32>
      %650 = vector.extract_strided_slice %642 {offsets = [0, 192], sizes = [2, 64], strides = [1, 1]} : vector<2x256xf32> to vector<2x64xf32>
      %651 = math.tanh %649 : vector<2x64xf32>
      %652 = arith.mulf %650, %651 : vector<2x64xf32>
      %653 = vector.extract_strided_slice %350 {offsets = [30, 0], sizes = [2, 256], strides = [1, 1]} : vector<32x256xf32> to vector<2x256xf32>
      %654 = arith.truncf %652 : vector<2x64xf32> to vector<2x64xbf16>
      %cst_193 = arith.constant dense<0.000000e+00> : vector<2x256xf32>
      %655 = tpu.matmul %654, %343, %cst_193 {dimension_numbers = #tpu.dot_dimension_numbers<[1], [0], [0], [1], [0, 0, 1, 1], [], []>} : vector<2x64xbf16>, vector<64x256xbf16>, vector<2x256xf32> -> vector<2x256xf32>
      %656 = arith.addf %653, %655 : vector<2x256xf32>
      %cst_194 = arith.constant 0.000000e+00 : f32
      %657 = vector.broadcast %cst_194 : f32 to vector<2x256xf32>
      %658 = arith.subf %657, %656 : vector<2x256xf32>
      %659 = math.exp %658 : vector<2x256xf32>
      %cst_195 = arith.constant 1.000000e+00 : f32
      %660 = vector.broadcast %cst_195 : f32 to vector<2x256xf32>
      %661 = arith.addf %660, %659 : vector<2x256xf32>
      %662 = tpu.reciprocal %661 {approx = true} : vector<2x256xf32> -> vector<2x256xf32>
      %663 = vector.extract_strided_slice %656 {offsets = [0, 128], sizes = [2, 64], strides = [1, 1]} : vector<2x256xf32> to vector<2x64xf32>
      %664 = math.tanh %663 : vector<2x64xf32>
      %665 = vector.extract_strided_slice %662 {offsets = [0, 64], sizes = [2, 64], strides = [1, 1]} : vector<2x256xf32> to vector<2x64xf32>
      %666 = arith.mulf %665, %649 : vector<2x64xf32>
      %667 = vector.extract_strided_slice %662 {offsets = [0, 0], sizes = [2, 64], strides = [1, 1]} : vector<2x256xf32> to vector<2x64xf32>
      %668 = arith.mulf %667, %664 : vector<2x64xf32>
      %669 = arith.addf %666, %668 : vector<2x64xf32>
      %670 = vector.extract_strided_slice %662 {offsets = [0, 192], sizes = [2, 64], strides = [1, 1]} : vector<2x256xf32> to vector<2x64xf32>
      %671 = math.tanh %669 : vector<2x64xf32>
      %672 = arith.mulf %670, %671 : vector<2x64xf32>
      %673 = tpu.concatenate %372, %392, %412, %432, %452, %472, %492, %512, %532, %552, %572, %592, %612, %632, %652, %672 in 0 : vector<2x64xf32>, vector<2x64xf32>, vector<2x64xf32>, vector<2x64xf32>, vector<2x64xf32>, vector<2x64xf32>, vector<2x64xf32>, vector<2x64xf32>, vector<2x64xf32>, vector<2x64xf32>, vector<2x64xf32>, vector<2x64xf32>, vector<2x64xf32>, vector<2x64xf32>, vector<2x64xf32>, vector<2x64xf32> -> vector<32x64xf32>
      scf.yield %673 : vector<32x64xf32>
    }
    %c10_i32_129 = arith.constant 10 : i32
    %320 = vector.extract_strided_slice %319 {offsets = [30, 0], sizes = [2, 64], strides = [1, 1]} : vector<32x64xf32> to vector<2x64xf32>
    %321 = arith.truncf %320 : vector<2x64xf32> to vector<2x64xbf16>
    %c0_130 = arith.constant 0 : index
    %c0_131 = arith.constant 0 : index
    %322 = vector.load %arg12[%c0_130, %c0_131] : memref<64x2xbf16, #tpu.memory_space<vmem>>, vector<64x2xbf16>
    %cst_132 = arith.constant dense<0.000000e+00> : vector<2x2xf32>
    %323 = tpu.matmul %321, %322, %cst_132 {dimension_numbers = #tpu.dot_dimension_numbers<[1], [0], [0], [1], [0, 0, 1, 1], [], []>} : vector<2x64xbf16>, vector<64x2xbf16>, vector<2x2xf32> -> vector<2x2xf32>
    %c0_133 = arith.constant 0 : index
    %c0_134 = arith.constant 0 : index
    %324 = vector.load %arg13[%c0_133, %c0_134] : memref<1x2xf32, #tpu.memory_space<vmem>>, vector<1x2xf32>
    %325 = vector.broadcast %324 : vector<1x2xf32> to vector<2x2xf32>
    %326 = arith.addf %323, %325 : vector<2x2xf32>
    %cst_135 = arith.constant dense<0xFF800000> : vector<2xf32>
    %327 = vector.multi_reduction <maximumf>, %326, %cst_135 [1] : vector<2x2xf32> to vector<2xf32>
    %328 = vector.shape_cast %327 : vector<2xf32> to vector<2x1xf32>
    %329 = vector.broadcast %328 : vector<2x1xf32> to vector<2x2xf32>
    %330 = arith.subf %326, %329 : vector<2x2xf32>
    %331 = math.exp %330 : vector<2x2xf32>
    %cst_136 = arith.constant dense<0.000000e+00> : vector<2xf32>
    %332 = vector.multi_reduction <add>, %331, %cst_136 [1] : vector<2x2xf32> to vector<2xf32>
    %333 = vector.shape_cast %332 : vector<2xf32> to vector<2x1xf32>
    %334 = math.log %333 : vector<2x1xf32>
    %335 = vector.broadcast %334 : vector<2x1xf32> to vector<2x2xf32>
    %336 = arith.subf %330, %335 : vector<2x2xf32>
    %c0_137 = arith.constant 0 : index
    %c0_138 = arith.constant 0 : index
    %337 = vector.load %arg14[%c0_137, %c0_138] : memref<2x2xf32, #tpu.memory_space<vmem>>, vector<2x2xf32>
    tpu.vector_store %arg14[%c0_137, %c0_138], %336 {strides = array<i32>} : memref<2x2xf32, #tpu.memory_space<vmem>>, vector<2x2xf32>,
    return
  }
}

</mosaic_0001>

<bundles_post_ra>
// kernel: motif_forward.1
= control target key start
LH: loop header
LB: loop body
LE: loop exit
PB: predicated region body
PF: predicated region fallthrough
CT: control target
= control target key end

     0   :  { %vm61_vm0 = vcmask 1043456   ;;  %vm78_vm1 = vcmask 1045504   ;;  %vm121_vm2 = vcmask 1041408   ;;  %s10577_s0 = inlined_call_operand.vmem [shape: f32[32,4], index: 0, kind: input, shape index: {}]   ;;  %s10578_s1 = inlined_call_operand.vmem [shape: bf16[20,32], index: 1, kind: input, shape index: {}]   ;;  %s10579_s2 = inlined_call_operand.vmem [shape: f32[1,32], index: 2, kind: input, shape index: {}]   ;;  %s10580_s3 = inlined_call_operand.vmem [shape: bf16[160,64], index: 3, kind: input, shape index: {}]   ;;  %s10581_s4 = inlined_call_operand.vmem [shape: f32[1,64], index: 4, kind: input, shape index: {}]   ;;  %s10582_s5 = inlined_call_operand.vmem [shape: f32[6,1,64], index: 5, kind: input, shape index: {}]   ;;  %s10583_s6 = inlined_call_operand.vmem [shape: f32[6,1,64], index: 6, kind: input, shape index: {}]   ;;  %s10584_s7 = inlined_call_operand.vmem [shape: bf16[6,704,64], index: 7, kind: input, shape index: {}]   ;;  %s10585_s8 = inlined_call_operand.vmem [shape: f32[6,1,64], index: 8, kind: input, shape index: {}]   ;;  %s10586_s9 = inlined_call_operand.vmem [shape: bf16[10,64,256], index: 9, kind: input, shape index: {}]   ;;  %s10587_s10 = inlined_call_operand.vmem [shape: bf16[10,64,256], index: 10, kind: input, shape index: {}]   ;;  %s10588_s11 = inlined_call_operand.vmem [shape: f32[10,1,256], index: 11, kind: input, shape index: {}]   ;;  %s10589_s12 = inlined_call_operand.vmem [shape: bf16[64,2], index: 12, kind: input, shape index: {}]   ;;  %s10590_s13 = inlined_call_operand.vmem [shape: f32[1,2], index: 13, kind: input, shape index: {}]   ;;  %s10591_s14 = inlined_call_operand.hbm [shape: f32[2,2], index: 14, kind: output, shape index: {}]  }
   0x1   :  { %v49_v0 = vld [vmem:[%s10577_s0] sm:$0xff]  ;;  %v50_v1 = vld [vmem:[%s10577_s0 + $0x8] sm:$0xff]  ;;  %v51_v2 = vld [vmem:[%s10577_s0 + $0x10] sm:$0xff] }
   0x2   :  { %v62_v3 = vrot.slane %v49_v0, 4  ;;  %v63_v4 = vrot.slane %v50_v1, 4  ;;  %v65_v5 = vrot.slane %v51_v2, 4  ;;  %v52_v6 = vld [vmem:[%s10577_s0 + $0x18] sm:$0xff] }
   0x3   :  { %v67_v7 = vrot.slane %v52_v6, 4 }
   0x4   :  { %v8417_v8 = vsel %vm61_vm0, %v62_v3, %v63_v4  ;;  %v8420_v9 = vsel %vm61_vm0, %v63_v4, %v65_v5  ;;  %v8423_v10 = vsel %vm61_vm0, 0.0, %v62_v3 }
   0x5   :  { %19 = vsyncpa [#allocation3], 0  ;;  %v100_v11 = vrot.slane %v8423_v10, 4  ;;  %v101_v12 = vrot.slane %v8417_v8, 4  ;;  %v103_v13 = vrot.slane %v8420_v9, 4  ;;  %v79_v14 = vrot.slane %v8423_v10, 2 }
   0x6   :  { %v80_v15 = vrot.slane %v8417_v8, 2  ;;  %v82_v16 = vrot.slane %v8420_v9, 2  ;;  %v8432_v17 = vsel %vm61_vm0, %v65_v5, %v67_v7  ;;  %v75_v18 = vsel %vm61_vm0, %v67_v7, 0.0  ;;  %v7731_v19 = vld [vmem:[%s10578_s1] sm:$0xff]   ;;  %s8315_s22 = smov 8   ;;  %s8316_s25 = smov 4  }
   0x7   :  { %v102_v20 = vsel %vm61_vm0, %v100_v11, %v101_v12  ;;  %v104_v21 = vsel %vm61_vm0, %v101_v12, %v103_v13  ;;  %v105_v22 = vrot.slane %v8432_v17, 4  ;;  %v107_v23 = vrot.slane %v75_v18, 4  ;;  %7436 = vmatprep.subr.bf16.mxu1 %v7731_v19  ;;  %v7732_v36 = vld [vmem:[%s10578_s1 + $0x8] ss:$0 sps:$4 sm:$0x33]   ;;  %s8317_s1 = smov 12  }
   0x8   :  { %v7521_v24 = vpack.i.bf16 %v104_v21, %v102_v20  ;;  %v81_v25 = vsel %vm78_vm1, %v79_v14, %v80_v15  ;;  %v83_v26 = vsel %vm78_vm1, %v80_v15, %v82_v16  ;;  %v84_v27 = vrot.slane %v8432_v17, 2  ;;  %7437 = vmatpush3.bf16.msra.mxu1 %v7731_v19  ;;  %s8318_s26 = smov 16   ;;  %s8321_s30 = smov 32  }
   0x9   :  { %v7511_v28 = vpack.i.bf16 %v83_v26, %v81_v25  ;;  %v106_v29 = vsel %vm61_vm0, %v103_v13, %v105_v22  ;;  %v108_v30 = vsel %vm61_vm0, %v105_v22, %v107_v23  ;;  %v86_v31 = vrot.slane %v75_v18, 2  ;;  %7456 = vmatprep.subr.msk.bf16.mxu1 %vm121_vm2, %v7732_v36  ;;  %s8322_s15 = smov 96  }
   0xa   :  { %7522 = vrot.lane.b32.xlu1 %v7521_v24, %s8315_s22  ;;  %v7526_v32 = vpack.i.bf16 %v108_v30, %v106_v29  ;;  %v85_v33 = vsel %vm78_vm1, %v82_v16, %v84_v27  ;;  %v125_v34 = vrot.slane %v8420_v9, 6  ;;  %v127_v35 = vrot.slane %v8432_v17, 6  ;;  %v7733_v29 = vld [vmem:[%s10580_s3] sm:$0xff]  }
   0xb   :  { %7512 = vrot.lane.b32.xlu0 %v7511_v28, %s8316_s25  ;;  %v87_v37 = vsel %vm78_vm1, %v84_v27, %v86_v31  ;;  %v129_v38 = vrot.slane %v75_v18, 6  ;;  %v122_v39 = vrot.slane %v8423_v10, 6  ;;  %v123_v40 = vrot.slane %v8417_v8, 6  ;;  %v7734_v31 = vld [vmem:[%s10580_s3 + $0x8] sm:$0xff]  }
   0xc   :  { %v7516_v41 = vpack.i.bf16 %v87_v37, %v85_v33  ;;  %v128_v42 = vsel %vm121_vm2, %v125_v34, %v127_v35  ;;  %v200_v47 = vsel %vm121_vm2, %v7732_v36, 0  ;;  %v7546_v49 = vpack.i.bf16 %v75_v18, %v8432_v17  ;;  %v7736_v33 = vld [vmem:[%s10580_s3 + $0x18] sm:$0xff]   ;;  %v7739_v36 = vld [vmem:[%s10580_s3 + $0x30] sm:$0xff]  }
   0xd   :  { %v130_v43 = vsel %vm121_vm2, %v127_v35, %v129_v38  ;;  %v124_v44 = vsel %vm121_vm2, %v122_v39, %v123_v40  ;;  %v126_v45 = vsel %vm121_vm2, %v123_v40, %v125_v34  ;;  %7439 = vmatpush3.bf16.msra.mxu1 %v200_v47  ;;  %v7541_v50 = vpack.i.bf16 %v8420_v9, %v8417_v8  ;;  %v7737_v34 = vld [vmem:[%s10580_s3 + $0x20] sm:$0xff]   ;;  %v7738_v35 = vld [vmem:[%s10580_s3 + $0x28] sm:$0xff]   ;;  %v7740_v37 = vld [vmem:[%s10580_s3 + $0x38] sm:$0xff]  }
   0xe   :  { %7527 = vrot.lane.b32.xlu1 %v7526_v32, %s8315_s22  ;;  %v7536_v46 = vpack.i.bf16 %v130_v43, %v128_v42  ;;  %v7531_v48 = vpack.i.bf16 %v126_v45, %v124_v44  ;;  %vm155_vm3 = vcmask 31744   ;;  %vm160_vm4 = vcmask 64512   ;;  %v7735_v32 = vld [vmem:[%s10580_s3 + $0x10] sm:$0xff]   ;;  %v6261_v38 = vld [vmem:[%s10579_s2] ss:$0 sm:$0xff] }
   0xf   :  { %7517 = vrot.lane.b32.xlu0 %v7516_v41, %s8316_s25  ;;  %vm165_vm5 = vcmask 97280   ;;  %vm170_vm6 = vcmask 130048   ;;  %vm192_vm7 = vcmask 162816   ;;  %v8319_v30 = vmov 0  }
  0x10   :  { %450 = vmatprep.subr.bf16.mxu1 %v8319_v30  ;;  %vm359_vm8 = vcmask 261120   ;;  %vm364_vm9 = vcmask 523264   ;;  %vm369_vm10 = vcmask 785408   ;;  %vm8324_vm12 = vmmov 1  }
  0x11   :  { %vm6325_vm11 = vmneg %vm364_vm9 }
  0x12   :  { %7537 = vrot.lane.b32.xlu1 %v7536_v46, %s8317_s1  ;;  %vm8800_vm13 = vmpackc.low %vm8324_vm12, %vm6325_vm11 }
  0x13   :  { %7532 = vrot.lane.b32.xlu0 %v7531_v48, %s8317_s1 }
  0x16   :  { %7547 = vrot.lane.b32.xlu1 %v7546_v49, %s8318_s26 }
  0x17   :  { %7542 = vrot.lane.b32.xlu0 %v7541_v50, %s8318_s26 }
  0x7c   :  { %v7523_v51 = vpop.permute.xlu1 %7522 }
  0x7d   :  { %v7513_v52 = vpop.permute.xlu0 %7512  ;;  %v7525_v59 = vunpack.i.h.bf16 %v7523_v51  ;;  %v7524_v60 = vunpack.i.l.bf16 %v7523_v51 }
  0x7e   :  { %v7515_v54 = vunpack.i.h.bf16 %v7513_v52  ;;  %v7514_v55 = vunpack.i.l.bf16 %v7513_v52  ;;  %v7741_v52 = vld [vmem:[%s10580_s3 + $0x40] sm:$0xff]  }
  0x80   :  { %v7528_v53 = vpop.permute.xlu1 %7527  ;;  %v157_v62 = vsel %vm155_vm3, %v8417_v8, %v7515_v54  ;;  %v156_v63 = vsel %vm155_vm3, %v8423_v10, %v7514_v55 }
  0x81   :  { %v7518_v56 = vpop.permute.xlu0 %7517  ;;  %v7530_v0 = vunpack.i.h.bf16 %v7528_v53  ;;  %v7529_v1 = vunpack.i.l.bf16 %v7528_v53  ;;  %v161_v13 = vsel %vm160_vm4, %v156_v63, %v7524_v60  ;;  %v162_v8 = vsel %vm160_vm4, %v157_v62, %v7525_v59 }
  0x82   :  { %v7520_v57 = vunpack.i.h.bf16 %v7518_v56  ;;  %v7519_v58 = vunpack.i.l.bf16 %v7518_v56 }
  0x84   :  { %v7538_v61 = vpop.permute.xlu1 %7537  ;;  %v159_v3 = vsel %vm155_vm3, %v8432_v17, %v7520_v57  ;;  %v158_v4 = vsel %vm155_vm3, %v8420_v9, %v7519_v58 }
  0x85   :  { %v7533_v2 = vpop.permute.xlu0 %7532  ;;  %v7540_v5 = vunpack.i.h.bf16 %v7538_v61  ;;  %v7539_v6 = vunpack.i.l.bf16 %v7538_v61  ;;  %v163_v10 = vsel %vm160_vm4, %v158_v4, %v7529_v1  ;;  %v164_v14 = vsel %vm160_vm4, %v159_v3, %v7530_v0 }
  0x86   :  { %v7535_v7 = vunpack.i.h.bf16 %v7533_v2  ;;  %v7534_v11 = vunpack.i.l.bf16 %v7533_v2  ;;  %v7742_v2 = vld [vmem:[%s10580_s3 + $0x48] sm:$0xff]   ;;  %s8320_s3 = smov 64  }
  0x87   :  { %v168_v17 = vsel %vm165_vm5, %v163_v10, %v7539_v6  ;;  %v169_v9 = vsel %vm165_vm5, %v164_v14, %v7540_v5 }
  0x88   :  { %v7548_v12 = vpop.permute.xlu1 %7547  ;;  %v166_v23 = vsel %vm165_vm5, %v161_v13, %v7534_v11  ;;  %v167_v24 = vsel %vm165_vm5, %v162_v8, %v7535_v7 }
  0x89   :  { %v7550_v15 = vunpack.i.h.bf16 %v7548_v12  ;;  %v7549_v16 = vunpack.i.l.bf16 %v7548_v12  ;;  %v7543_v18 = vpop.permute.xlu0 %7542 }
  0x8a   :  { %v7545_v19 = vunpack.i.h.bf16 %v7543_v18  ;;  %v7544_v20 = vunpack.i.l.bf16 %v7543_v18 }
  0x8b   :  { %v173_v21 = vsel %vm170_vm6, %v168_v17, %v7549_v16  ;;  %v174_v22 = vsel %vm170_vm6, %v169_v9, %v7550_v15 }
  0x8c   :  { %v176_v25 = vpack.c.bf16 %v174_v22, %v173_v21  ;;  %v171_v26 = vsel %vm170_vm6, %v166_v23, %v7544_v20  ;;  %v172_v27 = vsel %vm170_vm6, %v167_v24, %v7545_v19 }
  0x8d   :  { %v175_v28 = vpack.c.bf16 %v172_v27, %v171_v26 }
  0x8f   :  { %7440 = vmatprep.mubr.msk.bf16.mxu1 %vm192_vm7, %v175_v28 }
  0x90   :  { %7441 = vmatmul.mubr.msk.bf16.vlgmr.msra.gmra.mrb[0].mxu1 %vm192_vm7, %v176_v25 }
  0x91   :  { %451 = vmatpush1.bf16.msra.mxu1 %v7733_v29 }
  0x92   :  { %452 = vmatprep.subr.bf16.mxu1 %v8319_v30 }
  0x95   :  { %453 = vmatpush1.bf16.msra.mxu1 %v7734_v31 }
  0x96   :  { %454 = vmatprep.subr.bf16.mxu1 %v8319_v30 }
  0x99   :  { %455 = vmatpush1.bf16.msra.mxu1 %v7735_v32 }
  0x9a   :  { %456 = vmatprep.subr.bf16.mxu1 %v8319_v30 }
  0x9d   :  { %457 = vmatpush1.bf16.msra.mxu1 %v7736_v33 }
  0x9e   :  { %458 = vmatprep.subr.bf16.mxu1 %v8319_v30 }
  0xa1   :  { %459 = vmatpush1.bf16.msra.mxu1 %v7737_v34 }
  0xa2   :  { %460 = vmatprep.subr.bf16.mxu1 %v8319_v30 }
  0xa5   :  { %461 = vmatpush1.bf16.msra.mxu1 %v7738_v35 }
  0xa6   :  { %462 = vmatprep.subr.bf16.mxu1 %v8319_v30 }
  0xa9   :  { %463 = vmatpush1.bf16.msra.mxu1 %v7739_v36 }
  0xaa   :  { %464 = vmatprep.subr.bf16.mxu1 %v8319_v30 }
  0xad   :  { %465 = vmatpush1.bf16.msra.mxu1 %v7740_v37 }
  0xae   :  { %466 = vmatprep.subr.bf16.mxu1 %v8319_v30 }
  0xb1   :  { %467 = vmatpush1.bf16.msra.mxu1 %v7741_v52 }
  0xb2   :  { %468 = vmatprep.subr.bf16.mxu1 %v8319_v30 }
  0xb5   :  { %469 = vmatpush1.bf16.msra.mxu1 %v7742_v2 }
  0xb6   :  { %1146 = vmatprep.subr.bf16.mxu1 %v8319_v30 }
 0x163   :  { %v7442_v39 = vpop.f32.mrb[0].mxu1 }
 0x164   :  { %v245_v40 = vadd.f32 %v7442_v39, %v6261_v38  ;;  %v236_v41 = vpop.f32.mrb[1].mxu1 }
 0x165   :  { %v237_v42 = vadd.f32 %v6261_v38, %v236_v41  ;;  %v7443_v43 = vpop.f32.mrb[2].mxu1 }
 0x166   :  { %v253_v44 = vmax.f32 %v245_v40, 0.0  ;;  %v248_v45 = vadd.f32 %v7443_v43, %v6261_v38  ;;  %v239_v46 = vpop.f32.mrb[3].mxu1 }
 0x167   :  { %v251_v47 = vmax.f32 %v237_v42, 0.0  ;;  %v240_v48 = vadd.f32 %v6261_v38, %v239_v46 }
 0x168   :  { %v254_v49 = vmax.f32 %v248_v45, 0.0  ;;  %v283_v53 = vrot.slane %v253_v44, 4 }
 0x169   :  { %v280_v50 = vrot.slane %v251_v47, 4  ;;  %v252_v51 = vmax.f32 %v240_v48, 0.0 }
 0x16a   :  { %v285_v54 = vrot.slane %v254_v49, 4 }
 0x16b   :  { %v8526_v55 = vsel %vm61_vm0, 0.0, %v280_v50  ;;  %v281_v56 = vrot.slane %v252_v51, 4 }
 0x16c   :  { %v8529_v57 = vsel %vm61_vm0, %v283_v53, %v285_v54  ;;  %v296_v58 = vrot.slane %v8526_v55, 2  ;;  %v8534_v59 = vsel %vm61_vm0, %v285_v54, 0.0  ;;  %v317_v62 = vrot.slane %v8526_v55, 4 }
 0x16d   :  { %v282_v60 = vsel %vm61_vm0, %v280_v50, %v281_v56  ;;  %v8538_v61 = vsel %vm61_vm0, %v281_v56, %v283_v53  ;;  %v303_v63 = vrot.slane %v8534_v59, 2  ;;  %v301_v1 = vrot.slane %v8529_v57, 2 }
 0x16e   :  { %v375_v0 = vpack.c.bf16 %v8538_v61, %v282_v60  ;;  %v318_v3 = vrot.slane %v282_v60, 4  ;;  %v320_v4 = vrot.slane %v8538_v61, 4  ;;  %v297_v5 = vrot.slane %v282_v60, 2 }
 0x16f   :  { %v299_v6 = vrot.slane %v8538_v61, 2  ;;  %v338_v7 = vrot.slane %v8526_v55, 6  ;;  %v324_v11 = vrot.slane %v8534_v59, 4  ;;  %v339_v12 = vrot.slane %v282_v60, 6 }
 0x170   :  { %6277 = vmatprep.mubr.msk.bf16.mxu1 %vm359_vm8, %v375_v0  ;;  %v341_v13 = vrot.slane %v8538_v61, 6  ;;  %v319_v8 = vsel %vm61_vm0, %v317_v62, %v318_v3  ;;  %v321_v10 = vsel %vm61_vm0, %v318_v3, %v320_v4  ;;  %v298_v14 = vsel %vm78_vm1, %v296_v58, %v297_v5 }
 0x171   :  { %v300_v15 = vsel %vm78_vm1, %v297_v5, %v299_v6  ;;  %v345_v16 = vrot.slane %v8534_v59, 6  ;;  %v7556_v18 = vpack.i.bf16 %v321_v10, %v319_v8  ;;  %v304_v9 = vsel %vm78_vm1, %v301_v1, %v303_v63  ;;  %v7744_v5 = vld [vmem:[%s10584_s7 + $0x108] sm:$0xff]   ;;  %v7755_v8 = vld [vmem:[%s10584_s7 + $0x58] sm:$0xff]  }
 0x172   :  { %v7551_v17 = vpack.i.bf16 %v300_v15, %v298_v14  ;;  %v302_v19 = vsel %vm78_vm1, %v299_v6, %v301_v1  ;;  %v340_v20 = vsel %vm121_vm2, %v338_v7, %v339_v12  ;;  %v342_v21 = vsel %vm121_vm2, %v339_v12, %v341_v13  ;;  %v7749_v6 = vld [vmem:[%s10584_s7 + $0x48] sm:$0xff]   ;;  %v7745_v12 = vld [vmem:[%s10584_s7 + $0x110] sm:$0xff]   ;;  %v7748_v10 = vld [vmem:[%s10584_s7 + $0x118] sm:$0xff]  }
 0x173   :  { %v343_v22 = vrot.slane %v8529_v57, 6  ;;  %7557 = vrot.lane.b32.xlu1 %v7556_v18, %s8320_s3  ;;  %v322_v23 = vrot.slane %v8529_v57, 4  ;;  %v7566_v24 = vpack.i.bf16 %v304_v9, %v302_v19  ;;  %v7561_v25 = vpack.i.bf16 %v342_v21, %v340_v20  ;;  %v7750_v7 = vld [vmem:[%s10584_s7 + $0x8] sm:$0xff]   ;;  %v7756_v14 = vld [vmem:[%s10584_s7 + $0x18] sm:$0xff]   ;;  %v7758_v15 = vld [vmem:[%s10584_s7 + $0x60] sm:$0xff]  }
 0x174   :  { %7552 = vrot.lane.b32.xlu0 %v7551_v17, %s8321_s30  ;;  %v377_v54 = vpack.c.bf16 %v8534_v59, %v8529_v57  ;;  %v7759_v18 = vld [vmem:[%s10584_s7 + $0x20] sm:$0xff]   ;;  %v7761_v17 = vld [vmem:[%s10584_s7 + $0x68] sm:$0xff]   ;;  %v7764_v20 = vld [vmem:[%s10584_s7 + $0x70] sm:$0xff]  }
 0x175   :  { %v344_v26 = vsel %vm121_vm2, %v341_v13, %v343_v22  ;;  %v346_v27 = vsel %vm121_vm2, %v343_v22, %v345_v16  ;;  %v323_v28 = vsel %vm61_vm0, %v320_v4, %v322_v23  ;;  %v325_v29 = vsel %vm61_vm0, %v322_v23, %v324_v11  ;;  %v7747_v4 = vld [vmem:[%s10584_s7] sm:$0xff]   ;;  %v7752_v11 = vld [vmem:[%s10584_s7 + $0x50] sm:$0xff]   ;;  %v7754_v9 = vld [vmem:[%s10584_s7 + $0x128] sm:$0xff]  }
 0x176   :  { %v7576_v31 = vpack.i.bf16 %v346_v27, %v344_v26  ;;  %v7571_v32 = vpack.i.bf16 %v325_v29, %v323_v28  ;;  %v7753_v13 = vld [vmem:[%s10584_s7 + $0x10] sm:$0xff]   ;;  %v7751_v16 = vld [vmem:[%s10584_s7 + $0x120] sm:$0xff]   ;;  %v7762_v19 = vld [vmem:[%s10584_s7 + $0x28] sm:$0xff]  }
 0x177   :  { %7567 = vrot.lane.b32.xlu1 %v7566_v24, %s8321_s30  ;;  %v7757_v21 = vld [vmem:[%s10584_s7 + $0x130] sm:$0xff]   ;;  %v7760_v23 = vld [vmem:[%s10584_s7 + $0x138] sm:$0xff]   ;;  %v6266_v24 = vld [vmem:[%s10581_s4] ss:$0 sm:$0xff] }
 0x178   :  { %7562 = vrot.lane.b32.xlu0 %v7561_v25, %s8322_s15  ;;  %v7765_v22 = vld [vmem:[%s10584_s7 + $0x30] sm:$0xff]   ;;  %v7763_v26 = vld [vmem:[%s10584_s7 + $0x140] sm:$0xff]  }
 0x17b   :  { %7577 = vrot.lane.b32.xlu1 %v7576_v31, %s8322_s15 }
 0x17c   :  { %7572 = vrot.lane.b32.xlu0 %v7571_v32, %s8320_s3 }
 0x1e5   :  { %v7558_v33 = vpop.permute.xlu1 %7557 }
 0x1e6   :  { %v7553_v34 = vpop.permute.xlu0 %7552  ;;  %v7560_v37 = vunpack.i.h.bf16 %v7558_v33  ;;  %v7559_v38 = vunpack.i.l.bf16 %v7558_v33  ;;  %v7766_v33 = vld [vmem:[%s10584_s7 + $0x148] sm:$0xff]  }
 0x1e7   :  { %v7555_v35 = vunpack.i.h.bf16 %v7553_v34  ;;  %v7554_v36 = vunpack.i.l.bf16 %v7553_v34 }
 0x1e9   :  { %v361_v39 = vsel %vm359_vm8, %v282_v60, %v7555_v35  ;;  %v360_v40 = vsel %vm359_vm8, %v8526_v55, %v7554_v36  ;;  %v7568_v41 = vpop.permute.xlu1 %7567 }
 0x1ea   :  { %v7563_v42 = vpop.permute.xlu0 %7562  ;;  %v7570_v45 = vunpack.i.h.bf16 %v7568_v41  ;;  %v7569_v46 = vunpack.i.l.bf16 %v7568_v41  ;;  %v365_v47 = vsel %vm364_vm9, %v360_v40, %v7559_v38  ;;  %v366_v48 = vsel %vm364_vm9, %v361_v39, %v7560_v37 }
 0x1eb   :  { %v7565_v43 = vunpack.i.h.bf16 %v7563_v42  ;;  %v7564_v44 = vunpack.i.l.bf16 %v7563_v42 }
 0x1ec   :  { %v363_v62 = vsel %vm359_vm8, %v8529_v57, %v7570_v45  ;;  %v362_v63 = vsel %vm359_vm8, %v8538_v61, %v7569_v46  ;;  %v7743_v57 = vld [vmem:[%s10584_s7 + $0x100] sm:$0xff]  }
 0x1ed   :  { %v370_v49 = vsel %vm369_vm10, %v365_v47, %v7564_v44  ;;  %v371_v50 = vsel %vm369_vm10, %v366_v48, %v7565_v43  ;;  %v7578_v52 = vpop.permute.xlu1 %7577  ;;  %v7746_v61 = vld [vmem:[%s10584_s7 + $0x40] sm:$0xff]  }
 0x1ee   :  { %v374_v51 = vpack.c.bf16 %v371_v50, %v370_v49  ;;  %v7573_v53 = vpop.permute.xlu0 %7572  ;;  %v7580_v55 = vunpack.i.h.bf16 %v7578_v52  ;;  %v7579_v56 = vunpack.i.l.bf16 %v7578_v52  ;;  %7095 = vmatprep.subr.bf16.mxu0 %v7746_v61 }
 0x1ef   :  { %v7575_v58 = vunpack.i.h.bf16 %v7573_v53  ;;  %v7574_v60 = vunpack.i.l.bf16 %v7573_v53  ;;  %7096 = vmatpush3.bf16.msra.mxu0 %v7747_v4 }
 0x1f0   :  { %483 = vmatmul.mubr.bf16.vlgmr.msra.gmra.mrb[4].mxu1 %v374_v51  ;;  %7097 = vmatprep.subr.bf16.mxu0 %v7749_v6 }
 0x1f1   :  { %v368_v0 = vsel %vm364_vm9, %v363_v62, %v7575_v58  ;;  %v367_v1 = vsel %vm364_vm9, %v362_v63, %v7574_v60  ;;  %6278 = vmatprep.mubr.msk.bf16.mxu1 %vm359_vm8, %v377_v54  ;;  %1147 = vmatpush1.bf16.msra.mxu1 %v7743_v57 }
 0x1f2   :  { %v372_v2 = vsel %vm369_vm10, %v367_v1, %v7579_v56  ;;  %v373_v59 = vsel %vm369_vm10, %v368_v0, %v7580_v55  ;;  %1148 = vmatprep.subr.bf16.mxu1 %v8319_v30 }
 0x1f3   :  { %v376_v3 = vpack.c.bf16 %v373_v59, %v372_v2  ;;  %7098 = vmatpush3.bf16.msra.mxu0 %v7750_v7 }
 0x1f4   :  { %7099 = vmatprep.subr.bf16.mxu0 %v7752_v11 }
 0x1f5   :  { %1149 = vmatpush1.bf16.msra.mxu1 %v7744_v5 }
 0x1f6   :  { %1150 = vmatprep.subr.bf16.mxu1 %v8319_v30 }
 0x1f7   :  { %7100 = vmatpush3.bf16.msra.mxu0 %v7753_v13 }
 0x1f8   :  { %491 = vmatmul.mubr.bf16.gmra.mrb[8].mxu1 %v376_v3  ;;  %7101 = vmatprep.subr.bf16.mxu0 %v7755_v8 }
 0x1f9   :  { %1151 = vmatpush1.bf16.msra.mxu1 %v7745_v12 }
 0x1fa   :  { %1152 = vmatprep.subr.bf16.mxu1 %v8319_v30 }
 0x1fb   :  { %7102 = vmatpush3.bf16.msra.mxu0 %v7756_v14 }
 0x1fc   :  { %7103 = vmatprep.subr.bf16.mxu0 %v7758_v15 }
 0x1fd   :  { %1153 = vmatpush1.bf16.msra.mxu1 %v7748_v10 }
 0x1fe   :  { %1154 = vmatprep.subr.bf16.mxu1 %v8319_v30 }
 0x1ff   :  { %7104 = vmatpush3.bf16.msra.mxu0 %v7759_v18 }
 0x200   :  { %7105 = vmatprep.subr.bf16.mxu0 %v7761_v17  ;;  %v544_v17 = vlaneseq }
 0x201   :  { %1155 = vmatpush1.bf16.msra.mxu1 %v7751_v16 }
 0x202   :  { %1156 = vmatprep.subr.bf16.mxu1 %v8319_v30 }
 0x203   :  { %7106 = vmatpush3.bf16.msra.mxu0 %v7762_v19  ;;  %v503_v19 = vld [vmem:[%s10582_s5] sm:$0x1] }
 0x204   :  { %7107 = vmatprep.subr.bf16.mxu0 %v7764_v20 }
 0x205   :  { %1157 = vmatpush1.bf16.msra.mxu1 %v7754_v9  ;;  %v8698_v9 = vshrl.u32 %v544_v17, 7 }
 0x206   :  { %1158 = vmatprep.subr.bf16.mxu1 %v8319_v30 }
 0x207   :  { %7108 = vmatpush3.bf16.msra.mxu0 %v7765_v22  ;;  %v8704_v20 = vsub.s32 0, %v8698_v9 }
 0x209   :  { %1159 = vmatpush1.bf16.msra.mxu1 %v7757_v21 }
 0x20a   :  { %1160 = vmatprep.subr.bf16.mxu1 %v8319_v30 }
 0x20d   :  { %1161 = vmatpush1.bf16.msra.mxu1 %v7760_v23 }
 0x20e   :  { %1162 = vmatprep.subr.bf16.mxu1 %v8319_v30 }
 0x211   :  { %1163 = vmatpush1.bf16.msra.mxu1 %v7763_v26 }
 0x212   :  { %1164 = vmatprep.subr.bf16.mxu1 %v8319_v30 }
 0x215   :  { %1165 = vmatpush1.bf16.msra.mxu1 %v7766_v33 }
 0x216   :  { %1166 = vmatprep.subr.bf16.mxu1 %v8319_v30 }
 0x2c3   :  { %v484_v25 = vpop.f32.mrb[4].mxu1 }
 0x2c4   :  { %v486_v27 = vpop.f32.mrb[5].mxu1  ;;  %v485_v29 = vadd.f32 %v6266_v24, %v484_v25 }
 0x2c5   :  { %v487_v28 = vpop.f32.mrb[6].mxu1 }
 0x2c6   :  { %v488_v31 = vadd.f32 %v6266_v24, %v487_v28  ;;  %v489_v32 = vpop.f32.mrb[7].mxu1  ;;  %v8675_v35 = vmax.f32 %v485_v29, 0.0 }
 0x2c8   :  { %v8672_v34 = vmax.f32 %v488_v31, 0.0  ;;  %v505_v41 = vsel %vm364_vm9, %v8675_v35, 0.0 }
 0x2ca   :  { %v506_v37 = vsel %vm364_vm9, %v8672_v34, 0.0 }
 0x2cb   :  { %v492_v36 = vpop.f32.mrb[8].mxu1  ;;  %v507_v45 = vadd.f32 %v506_v37, %v505_v41 }
 0x2cc   :  { %v493_v38 = vadd.f32 %v6266_v24, %v492_v36  ;;  %v494_v39 = vpop.f32.mrb[9].mxu1 }
 0x2cd   :  { %v495_v40 = vpop.f32.mrb[10].mxu1 }
 0x2ce   :  { %v8682_v42 = vmax.f32 %v493_v38, 0.0  ;;  %v496_v43 = vadd.f32 %v6266_v24, %v495_v40  ;;  %v497_v44 = vpop.f32.mrb[11].mxu1  ;;  %v6279_v24 = vld [vmem:[%s10583_s6] ss:$0 sm:$0xff] }
 0x2d0   :  { %v508_v46 = vsel %vm364_vm9, %v8682_v42, 0.0  ;;  %v8686_v47 = vmax.f32 %v496_v43, 0.0 }
 0x2d1   :  { %v509_v48 = vadd.f32 %v508_v46, %v507_v45  ;;  %v7767_v45 = vld [vmem:[%s10584_s7 + $0x78] sm:$0xff]  }
 0x2d2   :  { %v510_v49 = vsel %vm364_vm9, %v8686_v47, 0.0  ;;  %v7768_v46 = vld [vmem:[%s10584_s7 + $0x38] sm:$0xff]   ;;  %7109 = vmatprep.subr.bf16.mxu0 %v7767_v45 }
 0x2d3   :  { %v511_v50 = vadd.f32 %v510_v49, %v509_v48  ;;  %v8323_v48 = vmov 0.0   ;;  %7110 = vmatpush3.bf16.msra.mxu0 %v7768_v46 }
 0x2d4   :  { %v8717_v49 = vrot.slane %v8323_v48, 2 }
 0x2d5   :  { %v512_v51 = vrot.slane %v511_v50, 4 }
 0x2d7   :  { %v513_v52 = vadd.f32 %v512_v51, %v511_v50  ;;  %v8720_v50 = vrot.slane %v8323_v48, 6  ;;  %v7769_v51 = vld [vmem:[%s10584_s7 + $0x150] sm:$0xff]  }
 0x2d8   :  { %1167 = vmatpush1.bf16.msra.mxu1 %v7769_v51 }
 0x2d9   :  { %v514_v53 = vrot.slane %v513_v52, 2  ;;  %1168 = vmatprep.subr.bf16.mxu1 %v8319_v30 }
 0x2db   :  { %v515_v54 = vadd.f32 %v514_v53, %v513_v52 }
 0x2dd   :  { %v516_v55 = vrot.slane %v515_v54, 1 }
 0x2df   :  { %v517_v56 = vadd.f32 %v516_v55, %v515_v54 }
 0x2e1   :  { %v518_v58 = vmul.f32 0.03125, %v517_v56 }
 0x2e3   :  { %v519_v60 = vsub.f32 %v8675_v35, %v518_v58  ;;  %v520_v62 = vsub.f32 %v8672_v34, %v518_v58  ;;  %v521_v63 = vsub.f32 %v8682_v42, %v518_v58  ;;  %v522_v0 = vsub.f32 %v8686_v47, %v518_v58 }
 0x2e5   :  { %v523_v1 = vmul.f32 %v519_v60, %v519_v60  ;;  %v524_v2 = vmul.f32 %v520_v62, %v520_v62  ;;  %v525_v59 = vmul.f32 %v521_v63, %v521_v63  ;;  %v526_v3 = vmul.f32 %v522_v0, %v522_v0 }
 0x2e7   :  { %v527_v57 = vsel %vm364_vm9, %v523_v1, 0.0  ;;  %v528_v61 = vsel %vm364_vm9, %v524_v2, 0.0  ;;  %v530_v5 = vsel %vm364_vm9, %v525_v59, 0.0  ;;  %v532_v7 = vsel %vm364_vm9, %v526_v3, 0.0  ;;  %v7770_v59 = vld [vmem:[%s10584_s7 + $0xc0] sm:$0xff]  }
 0x2e8   :  { %v529_v4 = vadd.f32 %v528_v61, %v527_v57  ;;  %7123 = vmatprep.subr.bf16.mxu0 %v7770_v59 }
 0x2ea   :  { %v531_v6 = vadd.f32 %v530_v5, %v529_v4  ;;  %v7772_v5 = vld [vmem:[%s10584_s7 + $0x158] sm:$0xff]  }
 0x2eb   :  { %1169 = vmatpush1.bf16.msra.mxu1 %v7772_v5 }
 0x2ec   :  { %v533_v11 = vadd.f32 %v532_v7, %v531_v6 }
 0x2ee   :  { %v534_v12 = vrot.slane %v533_v11, 4 }
 0x2f0   :  { %v535_v13 = vadd.f32 %v534_v12, %v533_v11 }
 0x2f2   :  { %v536_v8 = vrot.slane %v535_v13, 2 }
 0x2f4   :  { %v537_v10 = vadd.f32 %v536_v8, %v535_v13 }
 0x2f6   :  { %v538_v14 = vrot.slane %v537_v10, 1 }
 0x2f8   :  { %v539_v15 = vadd.f32 %v538_v14, %v537_v10 }
 0x2fa   :  { %v540_v16 = vmul.f32 0.03125, %v539_v15 }
 0x2fc   :  { %v541_v18 = vadd.f32 1e-05, %v540_v16 }
 0x2fe   :  { %8007 = vrsqrt.f32 %v541_v18 }
 0x308   :  { %v8008_v21 = vpop.eup %8007 }
 0x309   :  { %v543_v22 = vmul.f32 %v8008_v21, %v503_v19 }
 0x30b   :  { %v547_v23 = vrot.slane %v543_v22, %v8704_v20 }
 0x30d   :  { %v549_v25 = vmul.f32 %v547_v23, %v520_v62  ;;  %v550_v26 = vmul.f32 %v547_v23, %v521_v63  ;;  %v551_v27 = vmul.f32 %v547_v23, %v522_v0  ;;  %v548_v28 = vmul.f32 %v547_v23, %v519_v60 }
 0x30f   :  { %v559_v29 = vadd.f32 %v6279_v24, %v549_v25  ;;  %v560_v31 = vadd.f32 %v6279_v24, %v550_v26  ;;  %v561_v32 = vadd.f32 %v6279_v24, %v551_v27  ;;  %v558_v33 = vadd.f32 %v6279_v24, %v548_v28 }
 0x311   :  { %v563_v36 = vmax.f32 %v559_v29, 0.0  ;;  %v564_v37 = vmax.f32 %v560_v31, 0.0  ;;  %v565_v38 = vmax.f32 %v561_v32, 0.0  ;;  %v562_v39 = vmax.f32 %v558_v33, 0.0 }
 0x312   :  { %v8786_v29 = vrot.slane %v8323_v48, 4 }
 0x313   :  { %v662_v40 = vrot.slane %v564_v37, 6  ;;  %v664_v41 = vrot.slane %v565_v38, 6  ;;  %v659_v43 = vrot.slane %v562_v39, 6  ;;  %v660_v44 = vrot.slane %v563_v36, 6 }
 0x315   :  { %v8726_v52 = vsel %vm121_vm2, %v662_v40, %v664_v41  ;;  %v8729_v53 = vsel %vm121_vm2, %v664_v41, 0.0  ;;  %v8732_v54 = vsel %vm121_vm2, %v659_v43, %v660_v44  ;;  %v8735_v55 = vsel %vm121_vm2, 0.0, %v659_v43 }
 0x316   :  { %v710_v56 = vrot.slane %v8735_v55, 6  ;;  %v712_v58 = vrot.slane %v8732_v54, 6  ;;  %v8740_v60 = vsel %vm121_vm2, %v660_v44, %v662_v40  ;;  %v699_v62 = vrot.slane %v8732_v54, 4 }
 0x317   :  { %v701_v63 = vrot.slane %v8740_v60, 4  ;;  %v703_v0 = vrot.slane %v8726_v52, 4  ;;  %v676_v1 = vrot.slane %v8735_v55, 2  ;;  %v678_v2 = vrot.slane %v8732_v54, 2 }
 0x318   :  { %v711_v3 = vsel %vm121_vm2, %v8720_v50, %v710_v56  ;;  %v713_v57 = vsel %vm121_vm2, %v710_v56, %v712_v58  ;;  %v714_v61 = vrot.slane %v8740_v60, 6  ;;  %v716_v4 = vrot.slane %v8726_v52, 6 }
 0x319   :  { %v7581_v6 = vpack.i.bf16 %v713_v57, %v711_v3  ;;  %v702_v7 = vsel %vm61_vm0, %v699_v62, %v701_v63  ;;  %v704_v11 = vsel %vm61_vm0, %v701_v63, %v703_v0  ;;  %v677_v12 = vsel %vm78_vm1, %v8717_v49, %v676_v1 }
 0x31a   :  { %v766_v13 = vpack.c.bf16 %v704_v11, %v702_v7  ;;  %v679_v8 = vsel %vm78_vm1, %v676_v1, %v678_v2  ;;  %v715_v10 = vsel %vm121_vm2, %v712_v58, %v714_v61  ;;  %v717_v14 = vsel %vm121_vm2, %v714_v61, %v716_v4  ;;  %v7771_v1 = vld [vmem:[%s10584_s7 + $0x80] sm:$0xff]  }
 0x31b   :  { %7582 = vrot.lane.b32.xlu0 %v7581_v6, %s8320_s3  ;;  %v7586_v15 = vpack.i.bf16 %v677_v12, %v679_v8  ;;  %v680_v16 = vrot.slane %v8740_v60, 2  ;;  %v682_v18 = vrot.slane %v8726_v52, 2  ;;  %v731_v17 = vrot.slane %v8729_v53, 2 }
 0x31c   :  { %6329 = vmatprep.mubr.msk.bf16.mxu1 %vm364_vm9, %v766_v13  ;;  %v739_v19 = vrot.slane %v8729_v53, 6  ;;  %v7591_v21 = vpack.i.bf16 %v717_v14, %v715_v10  ;;  %v697_v31 = vrot.slane %v8735_v55, 4  ;;  %v736_v51 = vrot.slane %v8729_v53, 4 }
 0x31d   :  { %7587 = vrot.lane.b32.xlu1 %v7586_v15, %s8320_s3  ;;  %v681_v22 = vsel %vm78_vm1, %v678_v2, %v680_v16  ;;  %v683_v23 = vsel %vm78_vm1, %v680_v16, %v682_v18  ;;  %v732_v24 = vsel %vm78_vm1, %v682_v18, %v731_v17  ;;  %v744_v28 = vsel %vm78_vm1, %v731_v17, %v8717_v49  ;;  %v7777_v16 = vld [vmem:[%s10584_s7 + $0xd8] sm:$0xff]  }
 0x31e   :  { %v740_v25 = vsel %vm121_vm2, %v716_v4, %v739_v19  ;;  %v7596_v26 = vpack.i.bf16 %v683_v23, %v681_v22  ;;  %v698_v38 = vsel %vm61_vm0, %v8786_v29, %v697_v31  ;;  %v700_v39 = vsel %vm61_vm0, %v697_v31, %v699_v62  ;;  %v7779_v23 = vld [vmem:[%s10584_s7 + $0xe0] sm:$0xff]   ;;  %v7786_v31 = vld [vmem:[%s10584_s7 + $0xb8] sm:$0xff]  }
 0x31f   :  { %7592 = vrot.lane.b32.xlu0 %v7591_v21, %s8320_s3  ;;  %v7601_v27 = vpack.i.bf16 %v732_v24, %v740_v25  ;;  %v737_v12 = vsel %vm61_vm0, %v703_v0, %v736_v51  ;;  %v748_v13 = vsel %vm61_vm0, %v736_v51, %v8786_v29  ;;  %v7775_v0 = vld [vmem:[%s10584_s7 + $0xd0] sm:$0xff]   ;;  %v7778_v21 = vld [vmem:[%s10584_s7 + $0x98] sm:$0xff]   ;;  %v7782_v24 = vld [vmem:[%s10584_s7 + $0xa8] sm:$0xff]  }
 0x320   :  { %v771_v15 = vpack.c.bf16 %v748_v13, %v737_v12  ;;  %v7783_v25 = vld [vmem:[%s10584_s7 + $0xf0] sm:$0xff]  }
 0x321   :  { %7597 = vrot.lane.b32.xlu1 %v7596_v26, %s8320_s3  ;;  %v7784_v26 = vld [vmem:[%s10584_s7 + $0xb0] sm:$0xff]  }
 0x323   :  { %7602 = vrot.lane.b32.xlu0 %v7601_v27, %s8320_s3  ;;  %v7785_v27 = vld [vmem:[%s10584_s7 + $0xf8] sm:$0xff]  }
 0x325   :  { %745 = vrot.lane.b32.xlu1 %v744_v28, %s8320_s3 }
 0x38d   :  { %v7583_v32 = vpop.permute.xlu0 %7582 }
 0x38e   :  { %v7585_v33 = vunpack.i.h.bf16 %v7583_v32  ;;  %v7584_v36 = vunpack.i.l.bf16 %v7583_v32 }
 0x38f   :  { %v7588_v37 = vpop.permute.xlu1 %7587 }
 0x390   :  { %v7590_v40 = vunpack.i.h.bf16 %v7588_v37  ;;  %v7589_v41 = vunpack.i.l.bf16 %v7588_v37  ;;  %v754_v43 = vsel %vm364_vm9, %v698_v38, %v7584_v36  ;;  %v755_v44 = vsel %vm364_vm9, %v700_v39, %v7585_v33 }
 0x391   :  { %v7593_v45 = vpop.permute.xlu0 %7592  ;;  %v762_v46 = vpack.c.bf16 %v755_v44, %v754_v43 }
 0x392   :  { %v8798_v56 = vsel %vm364_vm9, %v8735_v55, %v7589_v41  ;;  %v7595_v58 = vunpack.i.h.bf16 %v7593_v45  ;;  %v7594_v63 = vunpack.i.l.bf16 %v7593_v45  ;;  %v7773_v55 = vld [vmem:[%s10584_s7 + $0xc8] sm:$0xff]   ;;  %v7788_v45 = vld [vmem:[%s10584_s7 + $0x160] sm:$0xff]  }
 0x393   :  { %v6327_v2 = vpack.c.bf16 %v8798_v56, %v7590_v40  ;;  %v7598_v59 = vpop.permute.xlu1 %7597  ;;  %1080 = vmatprep.mubr.bf16.mxu0 %v762_v46  ;;  %v7789_v46 = vld [vmem:[%s10584_s7 + $0x1a8] sm:$0xff]  }
 0x394   :  { %v7600_v3 = vunpack.i.h.bf16 %v7598_v59  ;;  %v7599_v57 = vunpack.i.l.bf16 %v7598_v59  ;;  %v756_v61 = vsel %vm364_vm9, %v702_v7, %v7594_v63  ;;  %v757_v4 = vsel %vm364_vm9, %v704_v11, %v7595_v58  ;;  %v7774_v11 = vld [vmem:[%s10584_s7 + $0x88] sm:$0xff]   ;;  %v7791_v58 = vld [vmem:[%s10584_s7 + $0x220] sm:$0xff]  }
 0x395   :  { %6328 = vmatmul.mubr.msk.bf16.vlgmr.msra.gmra.mrb[0].mxu0 %vm8800_vm13, %v6327_v2  ;;  %v7603_v5 = vpop.permute.xlu0 %7602  ;;  %v767_v6 = vpack.c.bf16 %v757_v4, %v756_v61  ;;  %v764_v18 = vpack.c.bf16 %v756_v61, %v755_v44  ;;  %v7787_v44 = vld [vmem:[%s10584_s7 + $0x1a0] sm:$0xff]   ;;  %v7795_v2 = vld [vmem:[%s10584_s7 + $0x228] sm:$0xff]   ;;  %7179 = vmatprep.subr.bf16.mxu1 %v7791_v58 }
 0x396   :  { %v753_v8 = vsel %vm364_vm9, %v8740_v60, %v7600_v3  ;;  %v752_v7 = vsel %vm364_vm9, %v8732_v54, %v7599_v57  ;;  %7124 = vmatpush3.bf16.msra.mxu0 %v7771_v1  ;;  %v7605_v14 = vunpack.i.h.bf16 %v7603_v5  ;;  %v7776_v54 = vld [vmem:[%s10584_s7 + $0x90] sm:$0xff]   ;;  %v7604_v28 = vunpack.i.l.bf16 %v7603_v5  ;;  %v7792_v63 = vld [vmem:[%s10584_s7 + $0x1e0] sm:$0xff]   ;;  %v7796_v61 = vld [vmem:[%s10584_s7 + $0x1e8] sm:$0xff]  }
 0x397   :  { %v765_v10 = vpack.c.bf16 %v753_v8, %v752_v7  ;;  %1088 = vmatprep.mubr.bf16.mxu0 %v767_v6  ;;  %7125 = vmatprep.subr.bf16.mxu0 %v7773_v55  ;;  %v746_v60 = vpop.permute.xlu1 %745  ;;  %v763_v33 = vpack.c.bf16 %v752_v7, %v8798_v56  ;;  %v7790_v55 = vld [vmem:[%s10584_s7 + $0x168] sm:$0xff]   ;;  %v7793_v57 = vld [vmem:[%s10584_s7 + $0x1b0] sm:$0xff]  }
 0x398   :  { %v758_v17 = vsel %vm364_vm9, %v8726_v52, %v7605_v14  ;;  %v760_v19 = vsel %vm364_vm9, %v8729_v53, %v746_v60  ;;  %v7780_v52 = vld [vmem:[%s10584_s7 + $0xa0] sm:$0xff]   ;;  %v7781_v53 = vld [vmem:[%s10584_s7 + $0xe8] sm:$0xff]   ;;  %v759_v32 = vsel %vm364_vm9, %v737_v12, %v7604_v28  ;;  %v7799_v5 = vld [vmem:[%s10584_s7 + $0x230] sm:$0xff]  }
 0x399   :  { %1179 = vmatmul.mubr.bf16.vlgmr.msra.gmra.mrb[12].mxu1 %v765_v10  ;;  %v770_v22 = vpack.c.bf16 %v760_v19, %v758_v17  ;;  %v769_v36 = vpack.c.bf16 %v759_v32, %v757_v4  ;;  %v768_v37 = vpack.c.bf16 %v758_v17, %v753_v8  ;;  %v7794_v8 = vld [vmem:[%s10584_s7 + $0x170] sm:$0xff]   ;;  %v7801_v17 = vld [vmem:[%s10584_s7 + $0x1c0] sm:$0xff]   ;;  %v7804_v19 = vld [vmem:[%s10584_s7 + $0x1f8] sm:$0xff]  }
 0x39a   :  { %7126 = vmatpush3.bf16.msra.mxu0 %v7774_v11  ;;  %6330 = vmatprep.mubr.msk.bf16.mxu1 %vm364_vm9, %v771_v15  ;;  %v7797_v11 = vld [vmem:[%s10584_s7 + $0x1b8] sm:$0xff]   ;;  %v6280_v28 = vld [vmem:[%s10585_s8] ss:$0 sm:$0xff] }
 0x39b   :  { %7127 = vmatprep.subr.bf16.mxu0 %v7775_v0  ;;  %7180 = vmatpush3.bf16.msra.mxu1 %v7792_v63  ;;  %v7803_v15 = vld [vmem:[%s10584_s7 + $0x238] sm:$0xff]  }
 0x39c   :  { %7181 = vmatprep.subr.bf16.mxu1 %v7795_v2 }
 0x39d   :  { %1089 = vmatmul.mubr.bf16.gmra.mrb[4].mxu0 %v765_v10  ;;  %v7800_v10 = vld [vmem:[%s10584_s7 + $0x1f0] sm:$0xff]  }
 0x39e   :  { %7128 = vmatpush3.bf16.msra.mxu0 %v7776_v54  ;;  %1129 = vmatprep.mubr.bf16.mxu0 %v764_v18 }
 0x39f   :  { %7129 = vmatprep.subr.bf16.mxu0 %v7777_v16  ;;  %7182 = vmatpush3.bf16.msra.mxu1 %v7796_v61  ;;  %v7798_v16 = vld [vmem:[%s10584_s7 + $0x178] sm:$0xff]  }
 0x3a0   :  { %7183 = vmatprep.subr.bf16.mxu1 %v7799_v5 }
 0x3a1   :  { %1187 = vmatmul.mubr.bf16.gmra.mrb[16].mxu1 %v770_v22  ;;  %v7802_v22 = vld [vmem:[%s10584_s7 + $0x180] sm:$0xff]  }
 0x3a2   :  { %7130 = vmatpush3.bf16.msra.mxu0 %v7778_v21  ;;  %v7807_v21 = vld [vmem:[%s10584_s7 + $0x240] sm:$0xff]  }
 0x3a3   :  { %7131 = vmatprep.subr.bf16.mxu0 %v7779_v23  ;;  %7184 = vmatpush3.bf16.msra.mxu1 %v7800_v10  ;;  %v7805_v23 = vld [vmem:[%s10584_s7 + $0x1c8] sm:$0xff]  }
 0x3a4   :  { %7185 = vmatprep.subr.bf16.mxu1 %v7803_v15 }
 0x3a6   :  { %7132 = vmatpush3.bf16.msra.mxu0 %v7780_v52  ;;  %v7808_v52 = vld [vmem:[%s10584_s7 + $0x200] sm:$0xff]  }
 0x3a7   :  { %7133 = vmatprep.subr.bf16.mxu0 %v7781_v53  ;;  %7186 = vmatpush3.bf16.msra.mxu1 %v7804_v19  ;;  %v7811_v53 = vld [vmem:[%s10584_s7 + $0x248] sm:$0xff]  }
 0x3a8   :  { %7187 = vmatprep.subr.bf16.mxu1 %v7807_v21 }
 0x3aa   :  { %7134 = vmatpush3.bf16.msra.mxu0 %v7782_v24  ;;  %v7806_v24 = vld [vmem:[%s10584_s7 + $0x188] sm:$0xff]  }
 0x3ab   :  { %7135 = vmatprep.subr.bf16.mxu0 %v7783_v25  ;;  %7188 = vmatpush3.bf16.msra.mxu1 %v7808_v52  ;;  %v7809_v25 = vld [vmem:[%s10584_s7 + $0x1d0] sm:$0xff]  }
 0x3ac   :  { %7189 = vmatprep.subr.bf16.mxu1 %v7811_v53 }
 0x3ae   :  { %7136 = vmatpush3.bf16.msra.mxu0 %v7784_v26  ;;  %v7812_v26 = vld [vmem:[%s10584_s7 + $0x208] sm:$0xff]  }
 0x3af   :  { %7137 = vmatprep.subr.bf16.mxu0 %v7785_v27  ;;  %v7810_v27 = vld [vmem:[%s10584_s7 + $0x190] sm:$0xff]   ;;  %7190 = vmatpush3.bf16.msra.mxu1 %v7812_v26 }
 0x3b2   :  { %7138 = vmatpush3.bf16.msra.mxu0 %v7786_v31 }
 0x3b3   :  { %7151 = vmatprep.subr.bf16.mxu0 %v7787_v44 }
 0x3b5   :  { %1130 = vmatmul.mubr.bf16.vlgmr.msra.gmra.mrb[8].mxu0 %v763_v33 }
 0x3b6   :  { %1137 = vmatprep.mubr.bf16.mxu0 %v769_v36  ;;  %7152 = vmatpush3.bf16.msra.mxu0 %v7788_v45 }
 0x3b7   :  { %7153 = vmatprep.subr.bf16.mxu0 %v7789_v46 }
 0x3ba   :  { %7154 = vmatpush3.bf16.msra.mxu0 %v7790_v55 }
 0x3bb   :  { %7155 = vmatprep.subr.bf16.mxu0 %v7793_v57 }
 0x3bd   :  { %1138 = vmatmul.mubr.bf16.gmra.mrb[12].mxu0 %v768_v37 }
 0x3be   :  { %7156 = vmatpush3.bf16.msra.mxu0 %v7794_v8 }
 0x3bf   :  { %7157 = vmatprep.subr.bf16.mxu0 %v7797_v11 }
 0x3c2   :  { %7158 = vmatpush3.bf16.msra.mxu0 %v7798_v16 }
 0x3c3   :  { %7159 = vmatprep.subr.bf16.mxu0 %v7801_v17 }
 0x3c6   :  { %7160 = vmatpush3.bf16.msra.mxu0 %v7802_v22 }
 0x3c7   :  { %7161 = vmatprep.subr.bf16.mxu0 %v7805_v23 }
 0x3ca   :  { %7162 = vmatpush3.bf16.msra.mxu0 %v7806_v24 }
 0x3cb   :  { %7163 = vmatprep.subr.bf16.mxu0 %v7809_v25 }
 0x3ce   :  { %7164 = vmatpush3.bf16.msra.mxu0 %v7810_v27 }
 0x468   :  { %v7111_v38 = vpop.f32.mrb[0].mxu0 }
 0x469   :  { %v7112_v39 = vpop.f32.mrb[1].mxu0 }
 0x46a   :  { %v8870_v40 = vadd.f32 %v7112_v39, %v7111_v38  ;;  %v7114_v41 = vpop.f32.mrb[2].mxu0 }
 0x46b   :  { %v7115_v43 = vpop.f32.mrb[3].mxu0 }
 0x46c   :  { %v8881_v51 = vadd.f32 %v7115_v43, %v7114_v41  ;;  %v8883_v56 = vpop.f32.mrb[12].mxu1  ;;  %v1083_v33 = vadd.f32 %v8870_v40, %v6280_v28 }
 0x46d   :  { %v1182_v1 = vpop.f32.mrb[13].mxu1 }
 0x46e   :  { %v8894_v59 = vpop.f32.mrb[14].mxu1  ;;  %v1086_v39 = vadd.f32 %v8881_v51, %v6280_v28 }
 0x46f   :  { %v1185_v3 = vpop.f32.mrb[15].mxu1 }
 0x470   :  { %v7117_v4 = vpop.f32.mrb[4].mxu0 }
 0x471   :  { %v7118_v6 = vpop.f32.mrb[5].mxu0 }
 0x472   :  { %v7119_v12 = vadd.f32 %v7118_v6, %v7117_v4  ;;  %v7120_v13 = vpop.f32.mrb[6].mxu0 }
 0x473   :  { %v7121_v7 = vpop.f32.mrb[7].mxu0 }
 0x474   :  { %v7122_v0 = vadd.f32 %v7121_v7, %v7120_v13  ;;  %v1188_v14 = vpop.f32.mrb[16].mxu1  ;;  %v1091_v1 = vadd.f32 %v7119_v12, %v6280_v28 }
 0x475   :  { %v1190_v54 = vpop.f32.mrb[17].mxu1 }
 0x476   :  { %v1191_v60 = vpop.f32.mrb[18].mxu1  ;;  %v1094_v4 = vadd.f32 %v7122_v0, %v6280_v28 }
 0x477   :  { %v1193_v18 = vpop.f32.mrb[19].mxu1 }
 0x488   :  { %v7139_v31 = vpop.f32.mrb[8].mxu0 }
 0x489   :  { %v7140_v32 = vpop.f32.mrb[9].mxu0 }
 0x48a   :  { %v7141_v36 = vadd.f32 %v7140_v32, %v7139_v31  ;;  %v7142_v37 = vpop.f32.mrb[10].mxu0 }
 0x48b   :  { %v7143_v38 = vpop.f32.mrb[11].mxu0 }
 0x48c   :  { %v1132_v41 = vadd.f32 %v7141_v36, %v1083_v33  ;;  %v7144_v43 = vadd.f32 %v7143_v38, %v7142_v37 }
 0x48e   :  { %v1181_v44 = vadd.f32 %v8883_v56, %v1132_v41  ;;  %v1135_v45 = vadd.f32 %v7144_v43, %v1086_v39 }
 0x490   :  { %v1184_v46 = vadd.f32 %v8894_v59, %v1135_v45  ;;  %v7145_v58 = vpop.f32.mrb[12].mxu0  ;;  %v1199_v2 = vsel %vm364_vm9, %v1181_v44, 0.0 }
 0x491   :  { %v7146_v63 = vpop.f32.mrb[13].mxu0 }
 0x492   :  { %v1200_v55 = vsel %vm364_vm9, %v1184_v46, 0.0  ;;  %v7147_v40 = vadd.f32 %v7146_v63, %v7145_v58  ;;  %v7148_v3 = vpop.f32.mrb[14].mxu0  ;;  %v6333_v63 = vld [vmem:[%s10583_s6 + $0x1] ss:$0 sm:$0xff] }
 0x493   :  { %v1201_v57 = vadd.f32 %v1200_v55, %v1199_v2  ;;  %v7149_v61 = vpop.f32.mrb[15].mxu0 }
 0x494   :  { %v1140_v51 = vadd.f32 %v7147_v40, %v1091_v1  ;;  %v7150_v5 = vadd.f32 %v7149_v61, %v7148_v3 }
 0x496   :  { %v1189_v6 = vadd.f32 %v1188_v14, %v1140_v51  ;;  %v1143_v13 = vadd.f32 %v7150_v5, %v1094_v4 }
 0x498   :  { %v1202_v56 = vsel %vm364_vm9, %v1189_v6, 0.0  ;;  %v1192_v8 = vadd.f32 %v1191_v60, %v1143_v13 }
 0x499   :  { %v1203_v59 = vadd.f32 %v1202_v56, %v1201_v57  ;;  %v7813_v56 = vld [vmem:[%s10584_s7 + $0x1d8] sm:$0xff]  }
 0x49a   :  { %v1204_v7 = vsel %vm364_vm9, %v1192_v8, 0.0  ;;  %7165 = vmatprep.subr.bf16.mxu0 %v7813_v56 }
 0x49b   :  { %v1205_v12 = vadd.f32 %v1204_v7, %v1203_v59  ;;  %v7815_v59 = vld [vmem:[%s10584_s7 + $0x250] sm:$0xff]  }
 0x49c   :  { %v7816_v7 = vld [vmem:[%s10584_s7 + $0x210] sm:$0xff]   ;;  %7191 = vmatprep.subr.bf16.mxu1 %v7815_v59 }
 0x49d   :  { %v1206_v11 = vrot.slane %v1205_v12, 4  ;;  %7192 = vmatpush3.bf16.msra.mxu1 %v7816_v7 }
 0x49f   :  { %v1207_v10 = vadd.f32 %v1206_v11, %v1205_v12 }
 0x4a1   :  { %v1208_v15 = vrot.slane %v1207_v10, 2 }
 0x4a3   :  { %v1209_v54 = vadd.f32 %v1208_v15, %v1207_v10 }
 0x4a5   :  { %v1210_v16 = vrot.slane %v1209_v54, 1 }
 0x4a7   :  { %v1211_v18 = vadd.f32 %v1210_v16, %v1209_v54 }
 0x4a9   :  { %v1212_v17 = vmul.f32 0.03125, %v1211_v18 }
 0x4ab   :  { %v1213_v19 = vsub.f32 %v1181_v44, %v1212_v17  ;;  %v1214_v0 = vsub.f32 %v1184_v46, %v1212_v17  ;;  %v1215_v21 = vsub.f32 %v1189_v6, %v1212_v17  ;;  %v1216_v22 = vsub.f32 %v1192_v8, %v1212_v17  ;;  %v6331_v44 = vld [vmem:[%s10582_s5 + $0x1] sm:$0x1]  ;;  %v7814_v8 = vld [vmem:[%s10584_s7 + $0x198] sm:$0xff]  }
 0x4ac   :  { %7166 = vmatpush3.bf16.msra.mxu0 %v7814_v8 }
 0x4ad   :  { %v1217_v14 = vmul.f32 %v1213_v19, %v1213_v19  ;;  %v1218_v23 = vmul.f32 %v1214_v0, %v1214_v0  ;;  %v1219_v52 = vmul.f32 %v1215_v21, %v1215_v21  ;;  %v1220_v53 = vmul.f32 %v1216_v22, %v1216_v22  ;;  %1838 = vmatprep.subr.bf16.mxu0 %v8319_v30 }
 0x4af   :  { %v1221_v60 = vsel %vm364_vm9, %v1217_v14, 0.0  ;;  %v1222_v24 = vsel %vm364_vm9, %v1218_v23, 0.0  ;;  %v1224_v26 = vsel %vm364_vm9, %v1219_v52, 0.0  ;;  %v1226_v28 = vsel %vm364_vm9, %v1220_v53, 0.0 }
 0x4b0   :  { %v1223_v25 = vadd.f32 %v1222_v24, %v1221_v60 }
 0x4b2   :  { %v1225_v27 = vadd.f32 %v1224_v26, %v1223_v25 }
 0x4b4   :  { %v1227_v31 = vadd.f32 %v1226_v28, %v1225_v27 }
 0x4b6   :  { %v1228_v32 = vrot.slane %v1227_v31, 4 }
 0x4b8   :  { %v1229_v33 = vadd.f32 %v1228_v32, %v1227_v31 }
 0x4ba   :  { %v1230_v36 = vrot.slane %v1229_v33, 2 }
 0x4bc   :  { %v1231_v37 = vadd.f32 %v1230_v36, %v1229_v33 }
 0x4be   :  { %v1232_v38 = vrot.slane %v1231_v37, 1 }
 0x4c0   :  { %v1233_v39 = vadd.f32 %v1232_v38, %v1231_v37 }
 0x4c2   :  { %v1234_v41 = vmul.f32 0.03125, %v1233_v39 }
 0x4c4   :  { %v1235_v43 = vadd.f32 1e-05, %v1234_v41 }
 0x4c6   :  { %8009 = vrsqrt.f32 %v1235_v43 }
 0x4d0   :  { %v8010_v45 = vpop.eup %8009 }
 0x4d1   :  { %v1237_v46 = vmul.f32 %v8010_v45, %v6331_v44 }
 0x4d3   :  { %v1241_v58 = vrot.slane %v1237_v46, %v8704_v20 }
 0x4d5   :  { %v1243_v1 = vmul.f32 %v1241_v58, %v1214_v0  ;;  %v1244_v2 = vmul.f32 %v1241_v58, %v1215_v21  ;;  %v1245_v55 = vmul.f32 %v1241_v58, %v1216_v22  ;;  %v1242_v40 = vmul.f32 %v1241_v58, %v1213_v19  ;;  %v7817_v19 = vld [vmem:[%s10584_s7 + $0x258] sm:$0xff]  }
 0x4d6   :  { %v7819_v0 = vld [vmem:[%s10584_s7 + $0x218] sm:$0xff]   ;;  %7193 = vmatprep.subr.bf16.mxu1 %v7817_v19  ;;  %v7818_v19 = vld [vmem:[%s10584_s7 + $0x260] sm:$0xff]  }
 0x4d7   :  { %v1253_v3 = vadd.f32 %v6333_v63, %v1243_v1  ;;  %v1254_v57 = vadd.f32 %v6333_v63, %v1244_v2  ;;  %v1255_v61 = vadd.f32 %v6333_v63, %v1245_v55  ;;  %v1252_v4 = vadd.f32 %v6333_v63, %v1242_v40  ;;  %7194 = vmatpush3.bf16.msra.mxu1 %v7819_v0 }
 0x4d9   :  { %v1259_v51 = vmax.f32 %v1255_v61, 0.0  ;;  %v1256_v5 = vmax.f32 %v1252_v4, 0.0  ;;  %v1257_v6 = vmax.f32 %v1253_v3, 0.0  ;;  %v1258_v13 = vmax.f32 %v1254_v57, 0.0 }
 0x4db   :  { %v1360_v12 = vrot.slane %v1259_v51, 6  ;;  %v1355_v11 = vrot.slane %v1256_v5, 6  ;;  %v1356_v10 = vrot.slane %v1257_v6, 6  ;;  %v1358_v15 = vrot.slane %v1258_v13, 6 }
 0x4dd   :  { %v8991_v54 = vsel %vm121_vm2, %v1355_v11, %v1356_v10  ;;  %v1367_v16 = vsel %vm121_vm2, 0.0, %v1355_v11  ;;  %v8995_v18 = vsel %vm121_vm2, %v1356_v10, %v1358_v15  ;;  %v8998_v17 = vsel %vm121_vm2, %v1358_v15, %v1360_v12 }
 0x4de   :  { %v1402_v21 = vrot.slane %v1367_v16, 6  ;;  %v1404_v22 = vrot.slane %v8991_v54, 6  ;;  %v1370_v14 = vrot.slane %v1367_v16, 2  ;;  %v1372_v23 = vrot.slane %v8991_v54, 2 }
 0x4df   :  { %v1406_v52 = vrot.slane %v8995_v18, 6  ;;  %v1408_v53 = vrot.slane %v8998_v17, 6  ;;  %v1374_v60 = vrot.slane %v8995_v18, 2  ;;  %v1376_v24 = vrot.slane %v8998_v17, 2 }
 0x4e0   :  { %v1403_v25 = vsel %vm121_vm2, %v8720_v50, %v1402_v21  ;;  %v1405_v26 = vsel %vm121_vm2, %v1402_v21, %v1404_v22  ;;  %v1371_v27 = vsel %vm78_vm1, %v8717_v49, %v1370_v14  ;;  %v1373_v28 = vsel %vm78_vm1, %v1370_v14, %v1372_v23 }
 0x4e1   :  { %v7606_v31 = vpack.i.bf16 %v1405_v26, %v1403_v25  ;;  %v7611_v32 = vpack.i.bf16 %v1371_v27, %v1373_v28  ;;  %v1407_v33 = vsel %vm121_vm2, %v1404_v22, %v1406_v52  ;;  %v1409_v36 = vsel %vm121_vm2, %v1406_v52, %v1408_v53 }
 0x4e2   :  { %v1375_v37 = vsel %vm78_vm1, %v1372_v23, %v1374_v60  ;;  %v1377_v38 = vsel %vm78_vm1, %v1374_v60, %v1376_v24  ;;  %v9024_v39 = vsel %vm121_vm2, %v1360_v12, 0.0  ;;  %v7616_v44 = vpack.i.bf16 %v1409_v36, %v1407_v33 }
 0x4e3   :  { %7607 = vrot.lane.b32.xlu0 %v7606_v31, %s8320_s3  ;;  %7612 = vrot.lane.b32.xlu1 %v7611_v32, %s8320_s3  ;;  %v1423_v41 = vrot.slane %v9024_v39, 2  ;;  %v1431_v43 = vrot.slane %v9024_v39, 6  ;;  %v7621_v45 = vpack.i.bf16 %v1377_v38, %v1375_v37  ;;  %v1390_v2 = vrot.slane %v1367_v16, 4  ;;  %v7820_v31 = vld [vmem:[%s10584_s7 + $0x268] sm:$0xff]  }
 0x4e4   :  { %v1392_v55 = vrot.slane %v8991_v54, 4  ;;  %v1394_v13 = vrot.slane %v8995_v18, 4  ;;  %v1396_v56 = vrot.slane %v8998_v17, 4  ;;  %v1428_v52 = vrot.slane %v9024_v39, 4 }
 0x4e5   :  { %v1424_v46 = vsel %vm78_vm1, %v1376_v24, %v1423_v41  ;;  %v1432_v58 = vsel %vm121_vm2, %v1408_v53, %v1431_v43  ;;  %v1436_v1 = vsel %vm78_vm1, %v1423_v41, %v8717_v49  ;;  %v1391_v5 = vsel %vm61_vm0, %v8786_v29, %v1390_v2  ;;  %v7821_v41 = vld [vmem:[%s10584_s7 + $0x270] sm:$0xff]  }
 0x4e6   :  { %v7626_v63 = vpack.i.bf16 %v1424_v46, %v1432_v58  ;;  %v1393_v6 = vsel %vm61_vm0, %v1390_v2, %v1392_v55  ;;  %v1395_v23 = vsel %vm61_vm0, %v1392_v55, %v1394_v13  ;;  %v1429_v33 = vsel %vm61_vm0, %v1396_v56, %v1428_v52  ;;  %v7823_v58 = vld [vmem:[%s10584_s7 + $0x280] sm:$0xff]   ;;  %v7828_v55 = vld [vmem:[%s10584_s7 + $0x2a8] sm:$0xff]  }
 0x4e7   :  { %7617 = vrot.lane.b32.xlu0 %v7616_v44, %s8320_s3  ;;  %7622 = vrot.lane.b32.xlu1 %v7621_v45, %s8320_s3  ;;  %v7827_v2 = vld [vmem:[%s10584_s7 + $0x2a0] sm:$0xff]  }
 0x4eb   :  { %7627 = vrot.lane.b32.xlu0 %v7626_v63, %s8320_s3  ;;  %1437 = vrot.lane.b32.xlu1 %v1436_v1, %s8320_s3  ;;  %v7825_v63 = vld [vmem:[%s10584_s7 + $0x290] sm:$0xff]   ;;  %v7826_v1 = vld [vmem:[%s10584_s7 + $0x298] sm:$0xff]  }
 0x555   :  { %v7608_v40 = vpop.permute.xlu0 %7607  ;;  %v7613_v3 = vpop.permute.xlu1 %7612 }
 0x556   :  { %v7610_v57 = vunpack.i.h.bf16 %v7608_v40  ;;  %v7609_v61 = vunpack.i.l.bf16 %v7608_v40  ;;  %v7615_v4 = vunpack.i.h.bf16 %v7613_v3  ;;  %v7614_v51 = vunpack.i.l.bf16 %v7613_v3  ;;  %v7829_v40 = vld [vmem:[%s10584_s7 + $0x2b0] sm:$0xff]   ;;  %v7830_v3 = vld [vmem:[%s10584_s7 + $0x2b8] sm:$0xff]  }
 0x558   :  { %v1443_v8 = vsel %vm364_vm9, %v1367_v16, %v7614_v51  ;;  %v1446_v59 = vsel %vm364_vm9, %v1391_v5, %v7609_v61  ;;  %v1447_v7 = vsel %vm364_vm9, %v1393_v6, %v7610_v57  ;;  %v1397_v16 = vsel %vm61_vm0, %v1394_v13, %v1396_v56 }
 0x559   :  { %v6470_v12 = vpack.c.bf16 %v1443_v8, %v7615_v4  ;;  %v7618_v11 = vpop.permute.xlu0 %7617  ;;  %v7623_v10 = vpop.permute.xlu1 %7622  ;;  %v1454_v15 = vpack.c.bf16 %v1447_v7, %v1446_v59  ;;  %v1458_v45 = vpack.c.bf16 %v1397_v16, %v1395_v23  ;;  %v1440_v57 = vsel %vm61_vm0, %v1428_v52, %v8786_v29  ;;  %v6423_v59 = vld [vmem:[%s10585_s8 + $0x1] ss:$0 sm:$0xff] }
 0x55a   :  { %v7620_v0 = vunpack.i.h.bf16 %v7618_v11  ;;  %v7619_v21 = vunpack.i.l.bf16 %v7618_v11  ;;  %v7624_v22 = vunpack.i.l.bf16 %v7623_v10  ;;  %v7625_v14 = vunpack.i.h.bf16 %v7623_v10 }
 0x55b   :  { %1772 = vmatprep.mubr.bf16.mxu0 %v1454_v15  ;;  %v1463_v61 = vpack.c.bf16 %v1440_v57, %v1429_v33  ;;  %v7842_v57 = vld [vmem:[%s10584_s7 + $0x2d8] sm:$0xff]  }
 0x55c   :  { %v1444_v53 = vsel %vm364_vm9, %v8991_v54, %v7624_v22  ;;  %6471 = vmatmul.mubr.msk.bf16.vlgmr.msra.gmra.mrb[16].mxu0 %vm8800_vm13, %v6470_v12  ;;  %v1448_v60 = vsel %vm364_vm9, %v1395_v23, %v7619_v21  ;;  %v1449_v24 = vsel %vm364_vm9, %v1397_v16, %v7620_v0  ;;  %v1445_v36 = vsel %vm364_vm9, %v8995_v18, %v7625_v14  ;;  %v7822_v18 = vld [vmem:[%s10584_s7 + $0x278] sm:$0xff]  }
 0x55d   :  { %v1455_v25 = vpack.c.bf16 %v1444_v53, %v1443_v8  ;;  %1839 = vmatpush1.bf16.msra.mxu0 %v7818_v19  ;;  %v7628_v26 = vpop.permute.xlu0 %7627  ;;  %v1459_v27 = vpack.c.bf16 %v1449_v24, %v1448_v60  ;;  %v1456_v28 = vpack.c.bf16 %v1448_v60, %v1447_v7  ;;  %v1457_v43 = vpack.c.bf16 %v1445_v36, %v1444_v53  ;;  %v1438_v4 = vpop.permute.xlu1 %1437 }
 0x55e   :  { %v7629_v32 = vunpack.i.l.bf16 %v7628_v26  ;;  %1840 = vmatprep.subr.bf16.mxu0 %v8319_v30  ;;  %v7630_v54 = vunpack.i.h.bf16 %v7628_v26  ;;  %v1452_v51 = vsel %vm364_vm9, %v9024_v39, %v1438_v4  ;;  %v7848_v4 = vld [vmem:[%s10584_s7 + $0x358] sm:$0xff]  }
 0x55f   :  { %1780 = vmatprep.mubr.bf16.mxu0 %v1459_v27  ;;  %1821 = vmatprep.mubr.bf16.mxu1 %v1456_v28 }
 0x560   :  { %1822 = vmatmul.mubr.bf16.vlgmr.msra.gmra.mrb[20].mxu1 %v1455_v25  ;;  %v1451_v37 = vsel %vm364_vm9, %v1429_v33, %v7629_v32  ;;  %v1450_v44 = vsel %vm364_vm9, %v8998_v17, %v7630_v54  ;;  %v7824_v17 = vld [vmem:[%s10584_s7 + $0x288] sm:$0xff]  }
 0x561   :  { %1841 = vmatpush1.bf16.msra.mxu0 %v7820_v31  ;;  %v1461_v38 = vpack.c.bf16 %v1451_v37, %v1449_v24  ;;  %v1460_v46 = vpack.c.bf16 %v1450_v44, %v1445_v36  ;;  %v1462_v5 = vpack.c.bf16 %v1452_v51, %v1450_v44  ;;  %v7835_v44 = vld [vmem:[%s10584_s7 + $0x380] sm:$0xff]  }
 0x562   :  { %1842 = vmatprep.subr.bf16.mxu0 %v8319_v30  ;;  %v7851_v51 = vld [vmem:[%s10584_s7 + $0x3a0] sm:$0xff]  }
 0x563   :  { %1829 = vmatprep.mubr.bf16.mxu1 %v1461_v38  ;;  %v7831_v38 = vld [vmem:[%s10584_s7 + $0x300] sm:$0xff]  }
 0x564   :  { %1781 = vmatmul.mubr.bf16.gmra.mrb[20].mxu0 %v1457_v43  ;;  %7207 = vmatprep.subr.bf16.mxu1 %v7831_v38 }
 0x565   :  { %1843 = vmatpush1.bf16.msra.mxu0 %v7821_v41  ;;  %6472 = vmatprep.mubr.msk.bf16.mxu0 %vm364_vm9, %v1458_v45  ;;  %v7832_v41 = vld [vmem:[%s10584_s7 + $0x2c0] sm:$0xff]  }
 0x566   :  { %1844 = vmatprep.subr.bf16.mxu0 %v8319_v30  ;;  %v7836_v45 = vld [vmem:[%s10584_s7 + $0x340] sm:$0xff]   ;;  %7208 = vmatpush3.bf16.msra.mxu1 %v7832_v41 }
 0x568   :  { %1830 = vmatmul.mubr.bf16.gmra.mrb[24].mxu1 %v1460_v46  ;;  %v7839_v46 = vld [vmem:[%s10584_s7 + $0x388] sm:$0xff]  }
 0x569   :  { %1845 = vmatpush1.bf16.msra.mxu0 %v7822_v18 }
 0x56a   :  { %1846 = vmatprep.subr.bf16.mxu0 %v8319_v30 }
 0x56d   :  { %1847 = vmatpush1.bf16.msra.mxu0 %v7823_v58  ;;  %v7834_v58 = vld [vmem:[%s10584_s7 + $0x2c8] sm:$0xff]  }
 0x56e   :  { %1848 = vmatprep.subr.bf16.mxu0 %v8319_v30 }
 0x571   :  { %1849 = vmatpush1.bf16.msra.mxu0 %v7824_v17  ;;  %v7837_v17 = vld [vmem:[%s10584_s7 + $0x310] sm:$0xff]  }
 0x572   :  { %1850 = vmatprep.subr.bf16.mxu0 %v8319_v30 }
 0x575   :  { %1851 = vmatpush1.bf16.msra.mxu0 %v7825_v63  ;;  %v7840_v63 = vld [vmem:[%s10584_s7 + $0x348] sm:$0xff]  }
 0x576   :  { %1852 = vmatprep.subr.bf16.mxu0 %v8319_v30 }
 0x579   :  { %1853 = vmatpush1.bf16.msra.mxu0 %v7826_v1  ;;  %v7843_v1 = vld [vmem:[%s10584_s7 + $0x390] sm:$0xff]  }
 0x57a   :  { %1854 = vmatprep.subr.bf16.mxu0 %v8319_v30 }
 0x57d   :  { %1855 = vmatpush1.bf16.msra.mxu0 %v7827_v2  ;;  %v7838_v2 = vld [vmem:[%s10584_s7 + $0x2d0] sm:$0xff]  }
 0x57e   :  { %1856 = vmatprep.subr.bf16.mxu0 %v8319_v30 }
 0x581   :  { %1857 = vmatpush1.bf16.msra.mxu0 %v7828_v55  ;;  %v7841_v55 = vld [vmem:[%s10584_s7 + $0x318] sm:$0xff]  }
 0x582   :  { %1858 = vmatprep.subr.bf16.mxu0 %v8319_v30 }
 0x585   :  { %1859 = vmatpush1.bf16.msra.mxu0 %v7829_v40  ;;  %v7844_v40 = vld [vmem:[%s10584_s7 + $0x350] sm:$0xff]  }
 0x586   :  { %1860 = vmatprep.subr.bf16.mxu0 %v8319_v30 }
 0x589   :  { %1861 = vmatpush1.bf16.msra.mxu0 %v7830_v3  ;;  %v7847_v3 = vld [vmem:[%s10584_s7 + $0x398] sm:$0xff]  }
 0x58a   :  { %7235 = vmatprep.subr.bf16.mxu0 %v7835_v44 }
 0x58c   :  { %1871 = vmatmul.mubr.bf16.vlgmr.msra.gmra.mrb[24].mxu0 %v1457_v43  ;;  %v7833_v43 = vld [vmem:[%s10584_s7 + $0x308] sm:$0xff]  }
 0x58d   :  { %6473 = vmatprep.mubr.msk.bf16.mxu0 %vm364_vm9, %v1463_v61  ;;  %7209 = vmatprep.subr.bf16.mxu1 %v7833_v43  ;;  %v7845_v61 = vld [vmem:[%s10584_s7 + $0x320] sm:$0xff]  }
 0x58e   :  { %7236 = vmatpush3.bf16.msra.mxu0 %v7836_v45  ;;  %7210 = vmatpush3.bf16.msra.mxu1 %v7834_v58 }
 0x58f   :  { %7237 = vmatprep.subr.bf16.mxu0 %v7839_v46  ;;  %7211 = vmatprep.subr.bf16.mxu1 %v7837_v17 }
 0x592   :  { %7238 = vmatpush3.bf16.msra.mxu0 %v7840_v63  ;;  %7212 = vmatpush3.bf16.msra.mxu1 %v7838_v2 }
 0x593   :  { %7239 = vmatprep.subr.bf16.mxu0 %v7843_v1  ;;  %7213 = vmatprep.subr.bf16.mxu1 %v7841_v55 }
 0x594   :  { %1879 = vmatmul.mubr.bf16.gmra.mrb[28].mxu0 %v1462_v5  ;;  %v7846_v5 = vld [vmem:[%s10584_s7 + $0x2e0] sm:$0xff]  }
 0x596   :  { %7240 = vmatpush3.bf16.msra.mxu0 %v7844_v40  ;;  %7214 = vmatpush3.bf16.msra.mxu1 %v7842_v57 }
 0x597   :  { %7241 = vmatprep.subr.bf16.mxu0 %v7847_v3  ;;  %7215 = vmatprep.subr.bf16.mxu1 %v7845_v61 }
 0x59a   :  { %7242 = vmatpush3.bf16.msra.mxu0 %v7848_v4  ;;  %7216 = vmatpush3.bf16.msra.mxu1 %v7846_v5 }
 0x59b   :  { %7243 = vmatprep.subr.bf16.mxu0 %v7851_v51 }
 0x62f   :  { %v7167_v6 = vpop.f32.mrb[16].mxu0 }
 0x630   :  { %v7168_v13 = vpop.f32.mrb[17].mxu0 }
 0x631   :  { %v7169_v56 = vadd.f32 %v7168_v13, %v7167_v6  ;;  %v7170_v8 = vpop.f32.mrb[18].mxu0  ;;  %v7849_v6 = vld [vmem:[%s10584_s7 + $0x328] sm:$0xff]   ;;  %v7852_v13 = vld [vmem:[%s10584_s7 + $0x360] sm:$0xff]  }
 0x632   :  { %v7171_v7 = vpop.f32.mrb[19].mxu0  ;;  %7217 = vmatprep.subr.bf16.mxu1 %v7849_v6  ;;  %7244 = vmatpush3.bf16.msra.mxu0 %v7852_v13 }
 0x633   :  { %v7172_v12 = vadd.f32 %v7171_v7, %v7170_v8  ;;  %v7195_v11 = vpop.f32.mrb[20].mxu1  ;;  %v1775_v15 = vadd.f32 %v7169_v56, %v6423_v59  ;;  %v7855_v56 = vld [vmem:[%s10584_s7 + $0x3a8] sm:$0xff]  }
 0x634   :  { %v7196_v10 = vpop.f32.mrb[21].mxu1  ;;  %v7850_v8 = vld [vmem:[%s10584_s7 + $0x2e8] sm:$0xff]   ;;  %7245 = vmatprep.subr.bf16.mxu0 %v7855_v56 }
 0x635   :  { %v7197_v19 = vadd.f32 %v7196_v10, %v7195_v11  ;;  %v7198_v0 = vpop.f32.mrb[22].mxu1  ;;  %v1778_v22 = vadd.f32 %v7172_v12, %v6423_v59  ;;  %v7856_v7 = vld [vmem:[%s10584_s7 + $0x368] sm:$0xff]   ;;  %7218 = vmatpush3.bf16.msra.mxu1 %v7850_v8  ;;  %v7854_v12 = vld [vmem:[%s10584_s7 + $0x2f0] sm:$0xff]  }
 0x636   :  { %v7199_v21 = vpop.f32.mrb[23].mxu1  ;;  %7246 = vmatpush3.bf16.msra.mxu0 %v7856_v7 }
 0x637   :  { %v7200_v39 = vadd.f32 %v7199_v21, %v7198_v0  ;;  %v7173_v14 = vpop.f32.mrb[20].mxu0  ;;  %v9118_v23 = vadd.f32 %v7197_v19, %v1775_v15 }
 0x638   :  { %v7174_v16 = vpop.f32.mrb[21].mxu0 }
 0x639   :  { %v7175_v52 = vadd.f32 %v7174_v16, %v7173_v14  ;;  %v7176_v53 = vpop.f32.mrb[22].mxu0  ;;  %v9120_v60 = vadd.f32 %v7200_v39, %v1778_v22 }
 0x63a   :  { %v7177_v24 = vpop.f32.mrb[23].mxu0 }
 0x63b   :  { %v7178_v25 = vadd.f32 %v7177_v24, %v7176_v53  ;;  %v7201_v26 = vpop.f32.mrb[24].mxu1  ;;  %v1783_v28 = vadd.f32 %v7175_v52, %v6423_v59 }
 0x63c   :  { %v7202_v27 = vpop.f32.mrb[25].mxu1 }
 0x63d   :  { %v7203_v31 = vadd.f32 %v7202_v27, %v7201_v26  ;;  %v7204_v32 = vpop.f32.mrb[26].mxu1  ;;  %v1786_v33 = vadd.f32 %v7178_v25, %v6423_v59  ;;  %v7853_v59 = vld [vmem:[%s10584_s7 + $0x330] sm:$0xff]  }
 0x63e   :  { %v7205_v54 = vpop.f32.mrb[27].mxu1  ;;  %7219 = vmatprep.subr.bf16.mxu1 %v7853_v59  ;;  %v6474_v59 = vld [vmem:[%s10582_s5 + $0x2] sm:$0x1] }
 0x63f   :  { %v7206_v36 = vadd.f32 %v7205_v54, %v7204_v32  ;;  %v9122_v37 = vadd.f32 %v7203_v31, %v1783_v28  ;;  %7220 = vmatpush3.bf16.msra.mxu1 %v7854_v12 }
 0x641   :  { %v9139_v18 = vadd.f32 %v7206_v36, %v1786_v33 }
 0x65f   :  { %v1872_v11 = vpop.f32.mrb[24].mxu0 }
 0x660   :  { %v1873_v10 = vadd.f32 %v1872_v11, %v9118_v23  ;;  %v1874_v15 = vpop.f32.mrb[25].mxu0 }
 0x661   :  { %v1875_v19 = vpop.f32.mrb[26].mxu0 }
 0x662   :  { %v1876_v0 = vadd.f32 %v1875_v19, %v9120_v60  ;;  %v1877_v21 = vpop.f32.mrb[27].mxu0  ;;  %v9210_v39 = vadd.f32 %v1873_v10, %v8675_v35  ;;  %v6476_v10 = vld [vmem:[%s10583_s6 + $0x2] ss:$0 sm:$0xff] }
 0x664   :  { %v9207_v22 = vadd.f32 %v1876_v0, %v8672_v34  ;;  %v1895_v23 = vsel %vm364_vm9, %v9210_v39, 0.0 }
 0x666   :  { %v1896_v16 = vsel %vm364_vm9, %v9207_v22, 0.0 }
 0x667   :  { %v1880_v14 = vpop.f32.mrb[28].mxu0  ;;  %v1897_v26 = vadd.f32 %v1896_v16, %v1895_v23 }
 0x668   :  { %v1881_v52 = vadd.f32 %v1880_v14, %v9122_v37  ;;  %v1882_v53 = vpop.f32.mrb[29].mxu0 }
 0x669   :  { %v1883_v24 = vpop.f32.mrb[30].mxu0 }
 0x66a   :  { %v9218_v60 = vadd.f32 %v1881_v52, %v8682_v42  ;;  %v1884_v34 = vadd.f32 %v1883_v24, %v9139_v18  ;;  %v1885_v25 = vpop.f32.mrb[31].mxu0 }
 0x66c   :  { %v1898_v35 = vsel %vm364_vm9, %v9218_v60, 0.0  ;;  %v9224_v27 = vadd.f32 %v1884_v34, %v8686_v47 }
 0x66d   :  { %v1899_v28 = vadd.f32 %v1898_v35, %v1897_v26  ;;  %v7857_v26 = vld [vmem:[%s10584_s7 + $0x338] sm:$0xff]  }
 0x66e   :  { %v1900_v31 = vsel %vm364_vm9, %v9224_v27, 0.0  ;;  %v7858_v35 = vld [vmem:[%s10584_s7 + $0x2f8] sm:$0xff]   ;;  %7221 = vmatprep.subr.bf16.mxu1 %v7857_v26 }
 0x66f   :  { %v1901_v32 = vadd.f32 %v1900_v31, %v1899_v28  ;;  %v7859_v28 = vld [vmem:[%s10584_s7 + $0x3b0] sm:$0xff]   ;;  %7222 = vmatpush3.bf16.msra.mxu1 %v7858_v35 }
 0x670   :  { %v7860_v31 = vld [vmem:[%s10584_s7 + $0x370] sm:$0xff]   ;;  %7247 = vmatprep.subr.bf16.mxu0 %v7859_v28  ;;  %2534 = vmatprep.subr.bf16.mxu1 %v8319_v30 }
 0x671   :  { %v1902_v54 = vrot.slane %v1901_v32, 4  ;;  %7248 = vmatpush3.bf16.msra.mxu0 %v7860_v31 }
 0x673   :  { %v1903_v33 = vadd.f32 %v1902_v54, %v1901_v32 }
 0x675   :  { %v1904_v36 = vrot.slane %v1903_v33, 2 }
 0x677   :  { %v1905_v42 = vadd.f32 %v1904_v36, %v1903_v33 }
 0x679   :  { %v1906_v37 = vrot.slane %v1905_v42, 1 }
 0x67b   :  { %v1907_v38 = vadd.f32 %v1906_v37, %v1905_v42 }
 0x67d   :  { %v1908_v41 = vmul.f32 0.03125, %v1907_v38 }
 0x67f   :  { %v1909_v43 = vsub.f32 %v9210_v39, %v1908_v41  ;;  %v1910_v44 = vsub.f32 %v9207_v22, %v1908_v41  ;;  %v1911_v45 = vsub.f32 %v9218_v60, %v1908_v41  ;;  %v1912_v47 = vsub.f32 %v9224_v27, %v1908_v41 }
 0x681   :  { %v1913_v18 = vmul.f32 %v1909_v43, %v1909_v43  ;;  %v1914_v46 = vmul.f32 %v1910_v44, %v1910_v44  ;;  %v1915_v58 = vmul.f32 %v1911_v45, %v1911_v45  ;;  %v1916_v17 = vmul.f32 %v1912_v47, %v1912_v47 }
 0x683   :  { %v1917_v63 = vsel %vm364_vm9, %v1913_v18, 0.0  ;;  %v1918_v1 = vsel %vm364_vm9, %v1914_v46, 0.0  ;;  %v1920_v55 = vsel %vm364_vm9, %v1915_v58, 0.0  ;;  %v1922_v3 = vsel %vm364_vm9, %v1916_v17, 0.0 }
 0x684   :  { %v1919_v2 = vadd.f32 %v1918_v1, %v1917_v63 }
 0x686   :  { %v1921_v40 = vadd.f32 %v1920_v55, %v1919_v2 }
 0x688   :  { %v1923_v57 = vadd.f32 %v1922_v3, %v1921_v40 }
 0x68a   :  { %v1924_v61 = vrot.slane %v1923_v57, 4 }
 0x68c   :  { %v1925_v4 = vadd.f32 %v1924_v61, %v1923_v57 }
 0x68e   :  { %v1926_v51 = vrot.slane %v1925_v4, 2 }
 0x690   :  { %v1927_v5 = vadd.f32 %v1926_v51, %v1925_v4 }
 0x692   :  { %v1928_v6 = vrot.slane %v1927_v5, 1 }
 0x694   :  { %v1929_v13 = vadd.f32 %v1928_v6, %v1927_v5 }
 0x696   :  { %v1930_v56 = vmul.f32 0.03125, %v1929_v13 }
 0x698   :  { %v1931_v8 = vadd.f32 1e-05, %v1930_v56 }
 0x69a   :  { %8011 = vrsqrt.f32 %v1931_v8 }
 0x6a4   :  { %v8012_v7 = vpop.eup %8011 }
 0x6a5   :  { %v1933_v12 = vmul.f32 %v8012_v7, %v6474_v59 }
 0x6a7   :  { %v1937_v11 = vrot.slane %v1933_v12, %v8704_v20 }
 0x6a9   :  { %v1941_v15 = vmul.f32 %v1937_v11, %v1912_v47  ;;  %v1938_v19 = vmul.f32 %v1937_v11, %v1909_v43  ;;  %v1939_v0 = vmul.f32 %v1937_v11, %v1910_v44  ;;  %v1940_v21 = vmul.f32 %v1937_v11, %v1911_v45  ;;  %v7861_v43 = vld [vmem:[%s10584_s7 + $0x3b8] sm:$0xff]  }
 0x6aa   :  { %v7863_v44 = vld [vmem:[%s10584_s7 + $0x378] sm:$0xff]   ;;  %7249 = vmatprep.subr.bf16.mxu0 %v7861_v43  ;;  %v7862_v43 = vld [vmem:[%s10584_s7 + $0x3c0] sm:$0xff]  }
 0x6ab   :  { %v1951_v14 = vadd.f32 %v6476_v10, %v1941_v15  ;;  %v1948_v16 = vadd.f32 %v6476_v10, %v1938_v19  ;;  %v1949_v52 = vadd.f32 %v6476_v10, %v1939_v0  ;;  %v1950_v53 = vadd.f32 %v6476_v10, %v1940_v21  ;;  %7250 = vmatpush3.bf16.msra.mxu0 %v7863_v44 }
 0x6ad   :  { %v1955_v24 = vmax.f32 %v1951_v14, 0.0  ;;  %v1952_v23 = vmax.f32 %v1948_v16, 0.0  ;;  %v1953_v34 = vmax.f32 %v1949_v52, 0.0  ;;  %v1954_v25 = vmax.f32 %v1950_v53, 0.0 }
 0x6af   :  { %v2056_v32 = vrot.slane %v1955_v24, 6  ;;  %v2051_v54 = vrot.slane %v1952_v23, 6  ;;  %v2052_v33 = vrot.slane %v1953_v34, 6  ;;  %v2054_v36 = vrot.slane %v1954_v25, 6 }
 0x6b1   :  { %v9256_v42 = vsel %vm121_vm2, %v2051_v54, %v2052_v33  ;;  %v2063_v37 = vsel %vm121_vm2, 0.0, %v2051_v54  ;;  %v9260_v38 = vsel %vm121_vm2, %v2052_v33, %v2054_v36  ;;  %v9263_v41 = vsel %vm121_vm2, %v2054_v36, %v2056_v32 }
 0x6b2   :  { %v2098_v45 = vrot.slane %v2063_v37, 6  ;;  %v2100_v47 = vrot.slane %v9256_v42, 6  ;;  %v2066_v18 = vrot.slane %v2063_v37, 2  ;;  %v2068_v46 = vrot.slane %v9256_v42, 2 }
 0x6b3   :  { %v2102_v58 = vrot.slane %v9260_v38, 6  ;;  %v2104_v17 = vrot.slane %v9263_v41, 6  ;;  %v2070_v63 = vrot.slane %v9260_v38, 2  ;;  %v2072_v1 = vrot.slane %v9263_v41, 2 }
 0x6b4   :  { %v2099_v2 = vsel %vm121_vm2, %v8720_v50, %v2098_v45  ;;  %v2101_v55 = vsel %vm121_vm2, %v2098_v45, %v2100_v47  ;;  %v2067_v40 = vsel %vm78_vm1, %v8717_v49, %v2066_v18  ;;  %v2069_v3 = vsel %vm78_vm1, %v2066_v18, %v2068_v46 }
 0x6b5   :  { %v7631_v57 = vpack.i.bf16 %v2101_v55, %v2099_v2  ;;  %v7636_v61 = vpack.i.bf16 %v2067_v40, %v2069_v3  ;;  %v2103_v4 = vsel %vm121_vm2, %v2100_v47, %v2102_v58  ;;  %v2105_v51 = vsel %vm121_vm2, %v2102_v58, %v2104_v17 }
 0x6b6   :  { %v2071_v5 = vsel %vm78_vm1, %v2068_v46, %v2070_v63  ;;  %v2073_v6 = vsel %vm78_vm1, %v2070_v63, %v2072_v1  ;;  %v9289_v13 = vsel %vm121_vm2, %v2056_v32, 0.0  ;;  %v7641_v59 = vpack.i.bf16 %v2105_v51, %v2103_v4 }
 0x6b7   :  { %7632 = vrot.lane.b32.xlu0 %v7631_v57, %s8320_s3  ;;  %7637 = vrot.lane.b32.xlu1 %v7636_v61, %s8320_s3  ;;  %v2119_v56 = vrot.slane %v9289_v13, 2  ;;  %v2127_v8 = vrot.slane %v9289_v13, 6  ;;  %v7646_v7 = vpack.i.bf16 %v2073_v6, %v2071_v5  ;;  %v2086_v19 = vrot.slane %v2063_v37, 4  ;;  %v7864_v57 = vld [vmem:[%s10584_s7 + $0x3c8] sm:$0xff]  }
 0x6b8   :  { %v2088_v0 = vrot.slane %v9256_v42, 4  ;;  %v2090_v25 = vrot.slane %v9260_v38, 4  ;;  %v2092_v26 = vrot.slane %v9263_v41, 4  ;;  %v2124_v58 = vrot.slane %v9289_v13, 4 }
 0x6b9   :  { %v2120_v12 = vsel %vm78_vm1, %v2072_v1, %v2119_v56  ;;  %v2128_v11 = vsel %vm121_vm2, %v2104_v17, %v2127_v8  ;;  %v2132_v15 = vsel %vm78_vm1, %v2119_v56, %v8717_v49  ;;  %v2087_v23 = vsel %vm61_vm0, %v8786_v29, %v2086_v19  ;;  %v7865_v56 = vld [vmem:[%s10584_s7 + $0x3d0] sm:$0xff]  }
 0x6ba   :  { %v7651_v10 = vpack.i.bf16 %v2120_v12, %v2128_v11  ;;  %v2089_v34 = vsel %vm61_vm0, %v2086_v19, %v2088_v0  ;;  %v2091_v46 = vsel %vm61_vm0, %v2088_v0, %v2090_v25  ;;  %v2125_v4 = vsel %vm61_vm0, %v2092_v26, %v2124_v58  ;;  %v7867_v11 = vld [vmem:[%s10584_s7 + $0x3e0] sm:$0xff]   ;;  %v7872_v0 = vld [vmem:[%s10584_s7 + $0x408] sm:$0xff]  }
 0x6bb   :  { %7642 = vrot.lane.b32.xlu0 %v7641_v59, %s8320_s3  ;;  %7647 = vrot.lane.b32.xlu1 %v7646_v7, %s8320_s3  ;;  %v7871_v19 = vld [vmem:[%s10584_s7 + $0x400] sm:$0xff]  }
 0x6bf   :  { %7652 = vrot.lane.b32.xlu0 %v7651_v10, %s8320_s3  ;;  %2133 = vrot.lane.b32.xlu1 %v2132_v15, %s8320_s3  ;;  %v7869_v10 = vld [vmem:[%s10584_s7 + $0x3f0] sm:$0xff]   ;;  %v7870_v15 = vld [vmem:[%s10584_s7 + $0x3f8] sm:$0xff]  }
 0x729   :  { %v7633_v21 = vpop.permute.xlu0 %7632  ;;  %v7638_v14 = vpop.permute.xlu1 %7637 }
 0x72a   :  { %v7635_v16 = vunpack.i.h.bf16 %v7633_v21  ;;  %v7634_v52 = vunpack.i.l.bf16 %v7633_v21  ;;  %v7640_v53 = vunpack.i.h.bf16 %v7638_v14  ;;  %v7639_v24 = vunpack.i.l.bf16 %v7638_v14  ;;  %v7873_v21 = vld [vmem:[%s10584_s7 + $0x410] sm:$0xff]   ;;  %v7874_v14 = vld [vmem:[%s10584_s7 + $0x418] sm:$0xff]  }
 0x72c   :  { %v2139_v35 = vsel %vm364_vm9, %v2063_v37, %v7639_v24  ;;  %v2142_v28 = vsel %vm364_vm9, %v2087_v23, %v7634_v52  ;;  %v2143_v31 = vsel %vm364_vm9, %v2089_v34, %v7635_v16  ;;  %v2093_v37 = vsel %vm61_vm0, %v2090_v25, %v2092_v26 }
 0x72d   :  { %v6613_v32 = vpack.c.bf16 %v2139_v35, %v7640_v53  ;;  %v7643_v54 = vpop.permute.xlu0 %7642  ;;  %v7648_v33 = vpop.permute.xlu1 %7647  ;;  %v2150_v36 = vpack.c.bf16 %v2143_v31, %v2142_v28  ;;  %v2154_v7 = vpack.c.bf16 %v2093_v37, %v2091_v46  ;;  %v2136_v16 = vsel %vm61_vm0, %v2124_v58, %v8786_v29  ;;  %v6566_v28 = vld [vmem:[%s10585_s8 + $0x2] ss:$0 sm:$0xff] }
 0x72e   :  { %v7645_v44 = vunpack.i.h.bf16 %v7643_v54  ;;  %v7644_v45 = vunpack.i.l.bf16 %v7643_v54  ;;  %v7649_v47 = vunpack.i.l.bf16 %v7648_v33  ;;  %v7650_v18 = vunpack.i.h.bf16 %v7648_v33 }
 0x72f   :  { %2468 = vmatprep.mubr.bf16.mxu1 %v2150_v36  ;;  %v2159_v52 = vpack.c.bf16 %v2136_v16, %v2125_v4  ;;  %v7886_v16 = vld [vmem:[%s10584_s7 + $0x438] sm:$0xff]  }
 0x730   :  { %v2140_v17 = vsel %vm364_vm9, %v9256_v42, %v7649_v47  ;;  %6614 = vmatmul.mubr.msk.bf16.vlgmr.msra.gmra.mrb[28].mxu1 %vm8800_vm13, %v6613_v32  ;;  %v2144_v63 = vsel %vm364_vm9, %v2091_v46, %v7644_v45  ;;  %v2145_v1 = vsel %vm364_vm9, %v2093_v37, %v7645_v44  ;;  %v2141_v51 = vsel %vm364_vm9, %v9260_v38, %v7650_v18  ;;  %v7866_v38 = vld [vmem:[%s10584_s7 + $0x3d8] sm:$0xff]  }
 0x731   :  { %v2151_v2 = vpack.c.bf16 %v2140_v17, %v2139_v35  ;;  %2535 = vmatpush1.bf16.msra.mxu1 %v7862_v43  ;;  %v7653_v55 = vpop.permute.xlu0 %7652  ;;  %v2155_v40 = vpack.c.bf16 %v2145_v1, %v2144_v63  ;;  %v2152_v3 = vpack.c.bf16 %v2144_v63, %v2143_v31  ;;  %v2153_v8 = vpack.c.bf16 %v2141_v51, %v2140_v17  ;;  %v2134_v53 = vpop.permute.xlu1 %2133 }
 0x732   :  { %v7654_v61 = vunpack.i.l.bf16 %v7653_v55  ;;  %2536 = vmatprep.subr.bf16.mxu1 %v8319_v30  ;;  %v7655_v42 = vunpack.i.h.bf16 %v7653_v55  ;;  %v2148_v24 = vsel %vm364_vm9, %v9289_v13, %v2134_v53  ;;  %v7892_v53 = vld [vmem:[%s10584_s7 + $0x4b8] sm:$0xff]  }
 0x733   :  { %2476 = vmatprep.mubr.bf16.mxu1 %v2155_v40  ;;  %2517 = vmatprep.mubr.bf16.mxu0 %v2152_v3 }
 0x734   :  { %2518 = vmatmul.mubr.bf16.vlgmr.msra.gmra.mrb[32].mxu0 %v2151_v2  ;;  %v2147_v5 = vsel %vm364_vm9, %v2125_v4, %v7654_v61  ;;  %v2146_v59 = vsel %vm364_vm9, %v9263_v41, %v7655_v42  ;;  %v7868_v41 = vld [vmem:[%s10584_s7 + $0x3e8] sm:$0xff]   ;;  %v7875_v42 = vld [vmem:[%s10584_s7 + $0x460] sm:$0xff]  }
 0x735   :  { %2537 = vmatpush1.bf16.msra.mxu1 %v7864_v57  ;;  %v2157_v6 = vpack.c.bf16 %v2147_v5, %v2145_v1  ;;  %v2156_v12 = vpack.c.bf16 %v2146_v59, %v2141_v51  ;;  %v2158_v23 = vpack.c.bf16 %v2148_v24, %v2146_v59  ;;  %v7876_v4 = vld [vmem:[%s10584_s7 + $0x420] sm:$0xff]   ;;  %v7877_v51 = vld [vmem:[%s10584_s7 + $0x468] sm:$0xff]   ;;  %7263 = vmatprep.subr.bf16.mxu0 %v7875_v42 }
 0x736   :  { %2538 = vmatprep.subr.bf16.mxu1 %v8319_v30  ;;  %7264 = vmatpush3.bf16.msra.mxu0 %v7876_v4  ;;  %v7895_v24 = vld [vmem:[%s10584_s7 + $0x500] sm:$0xff]  }
 0x737   :  { %2525 = vmatprep.mubr.bf16.mxu0 %v2157_v6  ;;  %v7879_v6 = vld [vmem:[%s10584_s7 + $0x4e0] sm:$0xff]   ;;  %7265 = vmatprep.subr.bf16.mxu0 %v7877_v51 }
 0x738   :  { %2477 = vmatmul.mubr.bf16.gmra.mrb[32].mxu1 %v2153_v8 }
 0x739   :  { %2539 = vmatpush1.bf16.msra.mxu1 %v7865_v56  ;;  %6615 = vmatprep.mubr.msk.bf16.mxu1 %vm364_vm9, %v2154_v7  ;;  %v7880_v56 = vld [vmem:[%s10584_s7 + $0x4a0] sm:$0xff]  }
 0x73a   :  { %2540 = vmatprep.subr.bf16.mxu1 %v8319_v30 }
 0x73c   :  { %2526 = vmatmul.mubr.bf16.gmra.mrb[36].mxu0 %v2156_v12  ;;  %v7878_v12 = vld [vmem:[%s10584_s7 + $0x428] sm:$0xff]  }
 0x73d   :  { %2541 = vmatpush1.bf16.msra.mxu1 %v7866_v38  ;;  %v7883_v38 = vld [vmem:[%s10584_s7 + $0x4e8] sm:$0xff]   ;;  %7266 = vmatpush3.bf16.msra.mxu0 %v7878_v12 }
 0x73e   :  { %2542 = vmatprep.subr.bf16.mxu1 %v8319_v30 }
 0x741   :  { %2543 = vmatpush1.bf16.msra.mxu1 %v7867_v11 }
 0x742   :  { %2544 = vmatprep.subr.bf16.mxu1 %v8319_v30 }
 0x745   :  { %2545 = vmatpush1.bf16.msra.mxu1 %v7868_v41  ;;  %v7881_v41 = vld [vmem:[%s10584_s7 + $0x470] sm:$0xff]  }
 0x746   :  { %2546 = vmatprep.subr.bf16.mxu1 %v8319_v30  ;;  %7267 = vmatprep.subr.bf16.mxu0 %v7881_v41 }
 0x749   :  { %2547 = vmatpush1.bf16.msra.mxu1 %v7869_v10  ;;  %v7884_v10 = vld [vmem:[%s10584_s7 + $0x4a8] sm:$0xff]  }
 0x74a   :  { %2548 = vmatprep.subr.bf16.mxu1 %v8319_v30 }
 0x74d   :  { %2549 = vmatpush1.bf16.msra.mxu1 %v7870_v15  ;;  %v7887_v15 = vld [vmem:[%s10584_s7 + $0x4f0] sm:$0xff]  }
 0x74e   :  { %2550 = vmatprep.subr.bf16.mxu1 %v8319_v30 }
 0x751   :  { %2551 = vmatpush1.bf16.msra.mxu1 %v7871_v19  ;;  %v7882_v19 = vld [vmem:[%s10584_s7 + $0x430] sm:$0xff]  }
 0x752   :  { %2552 = vmatprep.subr.bf16.mxu1 %v8319_v30  ;;  %7268 = vmatpush3.bf16.msra.mxu0 %v7882_v19 }
 0x755   :  { %2553 = vmatpush1.bf16.msra.mxu1 %v7872_v0  ;;  %v7885_v0 = vld [vmem:[%s10584_s7 + $0x478] sm:$0xff]  }
 0x756   :  { %2554 = vmatprep.subr.bf16.mxu1 %v8319_v30  ;;  %7269 = vmatprep.subr.bf16.mxu0 %v7885_v0 }
 0x757   :  { %7270 = vmatpush3.bf16.msra.mxu0 %v7886_v16 }
 0x759   :  { %2555 = vmatpush1.bf16.msra.mxu1 %v7873_v21  ;;  %v7888_v21 = vld [vmem:[%s10584_s7 + $0x4b0] sm:$0xff]  }
 0x75a   :  { %2556 = vmatprep.subr.bf16.mxu1 %v8319_v30 }
 0x75d   :  { %2557 = vmatpush1.bf16.msra.mxu1 %v7874_v14  ;;  %v7891_v14 = vld [vmem:[%s10584_s7 + $0x4f8] sm:$0xff]  }
 0x75e   :  { %7291 = vmatprep.subr.bf16.mxu1 %v7879_v6 }
 0x760   :  { %2567 = vmatmul.mubr.bf16.vlgmr.msra.gmra.mrb[36].mxu1 %v2153_v8 }
 0x761   :  { %6616 = vmatprep.mubr.msk.bf16.mxu1 %vm364_vm9, %v2159_v52  ;;  %7292 = vmatpush3.bf16.msra.mxu1 %v7880_v56  ;;  %v7889_v52 = vld [vmem:[%s10584_s7 + $0x480] sm:$0xff]  }
 0x762   :  { %7293 = vmatprep.subr.bf16.mxu1 %v7883_v38  ;;  %7271 = vmatprep.subr.bf16.mxu0 %v7889_v52 }
 0x765   :  { %7294 = vmatpush3.bf16.msra.mxu1 %v7884_v10 }
 0x766   :  { %7295 = vmatprep.subr.bf16.mxu1 %v7887_v15 }
 0x768   :  { %2575 = vmatmul.mubr.bf16.gmra.mrb[40].mxu1 %v2158_v23  ;;  %v7890_v23 = vld [vmem:[%s10584_s7 + $0x440] sm:$0xff]  }
 0x769   :  { %7296 = vmatpush3.bf16.msra.mxu1 %v7888_v21  ;;  %7272 = vmatpush3.bf16.msra.mxu0 %v7890_v23 }
 0x76a   :  { %7297 = vmatprep.subr.bf16.mxu1 %v7891_v14 }
 0x76d   :  { %7298 = vmatpush3.bf16.msra.mxu1 %v7892_v53 }
 0x76e   :  { %7299 = vmatprep.subr.bf16.mxu1 %v7895_v24 }
 0x803   :  { %v7223_v34 = vpop.f32.mrb[28].mxu1 }
 0x804   :  { %v7224_v25 = vpop.f32.mrb[29].mxu1 }
 0x805   :  { %v7225_v26 = vadd.f32 %v7224_v25, %v7223_v34  ;;  %v7226_v35 = vpop.f32.mrb[30].mxu1  ;;  %v7893_v34 = vld [vmem:[%s10584_s7 + $0x488] sm:$0xff]   ;;  %v7896_v25 = vld [vmem:[%s10584_s7 + $0x4c0] sm:$0xff]  }
 0x806   :  { %v7227_v31 = vpop.f32.mrb[31].mxu1  ;;  %7273 = vmatprep.subr.bf16.mxu0 %v7893_v34  ;;  %7300 = vmatpush3.bf16.msra.mxu1 %v7896_v25 }
 0x807   :  { %v7228_v32 = vadd.f32 %v7227_v31, %v7226_v35  ;;  %v7251_v54 = vpop.f32.mrb[32].mxu0  ;;  %v2471_v36 = vadd.f32 %v7225_v26, %v6566_v28  ;;  %v7899_v26 = vld [vmem:[%s10584_s7 + $0x508] sm:$0xff]  }
 0x808   :  { %v7252_v33 = vpop.f32.mrb[33].mxu0  ;;  %v7894_v35 = vld [vmem:[%s10584_s7 + $0x448] sm:$0xff]   ;;  %7301 = vmatprep.subr.bf16.mxu1 %v7899_v26 }
 0x809   :  { %v7253_v43 = vadd.f32 %v7252_v33, %v7251_v54  ;;  %v7254_v44 = vpop.f32.mrb[34].mxu0  ;;  %v2474_v47 = vadd.f32 %v7228_v32, %v6566_v28  ;;  %v7900_v31 = vld [vmem:[%s10584_s7 + $0x4c8] sm:$0xff]   ;;  %7274 = vmatpush3.bf16.msra.mxu0 %v7894_v35  ;;  %v7898_v32 = vld [vmem:[%s10584_s7 + $0x450] sm:$0xff]  }
 0x80a   :  { %v7255_v45 = vpop.f32.mrb[35].mxu0  ;;  %7302 = vmatpush3.bf16.msra.mxu1 %v7900_v31 }
 0x80b   :  { %v7256_v13 = vadd.f32 %v7255_v45, %v7254_v44  ;;  %v7229_v18 = vpop.f32.mrb[32].mxu1  ;;  %v9383_v46 = vadd.f32 %v7253_v43, %v2471_v36 }
 0x80c   :  { %v7230_v37 = vpop.f32.mrb[33].mxu1 }
 0x80d   :  { %v7231_v58 = vadd.f32 %v7230_v37, %v7229_v18  ;;  %v7232_v17 = vpop.f32.mrb[34].mxu1  ;;  %v9385_v63 = vadd.f32 %v7256_v13, %v2474_v47 }
 0x80e   :  { %v7233_v1 = vpop.f32.mrb[35].mxu1 }
 0x80f   :  { %v7234_v2 = vadd.f32 %v7233_v1, %v7232_v17  ;;  %v7257_v55 = vpop.f32.mrb[36].mxu0  ;;  %v2479_v3 = vadd.f32 %v7231_v58, %v6566_v28 }
 0x810   :  { %v7258_v40 = vpop.f32.mrb[37].mxu0 }
 0x811   :  { %v7259_v57 = vadd.f32 %v7258_v40, %v7257_v55  ;;  %v7260_v61 = vpop.f32.mrb[38].mxu0  ;;  %v2482_v8 = vadd.f32 %v7234_v2, %v6566_v28  ;;  %v7897_v28 = vld [vmem:[%s10584_s7 + $0x490] sm:$0xff]  }
 0x812   :  { %v7261_v5 = vpop.f32.mrb[39].mxu0  ;;  %7275 = vmatprep.subr.bf16.mxu0 %v7897_v28  ;;  %v6617_v28 = vld [vmem:[%s10582_s5 + $0x3] sm:$0x1] }
 0x813   :  { %v7262_v59 = vadd.f32 %v7261_v5, %v7260_v61  ;;  %v2528_v7 = vadd.f32 %v7259_v57, %v2479_v3  ;;  %7276 = vmatpush3.bf16.msra.mxu0 %v7898_v32 }
 0x815   :  { %v2531_v11 = vadd.f32 %v7262_v59, %v2482_v8 }
 0x833   :  { %v2568_v54 = vpop.f32.mrb[36].mxu1 }
 0x834   :  { %v2569_v33 = vadd.f32 %v2568_v54, %v9383_v46  ;;  %v2570_v36 = vpop.f32.mrb[37].mxu1 }
 0x835   :  { %v2571_v43 = vpop.f32.mrb[38].mxu1 }
 0x836   :  { %v2572_v44 = vadd.f32 %v2571_v43, %v9385_v63  ;;  %v2573_v45 = vpop.f32.mrb[39].mxu1  ;;  %v2587_v47 = vsel %vm364_vm9, %v2569_v33, 0.0 }
 0x838   :  { %v2588_v13 = vsel %vm364_vm9, %v2572_v44, 0.0 }
 0x839   :  { %v2589_v18 = vadd.f32 %v2588_v13, %v2587_v47 }
 0x83b   :  { %v2576_v37 = vpop.f32.mrb[40].mxu1 }
 0x83c   :  { %v2577_v58 = vadd.f32 %v2576_v37, %v2528_v7  ;;  %v2578_v17 = vpop.f32.mrb[41].mxu1 }
 0x83d   :  { %v2579_v1 = vpop.f32.mrb[42].mxu1 }
 0x83e   :  { %v2590_v2 = vsel %vm364_vm9, %v2577_v58, 0.0  ;;  %v2580_v55 = vadd.f32 %v2579_v1, %v2531_v11  ;;  %v2581_v40 = vpop.f32.mrb[43].mxu1 }
 0x83f   :  { %v2591_v3 = vadd.f32 %v2590_v2, %v2589_v18  ;;  %v7902_v40 = vld [vmem:[%s10584_s7 + $0x458] sm:$0xff]  }
 0x840   :  { %v2592_v46 = vsel %vm364_vm9, %v2580_v55, 0.0 }
 0x841   :  { %v2593_v57 = vadd.f32 %v2592_v46, %v2591_v3  ;;  %v7903_v3 = vld [vmem:[%s10584_s7 + $0x510] sm:$0xff]  }
 0x842   :  { %v7904_v46 = vld [vmem:[%s10584_s7 + $0x4d0] sm:$0xff]   ;;  %7303 = vmatprep.subr.bf16.mxu1 %v7903_v3 }
 0x843   :  { %v2594_v61 = vrot.slane %v2593_v57, 4  ;;  %7304 = vmatpush3.bf16.msra.mxu1 %v7904_v46 }
 0x845   :  { %v2595_v63 = vadd.f32 %v2594_v61, %v2593_v57 }
 0x847   :  { %v2596_v42 = vrot.slane %v2595_v63, 2 }
 0x849   :  { %v2597_v4 = vadd.f32 %v2596_v42, %v2595_v63 }
 0x84b   :  { %v2598_v51 = vrot.slane %v2597_v4, 1 }
 0x84d   :  { %v2599_v5 = vadd.f32 %v2598_v51, %v2597_v4 }
 0x84f   :  { %v2600_v6 = vmul.f32 0.03125, %v2599_v5 }
 0x851   :  { %v2601_v56 = vsub.f32 %v2569_v33, %v2600_v6  ;;  %v2602_v8 = vsub.f32 %v2572_v44, %v2600_v6  ;;  %v2603_v59 = vsub.f32 %v2577_v58, %v2600_v6  ;;  %v2604_v7 = vsub.f32 %v2580_v55, %v2600_v6  ;;  %v6619_v33 = vld [vmem:[%s10583_s6 + $0x3] ss:$0 sm:$0xff]  ;;  %v7901_v55 = vld [vmem:[%s10584_s7 + $0x498] sm:$0xff]  }
 0x852   :  { %7277 = vmatprep.subr.bf16.mxu0 %v7901_v55  ;;  %v7905_v6 = vld [vmem:[%s10584_s7 + $0x518] sm:$0xff]  }
 0x853   :  { %v2605_v38 = vmul.f32 %v2601_v56, %v2601_v56  ;;  %v2606_v12 = vmul.f32 %v2602_v8, %v2602_v8  ;;  %v2607_v41 = vmul.f32 %v2603_v59, %v2603_v59  ;;  %v2608_v11 = vmul.f32 %v2604_v7, %v2604_v7  ;;  %7278 = vmatpush3.bf16.msra.mxu0 %v7902_v40 }
 0x854   :  { %3226 = vmatprep.subr.bf16.mxu0 %v8319_v30  ;;  %7305 = vmatprep.subr.bf16.mxu1 %v7905_v6  ;;  %v7906_v6 = vld [vmem:[%s10584_s7 + $0x520] sm:$0xff]  }
 0x855   :  { %v2609_v10 = vsel %vm364_vm9, %v2605_v38, 0.0  ;;  %v2610_v15 = vsel %vm364_vm9, %v2606_v12, 0.0  ;;  %v2612_v0 = vsel %vm364_vm9, %v2607_v41, 0.0  ;;  %v2614_v14 = vsel %vm364_vm9, %v2608_v11, 0.0 }
 0x856   :  { %v2611_v19 = vadd.f32 %v2610_v15, %v2609_v10 }
 0x858   :  { %v2613_v21 = vadd.f32 %v2612_v0, %v2611_v19 }
 0x85a   :  { %v2615_v16 = vadd.f32 %v2614_v14, %v2613_v21 }
 0x85c   :  { %v2616_v52 = vrot.slane %v2615_v16, 4 }
 0x85e   :  { %v2617_v53 = vadd.f32 %v2616_v52, %v2615_v16 }
 0x860   :  { %v2618_v24 = vrot.slane %v2617_v53, 2 }
 0x862   :  { %v2619_v23 = vadd.f32 %v2618_v24, %v2617_v53 }
 0x864   :  { %v2620_v34 = vrot.slane %v2619_v23, 1 }
 0x866   :  { %v2621_v25 = vadd.f32 %v2620_v34, %v2619_v23 }
 0x868   :  { %v2622_v26 = vmul.f32 0.03125, %v2621_v25 }
 0x86a   :  { %v2623_v35 = vadd.f32 1e-05, %v2622_v26 }
 0x86c   :  { %8013 = vrsqrt.f32 %v2623_v35 }
 0x876   :  { %v8014_v31 = vpop.eup %8013 }
 0x877   :  { %v2625_v32 = vmul.f32 %v8014_v31, %v6617_v28 }
 0x879   :  { %v2629_v54 = vrot.slane %v2625_v32, %v8704_v20 }
 0x87b   :  { %v2630_v36 = vmul.f32 %v2629_v54, %v2601_v56  ;;  %v2631_v43 = vmul.f32 %v2629_v54, %v2602_v8  ;;  %v2632_v44 = vmul.f32 %v2629_v54, %v2603_v59  ;;  %v2633_v45 = vmul.f32 %v2629_v54, %v2604_v7  ;;  %v7907_v56 = vld [vmem:[%s10584_s7 + $0x4d8] sm:$0xff]  }
 0x87c   :  { %7306 = vmatpush3.bf16.msra.mxu1 %v7907_v56 }
 0x87d   :  { %v2640_v47 = vadd.f32 %v6619_v33, %v2630_v36  ;;  %v2641_v13 = vadd.f32 %v6619_v33, %v2631_v43  ;;  %v2642_v18 = vadd.f32 %v6619_v33, %v2632_v44  ;;  %v2643_v37 = vadd.f32 %v6619_v33, %v2633_v45 }
 0x87f   :  { %v2644_v58 = vmax.f32 %v2640_v47, 0.0  ;;  %v2645_v17 = vmax.f32 %v2641_v13, 0.0  ;;  %v2646_v1 = vmax.f32 %v2642_v18, 0.0  ;;  %v2647_v2 = vmax.f32 %v2643_v37, 0.0 }
 0x881   :  { %v2744_v57 = vrot.slane %v2645_v17, 6  ;;  %v2746_v61 = vrot.slane %v2646_v1, 6  ;;  %v2748_v63 = vrot.slane %v2647_v2, 6  ;;  %v2743_v42 = vrot.slane %v2644_v58, 6 }
 0x883   :  { %v9495_v4 = vsel %vm121_vm2, %v2746_v61, %v2748_v63  ;;  %v9498_v51 = vsel %vm121_vm2, %v2743_v42, %v2744_v57  ;;  %v2755_v5 = vsel %vm121_vm2, 0.0, %v2743_v42  ;;  %v9511_v12 = vsel %vm121_vm2, %v2748_v63, 0.0 }
 0x884   :  { %v2790_v8 = vrot.slane %v2755_v5, 6  ;;  %v2792_v59 = vrot.slane %v9498_v51, 6  ;;  %v2758_v7 = vrot.slane %v2755_v5, 2  ;;  %v2760_v38 = vrot.slane %v9498_v51, 2 }
 0x885   :  { %v9514_v41 = vsel %vm121_vm2, %v2744_v57, %v2746_v61  ;;  %v2796_v11 = vrot.slane %v9495_v4, 6  ;;  %v2764_v10 = vrot.slane %v9495_v4, 2  ;;  %v2811_v24 = vrot.slane %v9511_v12, 2 }
 0x886   :  { %v2791_v15 = vsel %vm121_vm2, %v8720_v50, %v2790_v8  ;;  %v2793_v19 = vsel %vm121_vm2, %v2790_v8, %v2792_v59  ;;  %v2759_v0 = vsel %vm78_vm1, %v8717_v49, %v2758_v7  ;;  %v2761_v21 = vsel %vm78_vm1, %v2758_v7, %v2760_v38 }
 0x887   :  { %v7656_v14 = vpack.i.bf16 %v2793_v19, %v2791_v15  ;;  %v7661_v16 = vpack.i.bf16 %v2759_v0, %v2761_v21  ;;  %v2794_v52 = vrot.slane %v9514_v41, 6  ;;  %v2762_v53 = vrot.slane %v9514_v41, 2 }
 0x888   :  { %v2819_v23 = vrot.slane %v9511_v12, 6  ;;  %v2812_v32 = vsel %vm78_vm1, %v2764_v10, %v2811_v24  ;;  %v2824_v36 = vsel %vm78_vm1, %v2811_v24, %v8717_v49  ;;  %v2778_v43 = vrot.slane %v2755_v5, 4 }
 0x889   :  { %7657 = vrot.lane.b32.xlu0 %v7656_v14, %s8320_s3  ;;  %7662 = vrot.lane.b32.xlu1 %v7661_v16, %s8320_s3  ;;  %v2795_v34 = vsel %vm121_vm2, %v2792_v59, %v2794_v52  ;;  %v2797_v25 = vsel %vm121_vm2, %v2794_v52, %v2796_v11  ;;  %v2763_v26 = vsel %vm78_vm1, %v2760_v38, %v2762_v53  ;;  %v2780_v44 = vrot.slane %v9498_v51, 4  ;;  %v7908_v52 = vld [vmem:[%s10584_s7 + $0x528] sm:$0xff]  }
 0x88a   :  { %v2765_v35 = vsel %vm78_vm1, %v2762_v53, %v2764_v10  ;;  %v7666_v28 = vpack.i.bf16 %v2797_v25, %v2795_v34  ;;  %v2820_v54 = vsel %vm121_vm2, %v2796_v11, %v2819_v23  ;;  %v2779_v17 = vsel %vm61_vm0, %v8786_v29, %v2778_v43 }
 0x88b   :  { %v7671_v31 = vpack.i.bf16 %v2765_v35, %v2763_v26  ;;  %v7676_v33 = vpack.i.bf16 %v2812_v32, %v2820_v54  ;;  %v2781_v1 = vsel %vm61_vm0, %v2778_v43, %v2780_v44  ;;  %v2782_v2 = vrot.slane %v9514_v41, 4  ;;  %v7909_v26 = vld [vmem:[%s10584_s7 + $0x530] sm:$0xff]   ;;  %v7911_v54 = vld [vmem:[%s10584_s7 + $0x540] sm:$0xff]  }
 0x88c   :  { %v2784_v55 = vrot.slane %v9495_v4, 4  ;;  %v2816_v11 = vrot.slane %v9511_v12, 4  ;;  %v7915_v43 = vld [vmem:[%s10584_s7 + $0x560] sm:$0xff]  }
 0x88d   :  { %7667 = vrot.lane.b32.xlu0 %v7666_v28, %s8320_s3  ;;  %7672 = vrot.lane.b32.xlu1 %v7671_v31, %s8320_s3  ;;  %v2783_v38 = vsel %vm61_vm0, %v2780_v44, %v2782_v2  ;;  %v7916_v44 = vld [vmem:[%s10584_s7 + $0x568] sm:$0xff]  }
 0x88e   :  { %v2817_v24 = vsel %vm61_vm0, %v2784_v55, %v2816_v11 }
 0x891   :  { %7677 = vrot.lane.b32.xlu0 %v7676_v33, %s8320_s3  ;;  %2825 = vrot.lane.b32.xlu1 %v2824_v36, %s8320_s3  ;;  %v7913_v33 = vld [vmem:[%s10584_s7 + $0x550] sm:$0xff]   ;;  %v7914_v36 = vld [vmem:[%s10584_s7 + $0x558] sm:$0xff]  }
 0x8fb   :  { %v7658_v45 = vpop.permute.xlu0 %7657  ;;  %v7663_v47 = vpop.permute.xlu1 %7662 }
 0x8fc   :  { %v7660_v13 = vunpack.i.h.bf16 %v7658_v45  ;;  %v7659_v18 = vunpack.i.l.bf16 %v7658_v45  ;;  %v7665_v37 = vunpack.i.h.bf16 %v7663_v47  ;;  %v7664_v58 = vunpack.i.l.bf16 %v7663_v47  ;;  %v7917_v45 = vld [vmem:[%s10584_s7 + $0x570] sm:$0xff]   ;;  %v7918_v47 = vld [vmem:[%s10584_s7 + $0x578] sm:$0xff]  }
 0x8fe   :  { %v2831_v40 = vsel %vm364_vm9, %v2755_v5, %v7664_v58  ;;  %v2834_v3 = vsel %vm364_vm9, %v2779_v17, %v7659_v18  ;;  %v2835_v46 = vsel %vm364_vm9, %v2781_v1, %v7660_v13  ;;  %v2785_v5 = vsel %vm61_vm0, %v2782_v2, %v2784_v55 }
 0x8ff   :  { %v6756_v57 = vpack.c.bf16 %v2831_v40, %v7665_v37  ;;  %v7668_v61 = vpop.permute.xlu0 %7667  ;;  %v7673_v63 = vpop.permute.xlu1 %7672  ;;  %v2842_v42 = vpack.c.bf16 %v2835_v46, %v2834_v3  ;;  %v2846_v31 = vpack.c.bf16 %v2785_v5, %v2783_v38  ;;  %v2828_v13 = vsel %vm61_vm0, %v2816_v11, %v8786_v29  ;;  %v6709_v3 = vld [vmem:[%s10585_s8 + $0x3] ss:$0 sm:$0xff] }
 0x900   :  { %v7670_v56 = vunpack.i.h.bf16 %v7668_v61  ;;  %v7669_v8 = vunpack.i.l.bf16 %v7668_v61  ;;  %v7674_v59 = vunpack.i.l.bf16 %v7673_v63  ;;  %v7675_v7 = vunpack.i.h.bf16 %v7673_v63 }
 0x901   :  { %3160 = vmatprep.mubr.bf16.mxu0 %v2842_v42  ;;  %v2851_v18 = vpack.c.bf16 %v2828_v13, %v2817_v24  ;;  %v7930_v13 = vld [vmem:[%s10584_s7 + $0x598] sm:$0xff]  }
 0x902   :  { %v2832_v10 = vsel %vm364_vm9, %v9498_v51, %v7674_v59  ;;  %6757 = vmatmul.mubr.msk.bf16.vlgmr.msra.gmra.mrb[40].mxu0 %vm8800_vm13, %v6756_v57  ;;  %v2836_v15 = vsel %vm364_vm9, %v2783_v38, %v7669_v8  ;;  %v2837_v19 = vsel %vm364_vm9, %v2785_v5, %v7670_v56  ;;  %v2833_v23 = vsel %vm364_vm9, %v9514_v41, %v7675_v7  ;;  %v7910_v41 = vld [vmem:[%s10584_s7 + $0x538] sm:$0xff]  }
 0x903   :  { %v2843_v0 = vpack.c.bf16 %v2832_v10, %v2831_v40  ;;  %3227 = vmatpush1.bf16.msra.mxu0 %v7906_v6  ;;  %v7678_v21 = vpop.permute.xlu0 %7677  ;;  %v2847_v14 = vpack.c.bf16 %v2837_v19, %v2836_v15  ;;  %v2844_v16 = vpack.c.bf16 %v2836_v15, %v2835_v46  ;;  %v2845_v35 = vpack.c.bf16 %v2833_v23, %v2832_v10  ;;  %v2826_v37 = vpop.permute.xlu1 %2825 }
 0x904   :  { %v7679_v53 = vunpack.i.l.bf16 %v7678_v21  ;;  %3228 = vmatprep.subr.bf16.mxu0 %v8319_v30  ;;  %v7680_v51 = vunpack.i.h.bf16 %v7678_v21  ;;  %v2840_v58 = vsel %vm364_vm9, %v9511_v12, %v2826_v37  ;;  %v7936_v37 = vld [vmem:[%s10584_s7 + $0x618] sm:$0xff]  }
 0x905   :  { %3168 = vmatprep.mubr.bf16.mxu0 %v2847_v14  ;;  %3209 = vmatprep.mubr.bf16.mxu1 %v2844_v16 }
 0x906   :  { %3210 = vmatmul.mubr.bf16.vlgmr.msra.gmra.mrb[44].mxu1 %v2843_v0  ;;  %v2839_v34 = vsel %vm364_vm9, %v2817_v24, %v7679_v53  ;;  %v2838_v28 = vsel %vm364_vm9, %v9495_v4, %v7680_v51  ;;  %v7912_v4 = vld [vmem:[%s10584_s7 + $0x548] sm:$0xff]  }
 0x907   :  { %3229 = vmatpush1.bf16.msra.mxu0 %v7908_v52  ;;  %v2849_v25 = vpack.c.bf16 %v2839_v34, %v2837_v19  ;;  %v2848_v32 = vpack.c.bf16 %v2838_v28, %v2833_v23  ;;  %v2850_v17 = vpack.c.bf16 %v2840_v58, %v2838_v28  ;;  %v7923_v28 = vld [vmem:[%s10584_s7 + $0x640] sm:$0xff]  }
 0x908   :  { %3230 = vmatprep.subr.bf16.mxu0 %v8319_v30  ;;  %v7939_v58 = vld [vmem:[%s10584_s7 + $0x660] sm:$0xff]  }
 0x909   :  { %3217 = vmatprep.mubr.bf16.mxu1 %v2849_v25  ;;  %v7919_v25 = vld [vmem:[%s10584_s7 + $0x5c0] sm:$0xff]  }
 0x90a   :  { %3169 = vmatmul.mubr.bf16.gmra.mrb[44].mxu0 %v2845_v35  ;;  %7319 = vmatprep.subr.bf16.mxu1 %v7919_v25 }
 0x90b   :  { %3231 = vmatpush1.bf16.msra.mxu0 %v7909_v26  ;;  %6758 = vmatprep.mubr.msk.bf16.mxu0 %vm364_vm9, %v2846_v31  ;;  %v7920_v26 = vld [vmem:[%s10584_s7 + $0x580] sm:$0xff]  }
 0x90c   :  { %3232 = vmatprep.subr.bf16.mxu0 %v8319_v30  ;;  %v7924_v31 = vld [vmem:[%s10584_s7 + $0x600] sm:$0xff]   ;;  %7320 = vmatpush3.bf16.msra.mxu1 %v7920_v26 }
 0x90e   :  { %3218 = vmatmul.mubr.bf16.gmra.mrb[48].mxu1 %v2848_v32  ;;  %v7927_v32 = vld [vmem:[%s10584_s7 + $0x648] sm:$0xff]  }
 0x90f   :  { %3233 = vmatpush1.bf16.msra.mxu0 %v7910_v41 }
 0x910   :  { %3234 = vmatprep.subr.bf16.mxu0 %v8319_v30 }
 0x913   :  { %3235 = vmatpush1.bf16.msra.mxu0 %v7911_v54  ;;  %v7922_v54 = vld [vmem:[%s10584_s7 + $0x588] sm:$0xff]  }
 0x914   :  { %3236 = vmatprep.subr.bf16.mxu0 %v8319_v30 }
 0x917   :  { %3237 = vmatpush1.bf16.msra.mxu0 %v7912_v4  ;;  %v7925_v4 = vld [vmem:[%s10584_s7 + $0x5d0] sm:$0xff]  }
 0x918   :  { %3238 = vmatprep.subr.bf16.mxu0 %v8319_v30 }
 0x91b   :  { %3239 = vmatpush1.bf16.msra.mxu0 %v7913_v33  ;;  %v7928_v33 = vld [vmem:[%s10584_s7 + $0x608] sm:$0xff]  }
 0x91c   :  { %3240 = vmatprep.subr.bf16.mxu0 %v8319_v30 }
 0x91f   :  { %3241 = vmatpush1.bf16.msra.mxu0 %v7914_v36  ;;  %v7931_v36 = vld [vmem:[%s10584_s7 + $0x650] sm:$0xff]  }
 0x920   :  { %3242 = vmatprep.subr.bf16.mxu0 %v8319_v30 }
 0x923   :  { %3243 = vmatpush1.bf16.msra.mxu0 %v7915_v43  ;;  %v7926_v43 = vld [vmem:[%s10584_s7 + $0x590] sm:$0xff]  }
 0x924   :  { %3244 = vmatprep.subr.bf16.mxu0 %v8319_v30 }
 0x927   :  { %3245 = vmatpush1.bf16.msra.mxu0 %v7916_v44  ;;  %v7929_v44 = vld [vmem:[%s10584_s7 + $0x5d8] sm:$0xff]  }
 0x928   :  { %3246 = vmatprep.subr.bf16.mxu0 %v8319_v30 }
 0x92b   :  { %3247 = vmatpush1.bf16.msra.mxu0 %v7917_v45  ;;  %v7932_v45 = vld [vmem:[%s10584_s7 + $0x610] sm:$0xff]  }
 0x92c   :  { %3248 = vmatprep.subr.bf16.mxu0 %v8319_v30 }
 0x92f   :  { %3249 = vmatpush1.bf16.msra.mxu0 %v7918_v47  ;;  %v7935_v47 = vld [vmem:[%s10584_s7 + $0x658] sm:$0xff]  }
 0x930   :  { %7347 = vmatprep.subr.bf16.mxu0 %v7923_v28 }
 0x932   :  { %3259 = vmatmul.mubr.bf16.vlgmr.msra.gmra.mrb[48].mxu0 %v2845_v35  ;;  %v7921_v35 = vld [vmem:[%s10584_s7 + $0x5c8] sm:$0xff]  }
 0x933   :  { %6759 = vmatprep.mubr.msk.bf16.mxu0 %vm364_vm9, %v2851_v18  ;;  %7321 = vmatprep.subr.bf16.mxu1 %v7921_v35  ;;  %v7933_v18 = vld [vmem:[%s10584_s7 + $0x5e0] sm:$0xff]  }
 0x934   :  { %7348 = vmatpush3.bf16.msra.mxu0 %v7924_v31  ;;  %7322 = vmatpush3.bf16.msra.mxu1 %v7922_v54 }
 0x935   :  { %7349 = vmatprep.subr.bf16.mxu0 %v7927_v32  ;;  %7323 = vmatprep.subr.bf16.mxu1 %v7925_v4 }
 0x938   :  { %7350 = vmatpush3.bf16.msra.mxu0 %v7928_v33  ;;  %7324 = vmatpush3.bf16.msra.mxu1 %v7926_v43 }
 0x939   :  { %7351 = vmatprep.subr.bf16.mxu0 %v7931_v36  ;;  %7325 = vmatprep.subr.bf16.mxu1 %v7929_v44 }
 0x93a   :  { %3267 = vmatmul.mubr.bf16.gmra.mrb[52].mxu0 %v2850_v17  ;;  %v7934_v17 = vld [vmem:[%s10584_s7 + $0x5a0] sm:$0xff]  }
 0x93c   :  { %7352 = vmatpush3.bf16.msra.mxu0 %v7932_v45  ;;  %7326 = vmatpush3.bf16.msra.mxu1 %v7930_v13 }
 0x93d   :  { %7353 = vmatprep.subr.bf16.mxu0 %v7935_v47  ;;  %7327 = vmatprep.subr.bf16.mxu1 %v7933_v18 }
 0x940   :  { %7354 = vmatpush3.bf16.msra.mxu0 %v7936_v37  ;;  %7328 = vmatpush3.bf16.msra.mxu1 %v7934_v17 }
 0x941   :  { %7355 = vmatprep.subr.bf16.mxu0 %v7939_v58 }
 0x9d5   :  { %v7279_v1 = vpop.f32.mrb[40].mxu0 }
 0x9d6   :  { %v7280_v2 = vpop.f32.mrb[41].mxu0 }
 0x9d7   :  { %v7281_v55 = vadd.f32 %v7280_v2, %v7279_v1  ;;  %v7282_v40 = vpop.f32.mrb[42].mxu0  ;;  %v7937_v1 = vld [vmem:[%s10584_s7 + $0x5e8] sm:$0xff]   ;;  %v7940_v2 = vld [vmem:[%s10584_s7 + $0x620] sm:$0xff]  }
 0x9d8   :  { %v7283_v46 = vpop.f32.mrb[43].mxu0  ;;  %7329 = vmatprep.subr.bf16.mxu1 %v7937_v1  ;;  %7356 = vmatpush3.bf16.msra.mxu0 %v7940_v2 }
 0x9d9   :  { %v7284_v57 = vadd.f32 %v7283_v46, %v7282_v40  ;;  %v7307_v61 = vpop.f32.mrb[44].mxu1  ;;  %v3163_v42 = vadd.f32 %v7281_v55, %v6709_v3  ;;  %v7943_v55 = vld [vmem:[%s10584_s7 + $0x668] sm:$0xff]  }
 0x9da   :  { %v7308_v63 = vpop.f32.mrb[45].mxu1  ;;  %v7938_v40 = vld [vmem:[%s10584_s7 + $0x5a8] sm:$0xff]   ;;  %7357 = vmatprep.subr.bf16.mxu0 %v7943_v55 }
 0x9db   :  { %v7309_v6 = vadd.f32 %v7308_v63, %v7307_v61  ;;  %v7310_v56 = vpop.f32.mrb[46].mxu1  ;;  %v3166_v59 = vadd.f32 %v7284_v57, %v6709_v3  ;;  %v7944_v46 = vld [vmem:[%s10584_s7 + $0x628] sm:$0xff]   ;;  %7330 = vmatpush3.bf16.msra.mxu1 %v7938_v40  ;;  %v7942_v57 = vld [vmem:[%s10584_s7 + $0x5b0] sm:$0xff]  }
 0x9dc   :  { %v7311_v8 = vpop.f32.mrb[47].mxu1  ;;  %7358 = vmatpush3.bf16.msra.mxu0 %v7944_v46 }
 0x9dd   :  { %v7312_v12 = vadd.f32 %v7311_v8, %v7310_v56  ;;  %v7285_v7 = vpop.f32.mrb[44].mxu0  ;;  %v9622_v38 = vadd.f32 %v7309_v6, %v3163_v42 }
 0x9de   :  { %v7286_v5 = vpop.f32.mrb[45].mxu0 }
 0x9df   :  { %v7287_v11 = vadd.f32 %v7286_v5, %v7285_v7  ;;  %v7288_v10 = vpop.f32.mrb[46].mxu0  ;;  %v9624_v15 = vadd.f32 %v7312_v12, %v3166_v59 }
 0x9e0   :  { %v7289_v19 = vpop.f32.mrb[47].mxu0 }
 0x9e1   :  { %v7290_v0 = vadd.f32 %v7289_v19, %v7288_v10  ;;  %v7313_v21 = vpop.f32.mrb[48].mxu1  ;;  %v3171_v16 = vadd.f32 %v7287_v11, %v6709_v3 }
 0x9e2   :  { %v7314_v14 = vpop.f32.mrb[49].mxu1 }
 0x9e3   :  { %v7315_v52 = vadd.f32 %v7314_v14, %v7313_v21  ;;  %v7316_v53 = vpop.f32.mrb[50].mxu1  ;;  %v3174_v24 = vadd.f32 %v7290_v0, %v6709_v3  ;;  %v7941_v3 = vld [vmem:[%s10584_s7 + $0x5f0] sm:$0xff]  }
 0x9e4   :  { %v7317_v51 = vpop.f32.mrb[51].mxu1  ;;  %7331 = vmatprep.subr.bf16.mxu1 %v7941_v3  ;;  %v6760_v3 = vld [vmem:[%s10582_s5 + $0x4] sm:$0x1] }
 0x9e5   :  { %v7318_v23 = vadd.f32 %v7317_v51, %v7316_v53  ;;  %v9626_v34 = vadd.f32 %v7315_v52, %v3171_v16  ;;  %7332 = vmatpush3.bf16.msra.mxu1 %v7942_v57 }
 0x9e7   :  { %v9643_v41 = vadd.f32 %v7318_v23, %v3174_v24 }
 0xa05   :  { %v3260_v61 = vpop.f32.mrb[48].mxu0 }
 0xa06   :  { %v3261_v63 = vadd.f32 %v3260_v61, %v9622_v38  ;;  %v3262_v42 = vpop.f32.mrb[49].mxu0 }
 0xa07   :  { %v3263_v6 = vpop.f32.mrb[50].mxu0 }
 0xa08   :  { %v3264_v56 = vadd.f32 %v3263_v6, %v9624_v15  ;;  %v3265_v8 = vpop.f32.mrb[51].mxu0  ;;  %v9714_v12 = vadd.f32 %v3261_v63, %v9210_v39  ;;  %v6762_v63 = vld [vmem:[%s10583_s6 + $0x4] ss:$0 sm:$0xff] }
 0xa0a   :  { %v9711_v59 = vadd.f32 %v3264_v56, %v9207_v22  ;;  %v3283_v38 = vsel %vm364_vm9, %v9714_v12, 0.0 }
 0xa0c   :  { %v3284_v5 = vsel %vm364_vm9, %v9711_v59, 0.0 }
 0xa0d   :  { %v3268_v7 = vpop.f32.mrb[52].mxu0  ;;  %v3285_v21 = vadd.f32 %v3284_v5, %v3283_v38 }
 0xa0e   :  { %v3269_v11 = vadd.f32 %v3268_v7, %v9626_v34  ;;  %v3270_v10 = vpop.f32.mrb[53].mxu0 }
 0xa0f   :  { %v3271_v19 = vpop.f32.mrb[54].mxu0 }
 0xa10   :  { %v9722_v15 = vadd.f32 %v3269_v11, %v9218_v60  ;;  %v3272_v22 = vadd.f32 %v3271_v19, %v9643_v41  ;;  %v3273_v0 = vpop.f32.mrb[55].mxu0 }
 0xa12   :  { %v3286_v39 = vsel %vm364_vm9, %v9722_v15, 0.0  ;;  %v9728_v14 = vadd.f32 %v3272_v22, %v9224_v27 }
 0xa13   :  { %v3287_v16 = vadd.f32 %v3286_v39, %v3285_v21  ;;  %v7945_v21 = vld [vmem:[%s10584_s7 + $0x5f8] sm:$0xff]  }
 0xa14   :  { %v3288_v52 = vsel %vm364_vm9, %v9728_v14, 0.0  ;;  %v7946_v39 = vld [vmem:[%s10584_s7 + $0x5b8] sm:$0xff]   ;;  %7333 = vmatprep.subr.bf16.mxu1 %v7945_v21 }
 0xa15   :  { %v3289_v53 = vadd.f32 %v3288_v52, %v3287_v16  ;;  %v7947_v16 = vld [vmem:[%s10584_s7 + $0x670] sm:$0xff]   ;;  %7334 = vmatpush3.bf16.msra.mxu1 %v7946_v39 }
 0xa16   :  { %v7948_v52 = vld [vmem:[%s10584_s7 + $0x630] sm:$0xff]   ;;  %7359 = vmatprep.subr.bf16.mxu0 %v7947_v16  ;;  %3922 = vmatprep.subr.bf16.mxu1 %v8319_v30 }
 0xa17   :  { %v3290_v51 = vrot.slane %v3289_v53, 4  ;;  %7360 = vmatpush3.bf16.msra.mxu0 %v7948_v52 }
 0xa19   :  { %v3291_v24 = vadd.f32 %v3290_v51, %v3289_v53 }
 0xa1b   :  { %v3292_v23 = vrot.slane %v3291_v24, 2 }
 0xa1d   :  { %v3293_v60 = vadd.f32 %v3292_v23, %v3291_v24 }
 0xa1f   :  { %v3294_v34 = vrot.slane %v3293_v60, 1 }
 0xa21   :  { %v3295_v25 = vadd.f32 %v3294_v34, %v3293_v60 }
 0xa23   :  { %v3296_v26 = vmul.f32 0.03125, %v3295_v25 }
 0xa25   :  { %v3297_v35 = vsub.f32 %v9714_v12, %v3296_v26  ;;  %v3298_v28 = vsub.f32 %v9711_v59, %v3296_v26  ;;  %v3299_v31 = vsub.f32 %v9722_v15, %v3296_v26  ;;  %v3300_v27 = vsub.f32 %v9728_v14, %v3296_v26 }
 0xa27   :  { %v3301_v41 = vmul.f32 %v3297_v35, %v3297_v35  ;;  %v3302_v32 = vmul.f32 %v3298_v28, %v3298_v28  ;;  %v3303_v54 = vmul.f32 %v3299_v31, %v3299_v31  ;;  %v3304_v4 = vmul.f32 %v3300_v27, %v3300_v27 }
 0xa29   :  { %v3305_v33 = vsel %vm364_vm9, %v3301_v41, 0.0  ;;  %v3306_v36 = vsel %vm364_vm9, %v3302_v32, 0.0  ;;  %v3308_v44 = vsel %vm364_vm9, %v3303_v54, 0.0  ;;  %v3310_v47 = vsel %vm364_vm9, %v3304_v4, 0.0 }
 0xa2a   :  { %v3307_v43 = vadd.f32 %v3306_v36, %v3305_v33 }
 0xa2c   :  { %v3309_v45 = vadd.f32 %v3308_v44, %v3307_v43 }
 0xa2e   :  { %v3311_v13 = vadd.f32 %v3310_v47, %v3309_v45 }
 0xa30   :  { %v3312_v18 = vrot.slane %v3311_v13, 4 }
 0xa32   :  { %v3313_v37 = vadd.f32 %v3312_v18, %v3311_v13 }
 0xa34   :  { %v3314_v58 = vrot.slane %v3313_v37, 2 }
 0xa36   :  { %v3315_v17 = vadd.f32 %v3314_v58, %v3313_v37 }
 0xa38   :  { %v3316_v1 = vrot.slane %v3315_v17, 1 }
 0xa3a   :  { %v3317_v2 = vadd.f32 %v3316_v1, %v3315_v17 }
 0xa3c   :  { %v3318_v55 = vmul.f32 0.03125, %v3317_v2 }
 0xa3e   :  { %v3319_v40 = vadd.f32 1e-05, %v3318_v55 }
 0xa40   :  { %8015 = vrsqrt.f32 %v3319_v40 }
 0xa4a   :  { %v8016_v46 = vpop.eup %8015 }
 0xa4b   :  { %v3321_v57 = vmul.f32 %v8016_v46, %v6760_v3 }
 0xa4d   :  { %v3325_v61 = vrot.slane %v3321_v57, %v8704_v20 }
 0xa4f   :  { %v3329_v42 = vmul.f32 %v3325_v61, %v3300_v27  ;;  %v3326_v6 = vmul.f32 %v3325_v61, %v3297_v35  ;;  %v3327_v56 = vmul.f32 %v3325_v61, %v3298_v28  ;;  %v3328_v8 = vmul.f32 %v3325_v61, %v3299_v31  ;;  %v7949_v35 = vld [vmem:[%s10584_s7 + $0x678] sm:$0xff]  }
 0xa50   :  { %v7951_v28 = vld [vmem:[%s10584_s7 + $0x638] sm:$0xff]   ;;  %7361 = vmatprep.subr.bf16.mxu0 %v7949_v35  ;;  %v7950_v35 = vld [vmem:[%s10584_s7 + $0x680] sm:$0xff]  }
 0xa51   :  { %v3339_v7 = vadd.f32 %v6762_v63, %v3329_v42  ;;  %v3336_v5 = vadd.f32 %v6762_v63, %v3326_v6  ;;  %v3337_v11 = vadd.f32 %v6762_v63, %v3327_v56  ;;  %v3338_v10 = vadd.f32 %v6762_v63, %v3328_v8  ;;  %7362 = vmatpush3.bf16.msra.mxu0 %v7951_v28 }
 0xa53   :  { %v3343_v19 = vmax.f32 %v3339_v7, 0.0  ;;  %v3340_v38 = vmax.f32 %v3336_v5, 0.0  ;;  %v3341_v22 = vmax.f32 %v3337_v11, 0.0  ;;  %v3342_v0 = vmax.f32 %v3338_v10, 0.0 }
 0xa55   :  { %v3444_v53 = vrot.slane %v3343_v19, 6  ;;  %v3439_v51 = vrot.slane %v3340_v38, 6  ;;  %v3440_v24 = vrot.slane %v3341_v22, 6  ;;  %v3442_v23 = vrot.slane %v3342_v0, 6 }
 0xa57   :  { %v9760_v60 = vsel %vm121_vm2, %v3439_v51, %v3440_v24  ;;  %v3451_v34 = vsel %vm121_vm2, 0.0, %v3439_v51  ;;  %v9764_v25 = vsel %vm121_vm2, %v3440_v24, %v3442_v23  ;;  %v9767_v26 = vsel %vm121_vm2, %v3442_v23, %v3444_v53 }
 0xa58   :  { %v3486_v31 = vrot.slane %v3451_v34, 6  ;;  %v3488_v27 = vrot.slane %v9760_v60, 6  ;;  %v3454_v41 = vrot.slane %v3451_v34, 2  ;;  %v3456_v32 = vrot.slane %v9760_v60, 2 }
 0xa59   :  { %v3490_v54 = vrot.slane %v9764_v25, 6  ;;  %v3492_v4 = vrot.slane %v9767_v26, 6  ;;  %v3458_v33 = vrot.slane %v9764_v25, 2  ;;  %v3460_v36 = vrot.slane %v9767_v26, 2 }
 0xa5a   :  { %v3487_v43 = vsel %vm121_vm2, %v8720_v50, %v3486_v31  ;;  %v3489_v44 = vsel %vm121_vm2, %v3486_v31, %v3488_v27  ;;  %v3455_v45 = vsel %vm78_vm1, %v8717_v49, %v3454_v41  ;;  %v3457_v47 = vsel %vm78_vm1, %v3454_v41, %v3456_v32 }
 0xa5b   :  { %v7681_v13 = vpack.i.bf16 %v3489_v44, %v3487_v43  ;;  %v7686_v18 = vpack.i.bf16 %v3455_v45, %v3457_v47  ;;  %v3491_v37 = vsel %vm121_vm2, %v3488_v27, %v3490_v54  ;;  %v3493_v58 = vsel %vm121_vm2, %v3490_v54, %v3492_v4 }
 0xa5c   :  { %v3459_v17 = vsel %vm78_vm1, %v3456_v32, %v3458_v33  ;;  %v3461_v1 = vsel %vm78_vm1, %v3458_v33, %v3460_v36  ;;  %v9793_v2 = vsel %vm121_vm2, %v3444_v53, 0.0  ;;  %v7691_v3 = vpack.i.bf16 %v3493_v58, %v3491_v37 }
 0xa5d   :  { %7682 = vrot.lane.b32.xlu0 %v7681_v13, %s8320_s3  ;;  %7687 = vrot.lane.b32.xlu1 %v7686_v18, %s8320_s3  ;;  %v3507_v55 = vrot.slane %v9793_v2, 2  ;;  %v3515_v40 = vrot.slane %v9793_v2, 6  ;;  %v7696_v46 = vpack.i.bf16 %v3461_v1, %v3459_v17  ;;  %v3474_v6 = vrot.slane %v3451_v34, 4  ;;  %v7952_v13 = vld [vmem:[%s10584_s7 + $0x688] sm:$0xff]  }
 0xa5e   :  { %v3476_v56 = vrot.slane %v9760_v60, 4  ;;  %v3478_v0 = vrot.slane %v9764_v25, 4  ;;  %v3480_v21 = vrot.slane %v9767_v26, 4  ;;  %v3512_v54 = vrot.slane %v9793_v2, 4 }
 0xa5f   :  { %v3508_v57 = vsel %vm78_vm1, %v3460_v36, %v3507_v55  ;;  %v3516_v61 = vsel %vm121_vm2, %v3492_v4, %v3515_v40  ;;  %v3520_v42 = vsel %vm78_vm1, %v3507_v55, %v8717_v49  ;;  %v3475_v38 = vsel %vm61_vm0, %v8786_v29, %v3474_v6  ;;  %v7953_v55 = vld [vmem:[%s10584_s7 + $0x690] sm:$0xff]  }
 0xa60   :  { %v7701_v63 = vpack.i.bf16 %v3508_v57, %v3516_v61  ;;  %v3477_v22 = vsel %vm61_vm0, %v3474_v6, %v3476_v56  ;;  %v3479_v32 = vsel %vm61_vm0, %v3476_v56, %v3478_v0  ;;  %v3513_v37 = vsel %vm61_vm0, %v3480_v21, %v3512_v54  ;;  %v7955_v61 = vld [vmem:[%s10584_s7 + $0x6a0] sm:$0xff]   ;;  %v7960_v56 = vld [vmem:[%s10584_s7 + $0x6c8] sm:$0xff]  }
 0xa61   :  { %7692 = vrot.lane.b32.xlu0 %v7691_v3, %s8320_s3  ;;  %7697 = vrot.lane.b32.xlu1 %v7696_v46, %s8320_s3  ;;  %v7959_v6 = vld [vmem:[%s10584_s7 + $0x6c0] sm:$0xff]  }
 0xa65   :  { %7702 = vrot.lane.b32.xlu0 %v7701_v63, %s8320_s3  ;;  %3521 = vrot.lane.b32.xlu1 %v3520_v42, %s8320_s3  ;;  %v7957_v63 = vld [vmem:[%s10584_s7 + $0x6b0] sm:$0xff]   ;;  %v7958_v42 = vld [vmem:[%s10584_s7 + $0x6b8] sm:$0xff]  }
 0xacf   :  { %v7683_v8 = vpop.permute.xlu0 %7682  ;;  %v7688_v7 = vpop.permute.xlu1 %7687 }
 0xad0   :  { %v7685_v5 = vunpack.i.h.bf16 %v7683_v8  ;;  %v7684_v11 = vunpack.i.l.bf16 %v7683_v8  ;;  %v7690_v10 = vunpack.i.h.bf16 %v7688_v7  ;;  %v7689_v19 = vunpack.i.l.bf16 %v7688_v7  ;;  %v7961_v8 = vld [vmem:[%s10584_s7 + $0x6d0] sm:$0xff]   ;;  %v7962_v7 = vld [vmem:[%s10584_s7 + $0x6d8] sm:$0xff]  }
 0xad2   :  { %v3527_v39 = vsel %vm364_vm9, %v3451_v34, %v7689_v19  ;;  %v3530_v16 = vsel %vm364_vm9, %v3475_v38, %v7684_v11  ;;  %v3531_v52 = vsel %vm364_vm9, %v3477_v22, %v7685_v5  ;;  %v3481_v34 = vsel %vm61_vm0, %v3478_v0, %v3480_v21 }
 0xad3   :  { %v6899_v53 = vpack.c.bf16 %v3527_v39, %v7690_v10  ;;  %v7693_v51 = vpop.permute.xlu0 %7692  ;;  %v7698_v24 = vpop.permute.xlu1 %7697  ;;  %v3538_v23 = vpack.c.bf16 %v3531_v52, %v3530_v16  ;;  %v3542_v46 = vpack.c.bf16 %v3481_v34, %v3479_v32  ;;  %v3524_v5 = vsel %vm61_vm0, %v3512_v54, %v8786_v29  ;;  %v6852_v16 = vld [vmem:[%s10585_s8 + $0x4] ss:$0 sm:$0xff] }
 0xad4   :  { %v7695_v28 = vunpack.i.h.bf16 %v7693_v51  ;;  %v7694_v31 = vunpack.i.l.bf16 %v7693_v51  ;;  %v7699_v27 = vunpack.i.l.bf16 %v7698_v24  ;;  %v7700_v41 = vunpack.i.h.bf16 %v7698_v24 }
 0xad5   :  { %3856 = vmatprep.mubr.bf16.mxu1 %v3538_v23  ;;  %v3547_v11 = vpack.c.bf16 %v3524_v5, %v3513_v37  ;;  %v7974_v5 = vld [vmem:[%s10584_s7 + $0x6f8] sm:$0xff]  }
 0xad6   :  { %v3528_v4 = vsel %vm364_vm9, %v9760_v60, %v7699_v27  ;;  %6900 = vmatmul.mubr.msk.bf16.vlgmr.msra.gmra.mrb[52].mxu1 %vm8800_vm13, %v6899_v53  ;;  %v3532_v33 = vsel %vm364_vm9, %v3479_v32, %v7694_v31  ;;  %v3533_v36 = vsel %vm364_vm9, %v3481_v34, %v7695_v28  ;;  %v3529_v58 = vsel %vm364_vm9, %v9764_v25, %v7700_v41  ;;  %v7954_v25 = vld [vmem:[%s10584_s7 + $0x698] sm:$0xff]  }
 0xad7   :  { %v3539_v43 = vpack.c.bf16 %v3528_v4, %v3527_v39  ;;  %3923 = vmatpush1.bf16.msra.mxu1 %v7950_v35  ;;  %v7703_v44 = vpop.permute.xlu0 %7702  ;;  %v3543_v45 = vpack.c.bf16 %v3533_v36, %v3532_v33  ;;  %v3540_v47 = vpack.c.bf16 %v3532_v33, %v3531_v52  ;;  %v3541_v40 = vpack.c.bf16 %v3529_v58, %v3528_v4  ;;  %v3522_v10 = vpop.permute.xlu1 %3521 }
 0xad8   :  { %v7704_v18 = vunpack.i.l.bf16 %v7703_v44  ;;  %3924 = vmatprep.subr.bf16.mxu1 %v8319_v30  ;;  %v7705_v60 = vunpack.i.h.bf16 %v7703_v44  ;;  %v3536_v19 = vsel %vm364_vm9, %v9793_v2, %v3522_v10  ;;  %v7980_v10 = vld [vmem:[%s10584_s7 + $0x778] sm:$0xff]  }
 0xad9   :  { %3864 = vmatprep.mubr.bf16.mxu1 %v3543_v45  ;;  %3905 = vmatprep.mubr.bf16.mxu0 %v3540_v47 }
 0xada   :  { %3906 = vmatmul.mubr.bf16.vlgmr.msra.gmra.mrb[56].mxu0 %v3539_v43  ;;  %v3535_v17 = vsel %vm364_vm9, %v3513_v37, %v7704_v18  ;;  %v3534_v3 = vsel %vm364_vm9, %v9767_v26, %v7705_v60  ;;  %v7956_v26 = vld [vmem:[%s10584_s7 + $0x6a8] sm:$0xff]   ;;  %v7963_v60 = vld [vmem:[%s10584_s7 + $0x720] sm:$0xff]  }
 0xadb   :  { %3925 = vmatpush1.bf16.msra.mxu1 %v7952_v13  ;;  %v3545_v1 = vpack.c.bf16 %v3535_v17, %v3533_v36  ;;  %v3544_v57 = vpack.c.bf16 %v3534_v3, %v3529_v58  ;;  %v3546_v38 = vpack.c.bf16 %v3536_v19, %v3534_v3  ;;  %v7964_v37 = vld [vmem:[%s10584_s7 + $0x6e0] sm:$0xff]   ;;  %v7965_v58 = vld [vmem:[%s10584_s7 + $0x728] sm:$0xff]   ;;  %7375 = vmatprep.subr.bf16.mxu0 %v7963_v60 }
 0xadc   :  { %3926 = vmatprep.subr.bf16.mxu1 %v8319_v30  ;;  %7376 = vmatpush3.bf16.msra.mxu0 %v7964_v37  ;;  %v7983_v19 = vld [vmem:[%s10584_s7 + $0x7c0] sm:$0xff]  }
 0xadd   :  { %3913 = vmatprep.mubr.bf16.mxu0 %v3545_v1  ;;  %v7967_v1 = vld [vmem:[%s10584_s7 + $0x7a0] sm:$0xff]   ;;  %7377 = vmatprep.subr.bf16.mxu0 %v7965_v58 }
 0xade   :  { %3865 = vmatmul.mubr.bf16.gmra.mrb[56].mxu1 %v3541_v40 }
 0xadf   :  { %3927 = vmatpush1.bf16.msra.mxu1 %v7953_v55  ;;  %6901 = vmatprep.mubr.msk.bf16.mxu1 %vm364_vm9, %v3542_v46  ;;  %v7968_v55 = vld [vmem:[%s10584_s7 + $0x760] sm:$0xff]  }
 0xae0   :  { %3928 = vmatprep.subr.bf16.mxu1 %v8319_v30 }
 0xae2   :  { %3914 = vmatmul.mubr.bf16.gmra.mrb[60].mxu0 %v3544_v57  ;;  %v7966_v57 = vld [vmem:[%s10584_s7 + $0x6e8] sm:$0xff]  }
 0xae3   :  { %3929 = vmatpush1.bf16.msra.mxu1 %v7954_v25  ;;  %v7971_v25 = vld [vmem:[%s10584_s7 + $0x7a8] sm:$0xff]   ;;  %7378 = vmatpush3.bf16.msra.mxu0 %v7966_v57 }
 0xae4   :  { %3930 = vmatprep.subr.bf16.mxu1 %v8319_v30 }
 0xae7   :  { %3931 = vmatpush1.bf16.msra.mxu1 %v7955_v61 }
 0xae8   :  { %3932 = vmatprep.subr.bf16.mxu1 %v8319_v30 }
 0xaeb   :  { %3933 = vmatpush1.bf16.msra.mxu1 %v7956_v26  ;;  %v7969_v26 = vld [vmem:[%s10584_s7 + $0x730] sm:$0xff]  }
 0xaec   :  { %3934 = vmatprep.subr.bf16.mxu1 %v8319_v30  ;;  %7379 = vmatprep.subr.bf16.mxu0 %v7969_v26 }
 0xaef   :  { %3935 = vmatpush1.bf16.msra.mxu1 %v7957_v63  ;;  %v7972_v63 = vld [vmem:[%s10584_s7 + $0x768] sm:$0xff]  }
 0xaf0   :  { %3936 = vmatprep.subr.bf16.mxu1 %v8319_v30 }
 0xaf3   :  { %3937 = vmatpush1.bf16.msra.mxu1 %v7958_v42  ;;  %v7975_v42 = vld [vmem:[%s10584_s7 + $0x7b0] sm:$0xff]  }
 0xaf4   :  { %3938 = vmatprep.subr.bf16.mxu1 %v8319_v30 }
 0xaf7   :  { %3939 = vmatpush1.bf16.msra.mxu1 %v7959_v6  ;;  %v7970_v6 = vld [vmem:[%s10584_s7 + $0x6f0] sm:$0xff]  }
 0xaf8   :  { %3940 = vmatprep.subr.bf16.mxu1 %v8319_v30  ;;  %7380 = vmatpush3.bf16.msra.mxu0 %v7970_v6 }
 0xafb   :  { %3941 = vmatpush1.bf16.msra.mxu1 %v7960_v56  ;;  %v7973_v56 = vld [vmem:[%s10584_s7 + $0x738] sm:$0xff]  }
 0xafc   :  { %3942 = vmatprep.subr.bf16.mxu1 %v8319_v30  ;;  %7381 = vmatprep.subr.bf16.mxu0 %v7973_v56 }
 0xafd   :  { %7382 = vmatpush3.bf16.msra.mxu0 %v7974_v5 }
 0xaff   :  { %3943 = vmatpush1.bf16.msra.mxu1 %v7961_v8  ;;  %v7976_v8 = vld [vmem:[%s10584_s7 + $0x770] sm:$0xff]  }
 0xb00   :  { %3944 = vmatprep.subr.bf16.mxu1 %v8319_v30 }
 0xb03   :  { %3945 = vmatpush1.bf16.msra.mxu1 %v7962_v7  ;;  %v7979_v7 = vld [vmem:[%s10584_s7 + $0x7b8] sm:$0xff]  }
 0xb04   :  { %7403 = vmatprep.subr.bf16.mxu1 %v7967_v1 }
 0xb06   :  { %3955 = vmatmul.mubr.bf16.vlgmr.msra.gmra.mrb[60].mxu1 %v3541_v40 }
 0xb07   :  { %6902 = vmatprep.mubr.msk.bf16.mxu1 %vm364_vm9, %v3547_v11  ;;  %7404 = vmatpush3.bf16.msra.mxu1 %v7968_v55  ;;  %v7977_v11 = vld [vmem:[%s10584_s7 + $0x740] sm:$0xff]  }
 0xb08   :  { %7405 = vmatprep.subr.bf16.mxu1 %v7971_v25  ;;  %7383 = vmatprep.subr.bf16.mxu0 %v7977_v11 }
 0xb0b   :  { %7406 = vmatpush3.bf16.msra.mxu1 %v7972_v63 }
 0xb0c   :  { %7407 = vmatprep.subr.bf16.mxu1 %v7975_v42 }
 0xb0e   :  { %3963 = vmatmul.mubr.bf16.gmra.mrb[64].mxu1 %v3546_v38  ;;  %v7978_v38 = vld [vmem:[%s10584_s7 + $0x700] sm:$0xff]  }
 0xb0f   :  { %7408 = vmatpush3.bf16.msra.mxu1 %v7976_v8  ;;  %7384 = vmatpush3.bf16.msra.mxu0 %v7978_v38 }
 0xb10   :  { %7409 = vmatprep.subr.bf16.mxu1 %v7979_v7 }
 0xb13   :  { %7410 = vmatpush3.bf16.msra.mxu1 %v7980_v10 }
 0xb14   :  { %7411 = vmatprep.subr.bf16.mxu1 %v7983_v19 }
 0xba9   :  { %v7335_v22 = vpop.f32.mrb[52].mxu1 }
 0xbaa   :  { %v7336_v0 = vpop.f32.mrb[53].mxu1 }
 0xbab   :  { %v7337_v21 = vadd.f32 %v7336_v0, %v7335_v22  ;;  %v7338_v39 = vpop.f32.mrb[54].mxu1  ;;  %v7981_v22 = vld [vmem:[%s10584_s7 + $0x748] sm:$0xff]   ;;  %v7984_v0 = vld [vmem:[%s10584_s7 + $0x780] sm:$0xff]  }
 0xbac   :  { %v7339_v52 = vpop.f32.mrb[55].mxu1  ;;  %7385 = vmatprep.subr.bf16.mxu0 %v7981_v22  ;;  %7412 = vmatpush3.bf16.msra.mxu1 %v7984_v0 }
 0xbad   :  { %v7340_v53 = vadd.f32 %v7339_v52, %v7338_v39  ;;  %v7363_v51 = vpop.f32.mrb[56].mxu0  ;;  %v3859_v23 = vadd.f32 %v7337_v21, %v6852_v16  ;;  %v7987_v21 = vld [vmem:[%s10584_s7 + $0x7c8] sm:$0xff]  }
 0xbae   :  { %v7364_v24 = vpop.f32.mrb[57].mxu0  ;;  %v7982_v39 = vld [vmem:[%s10584_s7 + $0x708] sm:$0xff]   ;;  %7413 = vmatprep.subr.bf16.mxu1 %v7987_v21 }
 0xbaf   :  { %v7365_v35 = vadd.f32 %v7364_v24, %v7363_v51  ;;  %v7366_v28 = vpop.f32.mrb[58].mxu0  ;;  %v3862_v27 = vadd.f32 %v7340_v53, %v6852_v16  ;;  %v7988_v52 = vld [vmem:[%s10584_s7 + $0x788] sm:$0xff]   ;;  %7386 = vmatpush3.bf16.msra.mxu0 %v7982_v39  ;;  %v7986_v53 = vld [vmem:[%s10584_s7 + $0x710] sm:$0xff]  }
 0xbb0   :  { %v7367_v31 = vpop.f32.mrb[59].mxu0  ;;  %7414 = vmatpush3.bf16.msra.mxu1 %v7988_v52 }
 0xbb1   :  { %v7368_v2 = vadd.f32 %v7367_v31, %v7366_v28  ;;  %v7341_v41 = vpop.f32.mrb[56].mxu1  ;;  %v9887_v32 = vadd.f32 %v7365_v35, %v3859_v23 }
 0xbb2   :  { %v7342_v34 = vpop.f32.mrb[57].mxu1 }
 0xbb3   :  { %v7343_v54 = vadd.f32 %v7342_v34, %v7341_v41  ;;  %v7344_v4 = vpop.f32.mrb[58].mxu1  ;;  %v9889_v33 = vadd.f32 %v7368_v2, %v3862_v27 }
 0xbb4   :  { %v7345_v36 = vpop.f32.mrb[59].mxu1 }
 0xbb5   :  { %v7346_v43 = vadd.f32 %v7345_v36, %v7344_v4  ;;  %v7369_v44 = vpop.f32.mrb[60].mxu0  ;;  %v3867_v47 = vadd.f32 %v7343_v54, %v6852_v16 }
 0xbb6   :  { %v7370_v45 = vpop.f32.mrb[61].mxu0 }
 0xbb7   :  { %v7371_v13 = vadd.f32 %v7370_v45, %v7369_v44  ;;  %v7372_v18 = vpop.f32.mrb[62].mxu0  ;;  %v3870_v40 = vadd.f32 %v7346_v43, %v6852_v16  ;;  %v7985_v16 = vld [vmem:[%s10584_s7 + $0x750] sm:$0xff]  }
 0xbb8   :  { %v7373_v17 = vpop.f32.mrb[63].mxu0  ;;  %7387 = vmatprep.subr.bf16.mxu0 %v7985_v16  ;;  %v6903_v16 = vld [vmem:[%s10582_s5 + $0x5] sm:$0x1] }
 0xbb9   :  { %v7374_v3 = vadd.f32 %v7373_v17, %v7372_v18  ;;  %v3916_v46 = vadd.f32 %v7371_v13, %v3867_v47  ;;  %7388 = vmatpush3.bf16.msra.mxu0 %v7986_v53 }
 0xbbb   :  { %v3919_v61 = vadd.f32 %v7374_v3, %v3870_v40 }
 0xbd9   :  { %v3956_v51 = vpop.f32.mrb[60].mxu1 }
 0xbda   :  { %v3957_v24 = vadd.f32 %v3956_v51, %v9887_v32  ;;  %v3958_v23 = vpop.f32.mrb[61].mxu1 }
 0xbdb   :  { %v3959_v35 = vpop.f32.mrb[62].mxu1 }
 0xbdc   :  { %v3960_v28 = vadd.f32 %v3959_v35, %v9889_v33  ;;  %v3961_v31 = vpop.f32.mrb[63].mxu1  ;;  %v3975_v27 = vsel %vm364_vm9, %v3957_v24, 0.0 }
 0xbde   :  { %v3976_v2 = vsel %vm364_vm9, %v3960_v28, 0.0 }
 0xbdf   :  { %v3977_v41 = vadd.f32 %v3976_v2, %v3975_v27 }
 0xbe1   :  { %v3964_v34 = vpop.f32.mrb[64].mxu1 }
 0xbe2   :  { %v3965_v54 = vadd.f32 %v3964_v34, %v3916_v46  ;;  %v3966_v4 = vpop.f32.mrb[65].mxu1 }
 0xbe3   :  { %v3967_v36 = vpop.f32.mrb[66].mxu1 }
 0xbe4   :  { %v3978_v43 = vsel %vm364_vm9, %v3965_v54, 0.0  ;;  %v3968_v44 = vadd.f32 %v3967_v36, %v3919_v61  ;;  %v3969_v45 = vpop.f32.mrb[67].mxu1 }
 0xbe5   :  { %v3979_v47 = vadd.f32 %v3978_v43, %v3977_v41  ;;  %v7990_v45 = vld [vmem:[%s10584_s7 + $0x718] sm:$0xff]  }
 0xbe6   :  { %v3980_v32 = vsel %vm364_vm9, %v3968_v44, 0.0 }
 0xbe7   :  { %v3981_v13 = vadd.f32 %v3980_v32, %v3979_v47  ;;  %v7991_v47 = vld [vmem:[%s10584_s7 + $0x7d0] sm:$0xff]  }
 0xbe8   :  { %v7992_v32 = vld [vmem:[%s10584_s7 + $0x790] sm:$0xff]   ;;  %7415 = vmatprep.subr.bf16.mxu1 %v7991_v47 }
 0xbe9   :  { %v3982_v18 = vrot.slane %v3981_v13, 4  ;;  %7416 = vmatpush3.bf16.msra.mxu1 %v7992_v32 }
 0xbeb   :  { %v3983_v33 = vadd.f32 %v3982_v18, %v3981_v13 }
 0xbed   :  { %v3984_v60 = vrot.slane %v3983_v33, 2 }
 0xbef   :  { %v3985_v37 = vadd.f32 %v3984_v60, %v3983_v33 }
 0xbf1   :  { %v3986_v58 = vrot.slane %v3985_v37, 1 }
 0xbf3   :  { %v3987_v17 = vadd.f32 %v3986_v58, %v3985_v37 }
 0xbf5   :  { %v3988_v1 = vmul.f32 0.03125, %v3987_v17 }
 0xbf7   :  { %v3989_v55 = vsub.f32 %v3957_v24, %v3988_v1  ;;  %v3990_v40 = vsub.f32 %v3960_v28, %v3988_v1  ;;  %v3991_v3 = vsub.f32 %v3965_v54, %v3988_v1  ;;  %v3992_v46 = vsub.f32 %v3968_v44, %v3988_v1  ;;  %v6905_v24 = vld [vmem:[%s10583_s6 + $0x5] ss:$0 sm:$0xff]  ;;  %v7989_v44 = vld [vmem:[%s10584_s7 + $0x758] sm:$0xff]  }
 0xbf8   :  { %7389 = vmatprep.subr.bf16.mxu0 %v7989_v44  ;;  %v7993_v1 = vld [vmem:[%s10584_s7 + $0x7d8] sm:$0xff]  }
 0xbf9   :  { %v3993_v25 = vmul.f32 %v3989_v55, %v3989_v55  ;;  %v3994_v57 = vmul.f32 %v3990_v40, %v3990_v40  ;;  %v3995_v26 = vmul.f32 %v3991_v3, %v3991_v3  ;;  %v3996_v61 = vmul.f32 %v3992_v46, %v3992_v46  ;;  %7390 = vmatpush3.bf16.msra.mxu0 %v7990_v45 }
 0xbfa   :  { %4614 = vmatprep.subr.bf16.mxu0 %v8319_v30  ;;  %7417 = vmatprep.subr.bf16.mxu1 %v7993_v1 }
 0xbfb   :  { %v3997_v63 = vsel %vm364_vm9, %v3993_v25, 0.0  ;;  %v3998_v42 = vsel %vm364_vm9, %v3994_v57, 0.0  ;;  %v4000_v56 = vsel %vm364_vm9, %v3995_v26, 0.0  ;;  %v4002_v7 = vsel %vm364_vm9, %v3996_v61, 0.0 }
 0xbfc   :  { %v3999_v6 = vadd.f32 %v3998_v42, %v3997_v63 }
 0xbfe   :  { %v4001_v8 = vadd.f32 %v4000_v56, %v3999_v6 }
 0xc00   :  { %v4003_v5 = vadd.f32 %v4002_v7, %v4001_v8 }
 0xc02   :  { %v4004_v11 = vrot.slane %v4003_v5, 4 }
 0xc04   :  { %v4005_v10 = vadd.f32 %v4004_v11, %v4003_v5 }
 0xc06   :  { %v4006_v19 = vrot.slane %v4005_v10, 2 }
 0xc08   :  { %v4007_v38 = vadd.f32 %v4006_v19, %v4005_v10 }
 0xc0a   :  { %v4008_v22 = vrot.slane %v4007_v38, 1 }
 0xc0c   :  { %v4009_v0 = vadd.f32 %v4008_v22, %v4007_v38 }
 0xc0e   :  { %v4010_v21 = vmul.f32 0.03125, %v4009_v0 }
 0xc10   :  { %v4011_v39 = vadd.f32 1e-05, %v4010_v21 }
 0xc12   :  { %8017 = vrsqrt.f32 %v4011_v39 }
 0xc1c   :  { %v8018_v52 = vpop.eup %8017 }
 0xc1d   :  { %v4013_v53 = vmul.f32 %v8018_v52, %v6903_v16 }
 0xc1f   :  { %v4017_v51 = vrot.slane %v4013_v53, %v8704_v20 }
 0xc21   :  { %v4018_v23 = vmul.f32 %v4017_v51, %v3989_v55  ;;  %v4019_v35 = vmul.f32 %v4017_v51, %v3990_v40  ;;  %v4020_v28 = vmul.f32 %v4017_v51, %v3991_v3  ;;  %v4021_v31 = vmul.f32 %v4017_v51, %v3992_v46  ;;  %v7995_v55 = vld [vmem:[%s10584_s7 + $0x798] sm:$0xff]  }
 0xc22   :  { %7418 = vmatpush3.bf16.msra.mxu1 %v7995_v55 }
 0xc23   :  { %v4028_v27 = vadd.f32 %v6905_v24, %v4018_v23  ;;  %v4029_v2 = vadd.f32 %v6905_v24, %v4019_v35  ;;  %v4030_v41 = vadd.f32 %v6905_v24, %v4020_v28  ;;  %v4031_v34 = vadd.f32 %v6905_v24, %v4021_v31 }
 0xc25   :  { %v4032_v54 = vmax.f32 %v4028_v27, 0.0  ;;  %v4033_v4 = vmax.f32 %v4029_v2, 0.0  ;;  %v4034_v36 = vmax.f32 %v4030_v41, 0.0  ;;  %v4035_v43 = vmax.f32 %v4031_v34, 0.0 }
 0xc27   :  { %v4132_v13 = vrot.slane %v4033_v4, 6  ;;  %v4134_v18 = vrot.slane %v4034_v36, 6  ;;  %v4136_v33 = vrot.slane %v4035_v43, 6  ;;  %v4131_v60 = vrot.slane %v4032_v54, 6 }
 0xc29   :  { %v9999_v37 = vsel %vm121_vm2, %v4134_v18, %v4136_v33  ;;  %v10002_v58 = vsel %vm121_vm2, %v4131_v60, %v4132_v13  ;;  %v4143_v17 = vsel %vm121_vm2, 0.0, %v4131_v60  ;;  %v10015_v57 = vsel %vm121_vm2, %v4136_v33, 0.0  ;;  %v7994_v33 = vld [vmem:[%s10584_s7 + $0x7e0] sm:$0xff]  }
 0xc2a   :  { %v4178_v40 = vrot.slane %v4143_v17, 6  ;;  %v4180_v3 = vrot.slane %v10002_v58, 6  ;;  %v4146_v46 = vrot.slane %v4143_v17, 2  ;;  %v4148_v25 = vrot.slane %v10002_v58, 2 }
 0xc2b   :  { %v10018_v26 = vsel %vm121_vm2, %v4132_v13, %v4134_v18  ;;  %v4184_v61 = vrot.slane %v9999_v37, 6  ;;  %v4152_v63 = vrot.slane %v9999_v37, 2  ;;  %v4199_v19 = vrot.slane %v10015_v57, 2 }
 0xc2c   :  { %v4179_v42 = vsel %vm121_vm2, %v8720_v50, %v4178_v40  ;;  %v4181_v6 = vsel %vm121_vm2, %v4178_v40, %v4180_v3  ;;  %v4147_v56 = vsel %vm78_vm1, %v8717_v49, %v4146_v46  ;;  %v4149_v8 = vsel %vm78_vm1, %v4146_v46, %v4148_v25 }
 0xc2d   :  { %v7706_v7 = vpack.i.bf16 %v4181_v6, %v4179_v42  ;;  %v7711_v5 = vpack.i.bf16 %v4147_v56, %v4149_v8  ;;  %v4182_v11 = vrot.slane %v10018_v26, 6  ;;  %v4150_v10 = vrot.slane %v10018_v26, 2 }
 0xc2e   :  { %v4207_v38 = vrot.slane %v10015_v57, 6  ;;  %v4200_v52 = vsel %vm78_vm1, %v4152_v63, %v4199_v19  ;;  %v4212_v24 = vsel %vm78_vm1, %v4199_v19, %v8717_v49  ;;  %v4166_v23 = vrot.slane %v4143_v17, 4 }
 0xc2f   :  { %7707 = vrot.lane.b32.xlu0 %v7706_v7, %s8320_s3  ;;  %7712 = vrot.lane.b32.xlu1 %v7711_v5, %s8320_s3  ;;  %v4183_v50 = vsel %vm121_vm2, %v4180_v3, %v4182_v11  ;;  %v4185_v22 = vsel %vm121_vm2, %v4182_v11, %v4184_v61  ;;  %v4151_v0 = vsel %vm78_vm1, %v4148_v25, %v4150_v10  ;;  %v4168_v35 = vrot.slane %v10002_v58, 4  ;;  %v7996_v7 = vld [vmem:[%s10584_s7 + $0x7e8] sm:$0xff]  }
 0xc30   :  { %v4153_v21 = vsel %vm78_vm1, %v4150_v10, %v4152_v63  ;;  %v7716_v39 = vpack.i.bf16 %v4185_v22, %v4183_v50  ;;  %v4208_v53 = vsel %vm121_vm2, %v4184_v61, %v4207_v38  ;;  %v4167_v54 = vsel %vm61_vm0, %v8786_v29, %v4166_v23  ;;  %v7997_v38 = vld [vmem:[%s10584_s7 + $0x7f0] sm:$0xff]  }
 0xc31   :  { %v7721_v16 = vpack.i.bf16 %v4153_v21, %v4151_v0  ;;  %v7726_v51 = vpack.i.bf16 %v4200_v52, %v4208_v53  ;;  %v4169_v4 = vsel %vm61_vm0, %v4166_v23, %v4168_v35  ;;  %v4170_v49 = vrot.slane %v10018_v26, 4  ;;  %v8002_v52 = vld [vmem:[%s10584_s7 + $0x818] sm:$0xff]   ;;  %v8003_v53 = vld [vmem:[%s10584_s7 + $0x820] sm:$0xff]  }
 0xc32   :  { %v4172_v36 = vrot.slane %v9999_v37, 4  ;;  %v4204_v46 = vrot.slane %v10015_v57, 4  ;;  %v8006_v23 = vld [vmem:[%s10584_s7 + $0x838] sm:$0xff]  }
 0xc33   :  { %7717 = vrot.lane.b32.xlu0 %v7716_v39, %s8320_s3  ;;  %7722 = vrot.lane.b32.xlu1 %v7721_v16, %s8320_s3  ;;  %v4171_v3 = vsel %vm61_vm0, %v4168_v35, %v4170_v49  ;;  %v7999_v39 = vld [vmem:[%s10584_s7 + $0x800] sm:$0xff]   ;;  %v8001_v16 = vld [vmem:[%s10584_s7 + $0x810] sm:$0xff]  }
 0xc34   :  { %v4205_v62 = vsel %vm61_vm0, %v4172_v36, %v4204_v46  ;;  %v4216_v35 = vsel %vm61_vm0, %v4204_v46, %v8786_v29 }
 0xc37   :  { %7727 = vrot.lane.b32.xlu0 %v7726_v51, %s8320_s3  ;;  %4213 = vrot.lane.b32.xlu1 %v4212_v24, %s8320_s3  ;;  %v8004_v51 = vld [vmem:[%s10584_s7 + $0x828] sm:$0xff]   ;;  %v8005_v24 = vld [vmem:[%s10584_s7 + $0x830] sm:$0xff]  }
 0xca1   :  { %v7708_v28 = vpop.permute.xlu0 %7707  ;;  %v7713_v31 = vpop.permute.xlu1 %7712 }
 0xca2   :  { %v7710_v27 = vunpack.i.h.bf16 %v7708_v28  ;;  %v7709_v2 = vunpack.i.l.bf16 %v7708_v28  ;;  %v7715_v41 = vunpack.i.h.bf16 %v7713_v31  ;;  %v7714_v34 = vunpack.i.l.bf16 %v7713_v31 }
 0xca3   :  { %v4239_v28 = vpack.c.bf16 %v4216_v35, %v4205_v62 }
 0xca4   :  { %v4219_v43 = vsel %vm364_vm9, %v4143_v17, %v7714_v34  ;;  %v4222_v44 = vsel %vm364_vm9, %v4167_v54, %v7709_v2  ;;  %v4223_v45 = vsel %vm364_vm9, %v4169_v4, %v7710_v27  ;;  %v4173_v17 = vsel %vm61_vm0, %v4170_v49, %v4172_v36 }
 0xca5   :  { %v7042_v47 = vpack.c.bf16 %v4219_v43, %v7715_v41  ;;  %v7718_v32 = vpop.permute.xlu0 %7717  ;;  %v7723_v13 = vpop.permute.xlu1 %7722  ;;  %v4230_v18 = vpack.c.bf16 %v4223_v45, %v4222_v44  ;;  %v4234_v0 = vpack.c.bf16 %v4173_v17, %v4171_v3 }
 0xca6   :  { %v7720_v60 = vunpack.i.h.bf16 %v7718_v32  ;;  %v7719_v1 = vunpack.i.l.bf16 %v7718_v32  ;;  %v7724_v55 = vunpack.i.l.bf16 %v7723_v13  ;;  %v7725_v40 = vunpack.i.h.bf16 %v7723_v13 }
 0xca7   :  { %4548 = vmatprep.mubr.bf16.mxu0 %v4230_v18 }
 0xca8   :  { %v4220_v25 = vsel %vm364_vm9, %v10002_v58, %v7724_v55  ;;  %7043 = vmatmul.mubr.msk.bf16.vlgmr.msra.gmra.mrb[64].mxu0 %vm8800_vm13, %v7042_v47  ;;  %v4224_v61 = vsel %vm364_vm9, %v4171_v3, %v7719_v1  ;;  %v4225_v63 = vsel %vm364_vm9, %v4173_v17, %v7720_v60  ;;  %v4221_v11 = vsel %vm364_vm9, %v10018_v26, %v7725_v40  ;;  %v7998_v26 = vld [vmem:[%s10584_s7 + $0x7f8] sm:$0xff]  }
 0xca9   :  { %v4231_v42 = vpack.c.bf16 %v4220_v25, %v4219_v43  ;;  %4615 = vmatpush1.bf16.msra.mxu0 %v7994_v33  ;;  %v7728_v6 = vpop.permute.xlu0 %7727  ;;  %v4235_v56 = vpack.c.bf16 %v4225_v63, %v4224_v61  ;;  %v4232_v8 = vpack.c.bf16 %v4224_v61, %v4223_v45  ;;  %v4233_v50 = vpack.c.bf16 %v4221_v11, %v4220_v25  ;;  %v4214_v31 = vpop.permute.xlu1 %4213 }
 0xcaa   :  { %v7729_v5 = vunpack.i.l.bf16 %v7728_v6  ;;  %4616 = vmatprep.subr.bf16.mxu0 %v8319_v30  ;;  %v7730_v58 = vunpack.i.h.bf16 %v7728_v6  ;;  %v4228_v27 = vsel %vm364_vm9, %v10015_v57, %v4214_v31 }
 0xcab   :  { %4556 = vmatprep.mubr.bf16.mxu0 %v4235_v56  ;;  %4597 = vmatprep.mubr.bf16.mxu1 %v4232_v8 }
 0xcac   :  { %4598 = vmatmul.mubr.bf16.vlgmr.msra.gmra.mrb[68].mxu1 %v4231_v42  ;;  %v4227_v10 = vsel %vm364_vm9, %v4205_v62, %v7729_v5  ;;  %v4226_v22 = vsel %vm364_vm9, %v9999_v37, %v7730_v58  ;;  %v8000_v37 = vld [vmem:[%s10584_s7 + $0x808] sm:$0xff]  }
 0xcad   :  { %4617 = vmatpush1.bf16.msra.mxu0 %v7996_v7  ;;  %v4237_v19 = vpack.c.bf16 %v4227_v10, %v4225_v63  ;;  %v4236_v21 = vpack.c.bf16 %v4226_v22, %v4221_v11  ;;  %v4238_v2 = vpack.c.bf16 %v4228_v27, %v4226_v22 }
 0xcae   :  { %4618 = vmatprep.subr.bf16.mxu0 %v8319_v30 }
 0xcaf   :  { %4605 = vmatprep.mubr.bf16.mxu1 %v4237_v19 }
 0xcb0   :  { %4557 = vmatmul.mubr.bf16.gmra.mrb[68].mxu0 %v4233_v50 }
 0xcb1   :  { %4619 = vmatpush1.bf16.msra.mxu0 %v7997_v38  ;;  %7044 = vmatprep.mubr.msk.bf16.mxu0 %vm364_vm9, %v4234_v0 }
 0xcb2   :  { %4620 = vmatprep.subr.bf16.mxu0 %v8319_v30 }
 0xcb4   :  { %4606 = vmatmul.mubr.bf16.gmra.mrb[72].mxu1 %v4236_v21 }
 0xcb5   :  { %4621 = vmatpush1.bf16.msra.mxu0 %v7998_v26 }
 0xcb6   :  { %4622 = vmatprep.subr.bf16.mxu0 %v8319_v30 }
 0xcb9   :  { %4623 = vmatpush1.bf16.msra.mxu0 %v7999_v39 }
 0xcba   :  { %4624 = vmatprep.subr.bf16.mxu0 %v8319_v30 }
 0xcbd   :  { %4625 = vmatpush1.bf16.msra.mxu0 %v8000_v37 }
 0xcbe   :  { %4626 = vmatprep.subr.bf16.mxu0 %v8319_v30 }
 0xcc1   :  { %4627 = vmatpush1.bf16.msra.mxu0 %v8001_v16 }
 0xcc2   :  { %4628 = vmatprep.subr.bf16.mxu0 %v8319_v30 }
 0xcc5   :  { %4629 = vmatpush1.bf16.msra.mxu0 %v8002_v52 }
 0xcc6   :  { %4630 = vmatprep.subr.bf16.mxu0 %v8319_v30 }
 0xcc9   :  { %4631 = vmatpush1.bf16.msra.mxu0 %v8003_v53 }
 0xcca   :  { %4632 = vmatprep.subr.bf16.mxu0 %v8319_v30 }
 0xccd   :  { %4633 = vmatpush1.bf16.msra.mxu0 %v8004_v51 }
 0xcce   :  { %4634 = vmatprep.subr.bf16.mxu0 %v8319_v30 }
 0xcd1   :  { %4635 = vmatpush1.bf16.msra.mxu0 %v8005_v24 }
 0xcd2   :  { %4636 = vmatprep.subr.bf16.mxu0 %v8319_v30  ;;  %v6995_v30 = vld [vmem:[%s10585_s8 + $0x5] ss:$0 sm:$0xff]  ;;  %s10138_s8 = smov 0  }
 0xcd5   :  { %4637 = vmatpush1.bf16.msra.mxu0 %v8006_v23 }
 0xcd8   :  { %4647 = vmatmul.mubr.bf16.vlgmr.msra.gmra.mrb[72].mxu0 %v4233_v50 }
 0xcd9   :  { %7045 = vmatprep.mubr.msk.bf16.mxu0 %vm364_vm9, %v4239_v28 }
 0xce0   :  { %4655 = vmatmul.mubr.bf16.gmra.mrb[76].mxu0 %v4238_v2 }
 0xd7b   :  { %v7391_v41 = vpop.f32.mrb[64].mxu0 }
 0xd7c   :  { %v7392_v34 = vpop.f32.mrb[65].mxu0 }
 0xd7d   :  { %v7393_v54 = vadd.f32 %v7392_v34, %v7391_v41  ;;  %v7394_v4 = vpop.f32.mrb[66].mxu0 }
 0xd7e   :  { %v7395_v29 = vpop.f32.mrb[67].mxu0 }
 0xd7f   :  { %v7396_v49 = vadd.f32 %v7395_v29, %v7394_v4  ;;  %v7419_v36 = vpop.f32.mrb[68].mxu1  ;;  %v4551_v44 = vadd.f32 %v7393_v54, %v6995_v30 }
 0xd80   :  { %v7420_v43 = vpop.f32.mrb[69].mxu1 }
 0xd81   :  { %v7421_v45 = vadd.f32 %v7420_v43, %v7419_v36  ;;  %v7422_v47 = vpop.f32.mrb[70].mxu1  ;;  %v4554_v13 = vadd.f32 %v7396_v49, %v6995_v30 }
 0xd82   :  { %v7423_v32 = vpop.f32.mrb[71].mxu1 }
 0xd83   :  { %v7424_v57 = vadd.f32 %v7423_v32, %v7422_v47  ;;  %v7397_v18 = vpop.f32.mrb[68].mxu0  ;;  %v4600_v33 = vadd.f32 %v7421_v45, %v4551_v44 }
 0xd84   :  { %v7398_v60 = vpop.f32.mrb[69].mxu0 }
 0xd85   :  { %v7399_v1 = vadd.f32 %v7398_v60, %v7397_v18  ;;  %v7400_v55 = vpop.f32.mrb[70].mxu0  ;;  %v4603_v40 = vadd.f32 %v7424_v57, %v4554_v13 }
 0xd86   :  { %v7401_v3 = vpop.f32.mrb[71].mxu0 }
 0xd87   :  { %v7402_v17 = vadd.f32 %v7401_v3, %v7400_v55  ;;  %v7425_v46 = vpop.f32.mrb[72].mxu1  ;;  %v4559_v61 = vadd.f32 %v7399_v1, %v6995_v30 }
 0xd88   :  { %v7426_v25 = vpop.f32.mrb[73].mxu1 }
 0xd89   :  { %v7427_v63 = vadd.f32 %v7426_v25, %v7425_v46  ;;  %v7428_v42 = vpop.f32.mrb[74].mxu1  ;;  %v4562_v56 = vadd.f32 %v7402_v17, %v6995_v30 }
 0xd8a   :  { %v7429_v6 = vpop.f32.mrb[75].mxu1 }
 0xd8b   :  { %v7430_v8 = vadd.f32 %v7429_v6, %v7428_v42  ;;  %v4608_v7 = vadd.f32 %v7427_v63, %v4559_v61 }
 0xd8d   :  { %v4611_v5 = vadd.f32 %v7430_v8, %v4562_v56 }
 0xdab   :  { %v4648_v58 = vpop.f32.mrb[72].mxu0 }
 0xdac   :  { %v4649_v62 = vadd.f32 %v4648_v58, %v4600_v33  ;;  %v4650_v11 = vpop.f32.mrb[73].mxu0 }
 0xdad   :  { %v4651_v10 = vpop.f32.mrb[74].mxu0 }
 0xdae   :  { %v4663_v19 = vadd.f32 %v4649_v62, %v9714_v12   ;;  %v4652_v38 = vadd.f32 %v4651_v10, %v4603_v40  ;;  %v4653_v50 = vpop.f32.mrb[75].mxu0 }
 0xdb0   :  { %v4664_v22 = vadd.f32 %v4652_v38, %v9711_v59  }
 0xdb3   :  { %v4656_v0 = vpop.f32.mrb[76].mxu0 }
 0xdb4   :  { %v4657_v26 = vadd.f32 %v4656_v0, %v4608_v7  ;;  %v4658_v21 = vpop.f32.mrb[77].mxu0 }
 0xdb5   :  { %v4659_v39 = vpop.f32.mrb[78].mxu0 }
 0xdb6   :  { %v4665_v37 = vadd.f32 %v4657_v26, %v9722_v15   ;;  %v4660_v16 = vadd.f32 %v4659_v39, %v4611_v5  ;;  %v4661_v52 = vpop.f32.mrb[79].mxu0 }
 0xdb8   :  { %v4666_v53 = vadd.f32 %v4660_v16, %v9728_v14  }
 0xdb9 LB: > { %v8325_v59 = vmov 0   ;;  %s7089_s17 = sshll.u32 %s8313_s8, 6  ;;  %v4701_v29 = vpack.c.bf16 %v8305_v22, %v8309_v19  ;;  %s7049_s23 = sshll.u32 %s8313_s8, 1  ;;  %v4710_v55 = vsub.s32 1, %v8698_v9  ;;  %v4702_v56 = vpack.c.bf16 %v8297_v53, %v8301_v37  ;;  %s8313_s8 = sphi %s10138_s8, %s4672_s8   ;;  %v8309_v19 = vphi %v4663_v19, %v6114_v19   ;;  %v8305_v22 = vphi %v4664_v22, %v6116_v22   ;;  %v8301_v37 = vphi %v4665_v37, %v6118_v37   ;;  %v8297_v53 = vphi %v4666_v53, %v10594_v53  }
 0xdba   : > { %4792 = vmatprep.mubr.bf16.mxu0 %v8325_v59  ;;  %4888 = vmatprep.mubr.bf16.mxu1 %v8325_v59  ;;  %s4679_s20 = scalar_lea.vmem %s10586_s9, %s7089_s17  ;;  %s10160_s22 = scalar_lea.vmem %s10587_s10, %s7089_s17 }
 0xdbb   : > { %v8019_v12 = vld [vmem:[%s4679_s20 + $0x4] ss:$8 sps:$4 sm:$0xff]   ;;  %v10163_v15 = vld [vmem:[%s10160_s22] ss:$8 sps:$4 sm:$0xff]   ;;  %v10169_v51 = vld [vmem:[%s10160_s22 + $0x14] ss:$8 sps:$4 sm:$0xff]   ;;  %s4699_s25 = scalar_lea.vmem %s10588_s11, %s7049_s23 }
 0xdbc   : > { %v10166_v14 = vld [vmem:[%s10160_s22 + $0x4] ss:$8 sps:$4 sm:$0xff]   ;;  %4760 = vmatprep.subr.bf16.mxu0 %v8019_v12  ;;  %v10172_v24 = vld [vmem:[%s10160_s22 + $0x10] ss:$8 sps:$4 sm:$0xff]   ;;  %v8033_v23 = vld [vmem:[%s4679_s20] ss:$8 sps:$4 sm:$0xff]  }
 0xdbd   : > { %4856 = vmatprep.subr.bf16.mxu1 %v10166_v14  ;;  %v10176_v35 = vld [vmem:[%s10160_s22 + $0x24] ss:$8 sps:$4 sm:$0xff]   ;;  %v8034_v28 = vld [vmem:[%s4679_s20 + $0x14] ss:$8 sps:$4 sm:$0xff]   ;;  %4761 = vmatpush1.bf16.msra.mxu0 %v8033_v23  ;;  %v8036_v31 = vld [vmem:[%s4679_s20 + $0x10] ss:$8 sps:$4 sm:$0xff]  }
 0xdbe   : > { %4857 = vmatpush1.bf16.msra.mxu1 %v10163_v15  ;;  %4762 = vmatprep.subr.bf16.mxu0 %v8034_v28  ;;  %v8037_v27 = vld [vmem:[%s4679_s20 + $0x24] ss:$8 sps:$4 sm:$0xff]   ;;  %v10181_v2 = vld [vmem:[%s10160_s22 + $0x20] ss:$8 sps:$4 sm:$0xff]   ;;  %v10185_v41 = vld [vmem:[%s10160_s22 + $0x34] ss:$8 sps:$4 sm:$0xff]  }
 0xdbf   : > { %4858 = vmatprep.subr.bf16.mxu1 %v10169_v51  ;;  %v8039_v34 = vld [vmem:[%s4679_s20 + $0x20] ss:$8 sps:$4 sm:$0xff]   ;;  %v8040_v54 = vld [vmem:[%s4679_s20 + $0x34] ss:$8 sps:$4 sm:$0xff]   ;;  %v10189_v4 = vld [vmem:[%s10160_s22 + $0x30] ss:$8 sps:$4 sm:$0xff]  }
 0xdc0   : > { %v8042_v30 = vld [vmem:[%s4679_s20 + $0x30] ss:$8 sps:$4 sm:$0xff]   ;;  %v4700_v49 = vld [vmem:[%s4699_s25] sm:$0x3]  ;;  %s8326_s1 = smov 64   ;;  %s4672_s8 = sadd.s32 1, %s8313_s8  }
 0xdc1   : > { %4763 = vmatpush1.bf16.msra.mxu0 %v8036_v31  ;;  %v10221_v36 = vrot.slane %v4700_v49, %v8704_v20  ;;  %v10232_v3 = vrot.slane %v4700_v49, %v4710_v55  ;;  %p4669_p0 = scmp.ge.s32.totalorder %s4672_s8, 10  }
 0xdc2   : > { %4859 = vmatpush1.bf16.msra.mxu1 %v10172_v24  ;;  %4764 = vmatprep.subr.bf16.mxu0 %v8037_v27  ;;  %vm8327_vm14 = vmmov (%p4669_p0), 0   ;;  %v8245_v9 = vld [vmem:[%s10589_s12 + $0x10] sm:$0xff] (%p4669_p0)   ;;  %vm6210_vm15 = vcmask (%p4669_p0), 9216  }
 0xdc3   : > { %4860 = vmatprep.subr.bf16.mxu1 %v10176_v35 }
 0xdc5   : > { %4765 = vmatpush1.bf16.msra.mxu0 %v8039_v34 }
 0xdc6   : > { %4861 = vmatpush1.bf16.msra.mxu1 %v10181_v2  ;;  %4766 = vmatprep.subr.bf16.mxu0 %v8040_v54 }
 0xdc7   : > { %4862 = vmatprep.subr.bf16.mxu1 %v10185_v41 }
 0xdc9   : > { %4767 = vmatpush1.bf16.msra.mxu0 %v8042_v30 }
 0xdca   : > { %4863 = vmatpush1.bf16.msra.mxu1 %v10189_v4  ;;  %4926 = vmatprep.subr.bf16.mxu0 %v10166_v14 }
 0xdcb   : > { %5006 = vmatprep.subr.bf16.mxu1 %v10166_v14 }
 0xdcc   : > { %7058 = vmatmul.mubr.msk.bf16.vlgmr.msra.gmra.mrb[0].mxu0 %vm364_vm9, %v4701_v29 }
 0xdcd   : > { %4889 = vmatmul.mubr.bf16.vlgmr.msra.gmra.mrb[0].mxu1 %v8325_v59  ;;  %4927 = vmatpush1.bf16.msra.mxu0 %v10163_v15 }
 0xdce   : > { %5007 = vmatpush1.bf16.msra.mxu1 %v10163_v15  ;;  %4802 = vmatprep.mubr.bf16.mxu0 %v8325_v59 }
 0xdcf   : > { %4928 = vmatprep.subr.bf16.mxu0 %v10169_v51  ;;  %5008 = vmatprep.subr.bf16.mxu1 %v10169_v51 }
 0xdd0   : > { %5038 = vmatprep.mubr.bf16.mxu1 %v8325_v59 }
 0xdd1   : > { %4929 = vmatpush1.bf16.msra.mxu0 %v10172_v24 }
 0xdd2   : > { %5009 = vmatpush1.bf16.msra.mxu1 %v10172_v24  ;;  %4930 = vmatprep.subr.bf16.mxu0 %v10176_v35 }
 0xdd3   : > { %5010 = vmatprep.subr.bf16.mxu1 %v10176_v35 }
 0xdd4   : > { %7059 = vmatmul.mubr.msk.bf16.gmra.mrb[4].mxu0 %vm364_vm9, %v4702_v56 }
 0xdd5   : > { %4931 = vmatpush1.bf16.msra.mxu0 %v10181_v2  ;;  %4958 = vmatprep.mubr.bf16.mxu0 %v8325_v59 }
 0xdd6   : > { %5011 = vmatpush1.bf16.msra.mxu1 %v10181_v2  ;;  %4932 = vmatprep.subr.bf16.mxu0 %v10185_v41 }
 0xdd7   : > { %5012 = vmatprep.subr.bf16.mxu1 %v10185_v41 }
 0xdd9   : > { %4933 = vmatpush1.bf16.msra.mxu0 %v10189_v4 }
 0xdda   : > { %5013 = vmatpush1.bf16.msra.mxu1 %v10189_v4  ;;  %5086 = vmatprep.subr.bf16.mxu0 %v10166_v14 }
 0xddb   : > { %5166 = vmatprep.subr.bf16.mxu1 %v10166_v14 }
 0xe9f   : > { %v4794_v44 = vpop.f32.mrb[0].mxu0 }
 0xea0   : > { %v4890_v43 = vpop.f32.mrb[0].mxu1  ;;  %v10224_v47 = vadd.f32 %v4794_v44, %v10221_v36  ;;  %v4796_v32 = vpop.f32.mrb[1].mxu0 }
 0xea1   : > { %v4892_v45 = vpop.f32.mrb[1].mxu1  ;;  %v10226_v57 = vpop.f32.mrb[2].mxu0  ;;  %v10235_v17 = vadd.f32 %v4796_v32, %v10232_v3 }
 0xea2   : > { %v4894_v13 = vpop.f32.mrb[2].mxu1  ;;  %v4897_v33 = vadd.f32 %v4890_v43, %v10224_v47  ;;  %v10229_v60 = vpop.f32.mrb[3].mxu0 }
 0xea3   : > { %v4895_v18 = vpop.f32.mrb[3].mxu1  ;;  %v4898_v46 = vadd.f32 %v4892_v45, %v10235_v17 }
 0xea4   : > { %v4899_v1 = vsub.f32 0.0, %v4897_v33 }
 0xea5   : > { %v4900_v8 = vsub.f32 0.0, %v4898_v46 }
 0xea6   : > { %v4901_v40 = vmul.f32 1.442695, %v4899_v1 }
 0xea7   : > { %v4903_v7 = vmul.f32 1.442695, %v4900_v8  ;;  %v10248_v0 = vpop.f32.mrb[4].mxu0 }
 0xea8   : > { %8043 = vpow2.f32 %v4901_v40  ;;  %v10250_v26 = vpop.f32.mrb[5].mxu0 }
 0xea9   : > { %8045 = vtanh.f32 %v4898_v46  ;;  %v10252_v21 = vpop.f32.mrb[6].mxu0 }
 0xeaa   : > { %v10254_v39 = vpop.f32.mrb[7].mxu0 }
 0xeb2   : > { %v8044_v25 = vpop.eup %8043 }
 0xeb3   : > { %v4905_v61 = vadd.f32 1.0, %v8044_v25  ;;  %v8046_v63 = vpop.eup %8045 }
 0xeb5   : > { %8047 = vrcp.f32 %v4905_v61 }
 0xeb6   : > { %8049 = vpow2.f32 %v4903_v7 }
 0xebf   : > { %v8048_v42 = vpop.eup %8047 }
 0xec0   : > { %v4911_v6 = vmul.f32 %v8048_v42, %v8046_v63  ;;  %v8050_v5 = vpop.eup %8049  ;;  %v4910_v62 = vmul.f32 0.0, %v8048_v42 }
 0xec1   : > { %v4906_v58 = vadd.f32 1.0, %v8050_v5 }
 0xec2   : > { %4913 = vrot.lane.b32.xlu0 %v4911_v6, %s8326_s1 }
 0xec3   : > { %8051 = vrcp.f32 %v4906_v58 }
 0xecd   : > { %v8052_v19 = vpop.eup %8051 }
 0xf34   : > { %v4914_v11 = vpop.permute.xlu0 %4913 }
 0xf35   : > { %v4916_v10 = vadd.f32 %v4914_v11, %v4910_v62 }
 0xf37   : > { %8053 = vtanh.f32 %v4916_v10  ;;  %v4987_v43 = vrot.slane %v4916_v10, 6 }
 0xf41   : > { %v8054_v38 = vpop.eup %8053 }
 0xf42   : > { %v10243_v50 = vmul.f32 %v8054_v38, %v8052_v19 }
 0xf44   : > { %v4919_v22 = vpack.c.bf16 %v10243_v50, %v10243_v50 }
 0xf46   : > { %4921 = vrot.lane.b32.xlu0 %v4919_v22, %s8326_s1 }
 0xfb8   : > { %v4922_v37 = vpop.permute.xlu0 %4921 }
 0xfb9   : > { %7068 = vmatmul.mubr.msk.bf16.vlgmr.msra.gmra.mrb[8].mxu0 %vm364_vm9, %v4922_v37 }
 0xfba   : > { %5087 = vmatpush1.bf16.msra.mxu0 %v10163_v15  ;;  %5118 = vmatprep.mubr.bf16.mxu0 %v8325_v59 }
 0xfbb   : > { %5088 = vmatprep.subr.bf16.mxu0 %v10169_v51 }
 0xfbe   : > { %5089 = vmatpush1.bf16.msra.mxu0 %v10172_v24 }
 0xfbf   : > { %5090 = vmatprep.subr.bf16.mxu0 %v10176_v35 }
 0xfc2   : > { %5091 = vmatpush1.bf16.msra.mxu0 %v10181_v2 }
 0xfc3   : > { %5092 = vmatprep.subr.bf16.mxu0 %v10185_v41 }
 0xfc6   : > { %5093 = vmatpush1.bf16.msra.mxu0 %v10189_v4 }
 0xfc7   : > { %5239 = vmatprep.subr.bf16.mxu0 %v10166_v14 }
0x108c   : > { %v4960_v16 = vpop.f32.mrb[8].mxu0 }
0x108d   : > { %v4969_v52 = vrot.slane %v4960_v16, 6  ;;  %v4962_v53 = vpop.f32.mrb[9].mxu0 }
0x108e   : > { %v4964_v12 = vpop.f32.mrb[10].mxu0  ;;  %v4970_v34 = vrot.slane %v4962_v53, 6 }
0x108f   : > { %v4973_v23 = vadd.f32 %v4969_v52, %v10224_v47  ;;  %v4965_v28 = vpop.f32.mrb[11].mxu0 }
0x1090   : > { %v4974_v54 = vadd.f32 %v4970_v34, %v10235_v17 }
0x1091   : > { %v4975_v31 = vsub.f32 0.0, %v4973_v23 }
0x1092   : > { %v4976_v13 = vsub.f32 0.0, %v4974_v54 }
0x1093   : > { %v4977_v27 = vmul.f32 1.442695, %v4975_v31 }
0x1094   : > { %v4979_v18 = vmul.f32 1.442695, %v4976_v13 }
0x1095   : > { %8055 = vpow2.f32 %v4977_v27 }
0x1096   : > { %8057 = vtanh.f32 %v4974_v54 }
0x109f   : > { %v8056_v30 = vpop.eup %8055 }
0x10a0   : > { %v4981_v29 = vadd.f32 1.0, %v8056_v30  ;;  %v8058_v49 = vpop.eup %8057 }
0x10a2   : > { %8059 = vrcp.f32 %v4981_v29 }
0x10a3   : > { %8061 = vpow2.f32 %v4979_v18 }
0x10ac   : > { %v8060_v44 = vpop.eup %8059 }
0x10ad   : > { %v4990_v45 = vmul.f32 %v8060_v44, %v8058_v49  ;;  %v4989_v32 = vmul.f32 %v8060_v44, %v4987_v43  ;;  %v8062_v33 = vpop.eup %8061 }
0x10ae   : > { %v4982_v1 = vadd.f32 1.0, %v8062_v33 }
0x10af   : > { %4992 = vrot.lane.b32.xlu1 %v4990_v45, %s8326_s1 }
0x10b0   : > { %8063 = vrcp.f32 %v4982_v1 }
0x10ba   : > { %v8064_v46 = vpop.eup %8063 }
0x1121   : > { %v4993_v55 = vpop.permute.xlu1 %4992 }
0x1122   : > { %v4995_v40 = vadd.f32 %v4993_v55, %v4989_v32 }
0x1124   : > { %8065 = vtanh.f32 %v4995_v40  ;;  %v5067_v52 = vrot.slane %v4995_v40, 6 }
0x112e   : > { %v8066_v25 = vpop.eup %8065 }
0x112f   : > { %v4997_v61 = vmul.f32 %v8066_v25, %v8064_v46 }
0x1131   : > { %v4998_v63 = vpack.c.bf16 %v4997_v61, %v4997_v61  ;;  %v6097_v44 = vsel %vm121_vm2, %v10243_v50, %v4997_v61 }
0x1133   : > { %v5000_v42 = vrot.slane %v4998_v63, 1 }
0x1135   : > { %5001 = vrot.lane.b32.xlu1 %v5000_v42, %s8326_s1 }
0x11a7   : > { %v5002_v6 = vpop.permute.xlu1 %5001 }
0x11a8   : > { %7069 = vmatmul.mubr.msk.bf16.vlgmr.msra.gmra.mrb[4].mxu1 %vm364_vm9, %v5002_v6 }
0x11a9   : > { %5167 = vmatpush1.bf16.msra.mxu1 %v10163_v15  ;;  %5198 = vmatprep.mubr.bf16.mxu1 %v8325_v59 }
0x11aa   : > { %5168 = vmatprep.subr.bf16.mxu1 %v10169_v51 }
0x11ad   : > { %5169 = vmatpush1.bf16.msra.mxu1 %v10172_v24 }
0x11ae   : > { %5170 = vmatprep.subr.bf16.mxu1 %v10176_v35 }
0x11b1   : > { %5171 = vmatpush1.bf16.msra.mxu1 %v10181_v2 }
0x11b2   : > { %5172 = vmatprep.subr.bf16.mxu1 %v10185_v41 }
0x11b5   : > { %5173 = vmatpush1.bf16.msra.mxu1 %v10189_v4 }
0x11b6   : > { %5319 = vmatprep.subr.bf16.mxu1 %v10166_v14 }
0x127b   : > { %v5040_v56 = vpop.f32.mrb[4].mxu1 }
0x127c   : > { %v5049_v8 = vrot.slane %v5040_v56, 4  ;;  %v5042_v7 = vpop.f32.mrb[5].mxu1 }
0x127d   : > { %v5044_v5 = vpop.f32.mrb[6].mxu1  ;;  %v5050_v19 = vrot.slane %v5042_v7, 4 }
0x127e   : > { %v5053_v58 = vadd.f32 %v5049_v8, %v10224_v47  ;;  %v5045_v62 = vpop.f32.mrb[7].mxu1 }
0x127f   : > { %v5054_v38 = vadd.f32 %v5050_v19, %v10235_v17 }
0x1280   : > { %v5055_v11 = vsub.f32 0.0, %v5053_v58 }
0x1281   : > { %v5056_v28 = vsub.f32 0.0, %v5054_v38 }
0x1282   : > { %v5057_v10 = vmul.f32 1.442695, %v5055_v11 }
0x1283   : > { %v5059_v31 = vmul.f32 1.442695, %v5056_v28  ;;  %v10316_v28 = vadd.f32 %v10226_v57, %v10221_v36 }
0x1284   : > { %8067 = vpow2.f32 %v5057_v10 }
0x1285   : > { %8069 = vtanh.f32 %v5054_v38 }
0x128e   : > { %v8068_v22 = vpop.eup %8067 }
0x128f   : > { %v5061_v37 = vadd.f32 1.0, %v8068_v22  ;;  %v8070_v16 = vpop.eup %8069 }
0x1291   : > { %8071 = vrcp.f32 %v5061_v37 }
0x1292   : > { %8073 = vpow2.f32 %v5059_v31 }
0x129b   : > { %v8072_v53 = vpop.eup %8071 }
0x129c   : > { %v5070_v12 = vmul.f32 %v8072_v53, %v8070_v16  ;;  %v5069_v23 = vmul.f32 %v8072_v53, %v5067_v52  ;;  %v8074_v27 = vpop.eup %8073 }
0x129d   : > { %v5062_v34 = vadd.f32 1.0, %v8074_v27 }
0x129e   : > { %5072 = vrot.lane.b32.xlu0 %v5070_v12, %s8326_s1 }
0x129f   : > { %8075 = vrcp.f32 %v5062_v34 }
0x12a9   : > { %v8076_v29 = vpop.eup %8075 }
0x1310   : > { %v5073_v54 = vpop.permute.xlu0 %5072 }
0x1311   : > { %v5075_v30 = vadd.f32 %v5073_v54, %v5069_v23 }
0x1313   : > { %8077 = vtanh.f32 %v5075_v30  ;;  %v5147_v7 = vrot.slane %v5075_v30, 6 }
0x131d   : > { %v8078_v49 = vpop.eup %8077 }
0x131e   : > { %v5077_v43 = vmul.f32 %v8078_v49, %v8076_v29 }
0x1320   : > { %v5078_v45 = vpack.c.bf16 %v5077_v43, %v5077_v43  ;;  %v6098_v32 = vsel %vm61_vm0, %v6097_v44, %v5077_v43  ;;  %v10321_v43 = vadd.f32 %v10229_v60, %v10232_v3 }
0x1322   : > { %v5080_v13 = vrot.slane %v5078_v45, 2 }
0x1324   : > { %5081 = vrot.lane.b32.xlu1 %v5080_v13, %s8326_s1 }
0x1396   : > { %v5082_v18 = vpop.permute.xlu1 %5081 }
0x1397   : > { %7070 = vmatmul.mubr.msk.bf16.vlgmr.msra.gmra.mrb[12].mxu0 %vm364_vm9, %v5082_v18 }
0x1398   : > { %5240 = vmatpush1.bf16.msra.mxu0 %v10163_v15  ;;  %5271 = vmatprep.mubr.bf16.mxu0 %v8325_v59 }
0x1399   : > { %5241 = vmatprep.subr.bf16.mxu0 %v10169_v51 }
0x139c   : > { %5242 = vmatpush1.bf16.msra.mxu0 %v10172_v24 }
0x139d   : > { %5243 = vmatprep.subr.bf16.mxu0 %v10176_v35 }
0x13a0   : > { %5244 = vmatpush1.bf16.msra.mxu0 %v10181_v2 }
0x13a1   : > { %5245 = vmatprep.subr.bf16.mxu0 %v10185_v41 }
0x13a4   : > { %5246 = vmatpush1.bf16.msra.mxu0 %v10189_v4 }
0x13a5   : > { %5399 = vmatprep.subr.bf16.mxu0 %v10166_v14 }
0x146a   : > { %v5120_v50 = vpop.f32.mrb[12].mxu0 }
0x146b   : > { %v5129_v33 = vrot.slane %v5120_v50, 2  ;;  %v5122_v1 = vpop.f32.mrb[13].mxu0 }
0x146c   : > { %v5124_v55 = vpop.f32.mrb[14].mxu0  ;;  %v5130_v63 = vrot.slane %v5122_v1, 2 }
0x146d   : > { %v5133_v40 = vadd.f32 %v5129_v33, %v10224_v47  ;;  %v5125_v46 = vpop.f32.mrb[15].mxu0 }
0x146e   : > { %v5134_v42 = vadd.f32 %v5130_v63, %v10235_v17 }
0x146f   : > { %v5135_v25 = vsub.f32 0.0, %v5133_v40 }
0x1470   : > { %v5136_v11 = vsub.f32 0.0, %v5134_v42 }
0x1471   : > { %v5137_v61 = vmul.f32 1.442695, %v5135_v25 }
0x1472   : > { %v5139_v47 = vmul.f32 1.442695, %v5136_v11 }
0x1473   : > { %8079 = vpow2.f32 %v5137_v61 }
0x1474   : > { %8081 = vtanh.f32 %v5134_v42 }
0x147d   : > { %v8080_v6 = vpop.eup %8079 }
0x147e   : > { %v5141_v56 = vadd.f32 1.0, %v8080_v6  ;;  %v8082_v8 = vpop.eup %8081 }
0x1480   : > { %8083 = vrcp.f32 %v5141_v56 }
0x1481   : > { %8085 = vpow2.f32 %v5139_v47 }
0x148a   : > { %v8084_v5 = vpop.eup %8083 }
0x148b   : > { %v5150_v58 = vmul.f32 %v8084_v5, %v8082_v8  ;;  %v5149_v62 = vmul.f32 %v8084_v5, %v5147_v7  ;;  %v8086_v10 = vpop.eup %8085 }
0x148c   : > { %v5142_v19 = vadd.f32 1.0, %v8086_v10 }
0x148d   : > { %5152 = vrot.lane.b32.xlu0 %v5150_v58, %s8326_s1 }
0x148e   : > { %8087 = vrcp.f32 %v5142_v19 }
0x1498   : > { %v8088_v17 = vpop.eup %8087 }
0x14ff   : > { %v5153_v38 = vpop.permute.xlu0 %5152 }
0x1500   : > { %v5155_v22 = vadd.f32 %v5153_v38, %v5149_v62 }
0x1502   : > { %8089 = vtanh.f32 %v5155_v22  ;;  %v5221_v13 = vrot.slane %v5155_v22, 6 }
0x150c   : > { %v8090_v37 = vpop.eup %8089 }
0x150d   : > { %v5157_v16 = vmul.f32 %v8090_v37, %v8088_v17 }
0x150f   : > { %v5158_v52 = vpack.c.bf16 %v5157_v16, %v5157_v16  ;;  %v10301_v53 = vsel %vm78_vm1, %v6098_v32, %v5157_v16 }
0x1511   : > { %v5160_v12 = vrot.slane %v5158_v52, 3 }
0x1513   : > { %5161 = vrot.lane.b32.xlu1 %v5160_v12, %s8326_s1 }
0x1585   : > { %v5162_v23 = vpop.permute.xlu1 %5161 }
0x1586   : > { %7071 = vmatmul.mubr.msk.bf16.vlgmr.msra.gmra.mrb[8].mxu1 %vm364_vm9, %v5162_v23 }
0x1587   : > { %5320 = vmatpush1.bf16.msra.mxu1 %v10163_v15  ;;  %5351 = vmatprep.mubr.bf16.mxu1 %v8325_v59 }
0x1588   : > { %5321 = vmatprep.subr.bf16.mxu1 %v10169_v51 }
0x158b   : > { %5322 = vmatpush1.bf16.msra.mxu1 %v10172_v24 }
0x158c   : > { %5323 = vmatprep.subr.bf16.mxu1 %v10176_v35 }
0x158f   : > { %5324 = vmatpush1.bf16.msra.mxu1 %v10181_v2 }
0x1590   : > { %5325 = vmatprep.subr.bf16.mxu1 %v10185_v41 }
0x1593   : > { %5326 = vmatpush1.bf16.msra.mxu1 %v10189_v4 }
0x1594   : > { %5479 = vmatprep.subr.bf16.mxu1 %v10166_v14 }
0x1659   : > { %v5200_v31 = vpop.f32.mrb[8].mxu1 }
0x165a   : > { %v5207_v27 = vadd.f32 %v5200_v31, %v10316_v28  ;;  %v5202_v34 = vpop.f32.mrb[9].mxu1 }
0x165b   : > { %v5204_v54 = vpop.f32.mrb[10].mxu1  ;;  %v5208_v44 = vadd.f32 %v5202_v34, %v10321_v43 }
0x165c   : > { %v5209_v30 = vsub.f32 0.0, %v5207_v27  ;;  %v5205_v29 = vpop.f32.mrb[11].mxu1 }
0x165d   : > { %v5210_v1 = vsub.f32 0.0, %v5208_v44 }
0x165e   : > { %v5211_v49 = vmul.f32 1.442695, %v5209_v30 }
0x165f   : > { %v5213_v55 = vmul.f32 1.442695, %v5210_v1 }
0x1660   : > { %8091 = vpow2.f32 %v5211_v49 }
0x1661   : > { %8093 = vtanh.f32 %v5208_v44 }
0x166a   : > { %v8092_v45 = vpop.eup %8091 }
0x166b   : > { %v5215_v32 = vadd.f32 1.0, %v8092_v45  ;;  %v8094_v57 = vpop.eup %8093 }
0x166d   : > { %8095 = vrcp.f32 %v5215_v32 }
0x166e   : > { %8097 = vpow2.f32 %v5213_v55 }
0x1677   : > { %v8096_v18 = vpop.eup %8095 }
0x1678   : > { %v5224_v50 = vmul.f32 %v8096_v18, %v8094_v57  ;;  %v5223_v33 = vmul.f32 %v8096_v18, %v5221_v13  ;;  %v8098_v40 = vpop.eup %8097 }
0x1679   : > { %v5216_v46 = vadd.f32 1.0, %v8098_v40 }
0x167a   : > { %5226 = vrot.lane.b32.xlu0 %v5224_v50, %s8326_s1 }
0x167b   : > { %8099 = vrcp.f32 %v5216_v46 }
0x1685   : > { %v8100_v61 = vpop.eup %8099 }
0x16ec   : > { %v5227_v60 = vpop.permute.xlu0 %5226 }
0x16ed   : > { %v5229_v25 = vadd.f32 %v5227_v60, %v5223_v33 }
0x16ef   : > { %8101 = vtanh.f32 %v5229_v25  ;;  %v5300_v16 = vrot.slane %v5229_v25, 6 }
0x16f9   : > { %v8102_v63 = vpop.eup %8101 }
0x16fa   : > { %v10325_v42 = vmul.f32 %v8102_v63, %v8100_v61 }
0x16fc   : > { %v5232_v6 = vpack.c.bf16 %v10325_v42, %v10325_v42 }
0x16fe   : > { %5234 = vrot.lane.b32.xlu1 %v5232_v6, %s8326_s1 }
0x1770   : > { %v5235_v56 = vpop.permute.xlu1 %5234 }
0x1771   : > { %7072 = vmatmul.mubr.msk.bf16.vlgmr.msra.gmra.mrb[16].mxu0 %vm364_vm9, %v5235_v56 }
0x1772   : > { %5400 = vmatpush1.bf16.msra.mxu0 %v10163_v15  ;;  %5431 = vmatprep.mubr.bf16.mxu0 %v8325_v59 }
0x1773   : > { %5401 = vmatprep.subr.bf16.mxu0 %v10169_v51 }
0x1776   : > { %5402 = vmatpush1.bf16.msra.mxu0 %v10172_v24 }
0x1777   : > { %5403 = vmatprep.subr.bf16.mxu0 %v10176_v35 }
0x177a   : > { %5404 = vmatpush1.bf16.msra.mxu0 %v10181_v2 }
0x177b   : > { %5405 = vmatprep.subr.bf16.mxu0 %v10185_v41 }
0x177e   : > { %5406 = vmatpush1.bf16.msra.mxu0 %v10189_v4 }
0x177f   : > { %5552 = vmatprep.subr.bf16.mxu0 %v10166_v14 }
0x1844   : > { %v5273_v8 = vpop.f32.mrb[16].mxu0 }
0x1845   : > { %v5282_v7 = vrot.slane %v5273_v8, 6  ;;  %v5275_v5 = vpop.f32.mrb[17].mxu0 }
0x1846   : > { %v5277_v58 = vpop.f32.mrb[18].mxu0  ;;  %v5283_v19 = vrot.slane %v5275_v5, 6 }
0x1847   : > { %v5286_v62 = vadd.f32 %v5282_v7, %v10316_v28  ;;  %v5278_v11 = vpop.f32.mrb[19].mxu0 }
0x1848   : > { %v5287_v38 = vadd.f32 %v5283_v19, %v10321_v43 }
0x1849   : > { %v5288_v47 = vsub.f32 0.0, %v5286_v62 }
0x184a   : > { %v5289_v31 = vsub.f32 0.0, %v5287_v38 }
0x184b   : > { %v5290_v10 = vmul.f32 1.442695, %v5288_v47 }
0x184c   : > { %v5292_v27 = vmul.f32 1.442695, %v5289_v31 }
0x184d   : > { %8103 = vpow2.f32 %v5290_v10 }
0x184e   : > { %8105 = vtanh.f32 %v5287_v38 }
0x1857   : > { %v8104_v22 = vpop.eup %8103 }
0x1858   : > { %v5294_v17 = vadd.f32 1.0, %v8104_v22  ;;  %v8106_v37 = vpop.eup %8105 }
0x185a   : > { %8107 = vrcp.f32 %v5294_v17 }
0x185b   : > { %8109 = vpow2.f32 %v5292_v27 }
0x1864   : > { %v8108_v52 = vpop.eup %8107 }
0x1865   : > { %v5303_v12 = vmul.f32 %v8108_v52, %v8106_v37  ;;  %v5302_v23 = vmul.f32 %v8108_v52, %v5300_v16  ;;  %v8110_v34 = vpop.eup %8109 }
0x1866   : > { %v5295_v54 = vadd.f32 1.0, %v8110_v34 }
0x1867   : > { %5305 = vrot.lane.b32.xlu0 %v5303_v12, %s8326_s1 }
0x1868   : > { %8111 = vrcp.f32 %v5295_v54 }
0x1872   : > { %v8112_v49 = vpop.eup %8111 }
0x18d9   : > { %v5306_v30 = vpop.permute.xlu0 %5305 }
0x18da   : > { %v5308_v29 = vadd.f32 %v5306_v30, %v5302_v23 }
0x18dc   : > { %8113 = vtanh.f32 %v5308_v29  ;;  %v5380_v8 = vrot.slane %v5308_v29, 6 }
0x18e6   : > { %v8114_v44 = vpop.eup %8113 }
0x18e7   : > { %v5310_v45 = vmul.f32 %v8114_v44, %v8112_v49 }
0x18e9   : > { %v5311_v32 = vpack.c.bf16 %v5310_v45, %v5310_v45  ;;  %v6100_v16 = vsel %vm121_vm2, %v10325_v42, %v5310_v45 }
0x18eb   : > { %v5313_v57 = vrot.slane %v5311_v32, 1 }
0x18ed   : > { %5314 = vrot.lane.b32.xlu1 %v5313_v57, %s8326_s1 }
0x195f   : > { %v5315_v13 = vpop.permute.xlu1 %5314 }
0x1960   : > { %7073 = vmatmul.mubr.msk.bf16.vlgmr.msra.gmra.mrb[12].mxu1 %vm364_vm9, %v5315_v13 }
0x1961   : > { %5480 = vmatpush1.bf16.msra.mxu1 %v10163_v15  ;;  %5511 = vmatprep.mubr.bf16.mxu1 %v8325_v59 }
0x1962   : > { %5481 = vmatprep.subr.bf16.mxu1 %v10169_v51 }
0x1965   : > { %5482 = vmatpush1.bf16.msra.mxu1 %v10172_v24 }
0x1966   : > { %5483 = vmatprep.subr.bf16.mxu1 %v10176_v35 }
0x1969   : > { %5484 = vmatpush1.bf16.msra.mxu1 %v10181_v2 }
0x196a   : > { %5485 = vmatprep.subr.bf16.mxu1 %v10185_v41 }
0x196d   : > { %5486 = vmatpush1.bf16.msra.mxu1 %v10189_v4 }
0x196e   : > { %5632 = vmatprep.subr.bf16.mxu1 %v10166_v14 }
0x1a33   : > { %v5353_v18 = vpop.f32.mrb[12].mxu1 }
0x1a34   : > { %v5362_v50 = vrot.slane %v5353_v18, 4  ;;  %v5355_v33 = vpop.f32.mrb[13].mxu1 }
0x1a35   : > { %v5357_v1 = vpop.f32.mrb[14].mxu1  ;;  %v5363_v25 = vrot.slane %v5355_v33, 4 }
0x1a36   : > { %v5366_v55 = vadd.f32 %v5362_v50, %v10316_v28  ;;  %v5358_v40 = vpop.f32.mrb[15].mxu1 }
0x1a37   : > { %v5367_v61 = vadd.f32 %v5363_v25, %v10321_v43 }
0x1a38   : > { %v5368_v46 = vsub.f32 0.0, %v5366_v55 }
0x1a39   : > { %v5369_v62 = vsub.f32 0.0, %v5367_v61 }
0x1a3a   : > { %v5370_v60 = vmul.f32 1.442695, %v5368_v46 }
0x1a3b   : > { %v5372_v11 = vmul.f32 1.442695, %v5369_v62 }
0x1a3c   : > { %8115 = vpow2.f32 %v5370_v60 }
0x1a3d   : > { %8117 = vtanh.f32 %v5367_v61 }
0x1a46   : > { %v8116_v63 = vpop.eup %8115 }
0x1a47   : > { %v5374_v6 = vadd.f32 1.0, %v8116_v63  ;;  %v8118_v56 = vpop.eup %8117 }
0x1a49   : > { %8119 = vrcp.f32 %v5374_v6 }
0x1a4a   : > { %8121 = vpow2.f32 %v5372_v11 }
0x1a53   : > { %v8120_v7 = vpop.eup %8119 }
0x1a54   : > { %v5383_v5 = vmul.f32 %v8120_v7, %v8118_v56  ;;  %v5382_v58 = vmul.f32 %v8120_v7, %v5380_v8  ;;  %v8122_v47 = vpop.eup %8121 }
0x1a55   : > { %v5375_v10 = vadd.f32 1.0, %v8122_v47 }
0x1a56   : > { %5385 = vrot.lane.b32.xlu0 %v5383_v5, %s8326_s1 }
0x1a57   : > { %8123 = vrcp.f32 %v5375_v10 }
0x1a61   : > { %v8124_v22 = vpop.eup %8123 }
0x1ac8   : > { %v5386_v19 = vpop.permute.xlu0 %5385 }
0x1ac9   : > { %v5388_v38 = vadd.f32 %v5386_v19, %v5382_v58  ;;  %v10390_v58 = vadd.f32 %v10248_v0, %v10221_v36 }
0x1acb   : > { %8125 = vtanh.f32 %v5388_v38  ;;  %v5460_v50 = vrot.slane %v5388_v38, 6 }
0x1ad5   : > { %v8126_v17 = vpop.eup %8125 }
0x1ad6   : > { %v5390_v37 = vmul.f32 %v8126_v17, %v8124_v22  ;;  %v10395_v17 = vadd.f32 %v10250_v26, %v10232_v3 }
0x1ad8   : > { %v5391_v52 = vpack.c.bf16 %v5390_v37, %v5390_v37  ;;  %v6101_v12 = vsel %vm61_vm0, %v6100_v16, %v5390_v37 }
0x1ada   : > { %v5393_v23 = vrot.slane %v5391_v52, 2 }
0x1adc   : > { %5394 = vrot.lane.b32.xlu1 %v5393_v23, %s8326_s1 }
0x1b4e   : > { %v5395_v31 = vpop.permute.xlu1 %5394 }
0x1b4f   : > { %7074 = vmatmul.mubr.msk.bf16.vlgmr.msra.gmra.mrb[20].mxu0 %vm364_vm9, %v5395_v31 }
0x1b50   : > { %5553 = vmatpush1.bf16.msra.mxu0 %v10163_v15  ;;  %5584 = vmatprep.mubr.bf16.mxu0 %v8325_v59 }
0x1b51   : > { %5554 = vmatprep.subr.bf16.mxu0 %v10169_v51 }
0x1b54   : > { %5555 = vmatpush1.bf16.msra.mxu0 %v10172_v24 }
0x1b55   : > { %5556 = vmatprep.subr.bf16.mxu0 %v10176_v35 }
0x1b58   : > { %5557 = vmatpush1.bf16.msra.mxu0 %v10181_v2 }
0x1b59   : > { %5558 = vmatprep.subr.bf16.mxu0 %v10185_v41 }
0x1b5c   : > { %5559 = vmatpush1.bf16.msra.mxu0 %v10189_v4 }
0x1b5d   : > { %5712 = vmatprep.subr.bf16.mxu0 %v10166_v14 }
0x1c22   : > { %v5433_v42 = vpop.f32.mrb[20].mxu0 }
0x1c23   : > { %v5442_v27 = vrot.slane %v5433_v42, 2  ;;  %v5435_v34 = vpop.f32.mrb[21].mxu0 }
0x1c24   : > { %v5437_v54 = vpop.f32.mrb[22].mxu0  ;;  %v5443_v45 = vrot.slane %v5435_v34, 2 }
0x1c25   : > { %v5446_v30 = vadd.f32 %v5442_v27, %v10316_v28  ;;  %v5438_v29 = vpop.f32.mrb[23].mxu0 }
0x1c26   : > { %v5447_v32 = vadd.f32 %v5443_v45, %v10321_v43 }
0x1c27   : > { %v5448_v49 = vsub.f32 0.0, %v5446_v30 }
0x1c28   : > { %v5449_v40 = vsub.f32 0.0, %v5447_v32 }
0x1c29   : > { %v5450_v44 = vmul.f32 1.442695, %v5448_v49 }
0x1c2a   : > { %v5452_v28 = vmul.f32 1.442695, %v5449_v40 }
0x1c2b   : > { %8127 = vpow2.f32 %v5450_v44 }
0x1c2c   : > { %8129 = vtanh.f32 %v5447_v32 }
0x1c35   : > { %v8128_v57 = vpop.eup %8127 }
0x1c36   : > { %v5454_v13 = vadd.f32 1.0, %v8128_v57  ;;  %v8130_v18 = vpop.eup %8129 }
0x1c38   : > { %8131 = vrcp.f32 %v5454_v13 }
0x1c39   : > { %8133 = vpow2.f32 %v5452_v28 }
0x1c42   : > { %v8132_v33 = vpop.eup %8131 }
0x1c43   : > { %v5463_v1 = vmul.f32 %v8132_v33, %v8130_v18  ;;  %v5462_v55 = vmul.f32 %v8132_v33, %v5460_v50  ;;  %v8134_v46 = vpop.eup %8133 }
0x1c44   : > { %v5455_v60 = vadd.f32 1.0, %v8134_v46 }
0x1c45   : > { %5465 = vrot.lane.b32.xlu0 %v5463_v1, %s8326_s1 }
0x1c46   : > { %8135 = vrcp.f32 %v5455_v60 }
0x1c50   : > { %v8136_v43 = vpop.eup %8135 }
0x1cb7   : > { %v5466_v25 = vpop.permute.xlu0 %5465 }
0x1cb8   : > { %v5468_v61 = vadd.f32 %v5466_v25, %v5462_v55 }
0x1cba   : > { %8137 = vtanh.f32 %v5468_v61 }
0x1cc4   : > { %v8138_v63 = vpop.eup %8137 }
0x1cc5   : > { %v5470_v6 = vmul.f32 %v8138_v63, %v8136_v43 }
0x1cc7   : > { %v5471_v56 = vpack.c.bf16 %v5470_v6, %v5470_v6  ;;  %v10375_v8 = vsel %vm78_vm1, %v6101_v12, %v5470_v6  ;;  %v5534_v12 = vrot.slane %v5468_v61, 6 }
0x1cc9   : > { %v5473_v7 = vrot.slane %v5471_v56, 3 }
0x1ccb   : > { %5474 = vrot.lane.b32.xlu1 %v5473_v7, %s8326_s1 }
0x1d3d   : > { %v5475_v5 = vpop.permute.xlu1 %5474 }
0x1d3e   : > { %7075 = vmatmul.mubr.msk.bf16.vlgmr.msra.gmra.mrb[16].mxu1 %vm364_vm9, %v5475_v5 }
0x1d3f   : > { %5633 = vmatpush1.bf16.msra.mxu1 %v10163_v15  ;;  %5664 = vmatprep.mubr.bf16.mxu1 %v8325_v59 }
0x1d40   : > { %5634 = vmatprep.subr.bf16.mxu1 %v10169_v51 }
0x1d43   : > { %5635 = vmatpush1.bf16.msra.mxu1 %v10172_v24 }
0x1d44   : > { %5636 = vmatprep.subr.bf16.mxu1 %v10176_v35 }
0x1d47   : > { %5637 = vmatpush1.bf16.msra.mxu1 %v10181_v2 }
0x1d48   : > { %5638 = vmatprep.subr.bf16.mxu1 %v10185_v41 }
0x1d4b   : > { %5639 = vmatpush1.bf16.msra.mxu1 %v10189_v4 }
0x1d4c   : > { %5792 = vmatprep.subr.bf16.mxu1 %v10166_v14 }
0x1e11   : > { %v5513_v62 = vpop.f32.mrb[16].mxu1 }
0x1e12   : > { %v5520_v11 = vadd.f32 %v5513_v62, %v10390_v58  ;;  %v5515_v47 = vpop.f32.mrb[17].mxu1 }
0x1e13   : > { %v5517_v10 = vpop.f32.mrb[18].mxu1  ;;  %v5521_v37 = vadd.f32 %v5515_v47, %v10395_v17 }
0x1e14   : > { %v5522_v19 = vsub.f32 0.0, %v5520_v11  ;;  %v5518_v38 = vpop.f32.mrb[19].mxu1  ;;  %v10420_v10 = vld [vmem:[%s10160_s22] ss:$8 sps:$4 sm:$0xff]  }
0x1e15   : > { %v5523_v27 = vsub.f32 0.0, %v5521_v37  ;;  %v10429_v38 = vld [vmem:[%s10160_s22 + $0x10] ss:$8 sps:$4 sm:$0xff]  }
0x1e16   : > { %v5524_v22 = vmul.f32 1.442695, %v5522_v19  ;;  %v10425_v19 = vld [vmem:[%s10160_s22 + $0x14] ss:$8 sps:$4 sm:$0xff]  }
0x1e17   : > { %v5526_v34 = vmul.f32 1.442695, %v5523_v27 }
0x1e18   : > { %8139 = vpow2.f32 %v5524_v22  ;;  %v10433_v22 = vld [vmem:[%s10160_s22 + $0x24] ss:$8 sps:$4 sm:$0xff]  }
0x1e19   : > { %8141 = vtanh.f32 %v5521_v37  ;;  %v10437_v37 = vld [vmem:[%s10160_s22 + $0x20] ss:$8 sps:$4 sm:$0xff]  }
0x1e22   : > { %v8140_v16 = vpop.eup %8139 }
0x1e23   : > { %v5528_v52 = vadd.f32 1.0, %v8140_v16  ;;  %v8142_v0 = vpop.eup %8141  ;;  %v10441_v16 = vld [vmem:[%s10160_s22 + $0x34] ss:$8 sps:$4 sm:$0xff]  }
0x1e25   : > { %8143 = vrcp.f32 %v5528_v52  ;;  %v10445_v52 = vld [vmem:[%s10160_s22 + $0x30] ss:$8 sps:$4 sm:$0xff]  }
0x1e26   : > { %8145 = vpow2.f32 %v5526_v34 }
0x1e2f   : > { %v8144_v23 = vpop.eup %8143 }
0x1e30   : > { %v5537_v31 = vmul.f32 %v8144_v23, %v8142_v0  ;;  %v5536_v42 = vmul.f32 %v8144_v23, %v5534_v12  ;;  %v8146_v54 = vpop.eup %8145  ;;  %v8242_v0 = vld [vmem:[%s10160_s22 + $0x4] ss:$8 sps:$4 sm:$0xff]  }
0x1e31   : > { %v5529_v30 = vadd.f32 1.0, %v8146_v54 }
0x1e32   : > { %5539 = vrot.lane.b32.xlu0 %v5537_v31, %s8326_s1 }
0x1e33   : > { %8147 = vrcp.f32 %v5529_v30 }
0x1e3d   : > { %v8148_v49 = vpop.eup %8147 }
0x1ea4   : > { %v5540_v26 = vpop.permute.xlu0 %5539 }
0x1ea5   : > { %v5542_v29 = vadd.f32 %v5540_v26, %v5536_v42 }
0x1ea7   : > { %8149 = vtanh.f32 %v5542_v29 }
0x1eb1   : > { %v8150_v44 = vpop.eup %8149 }
0x1eb2   : > { %v10399_v45 = vmul.f32 %v8150_v44, %v8148_v49 }
0x1eb4   : > { %v5545_v32 = vpack.c.bf16 %v10399_v45, %v10399_v45 }
0x1eb6   : > { %5547 = vrot.lane.b32.xlu1 %v5545_v32, %s8326_s1 }
0x1f28   : > { %v5548_v57 = vpop.permute.xlu1 %5547 }
0x1f29   : > { %7076 = vmatmul.mubr.msk.bf16.vlgmr.msra.gmra.mrb[24].mxu0 %vm364_vm9, %v5548_v57 }
0x1f2a   : > { %5713 = vmatpush1.bf16.msra.mxu0 %v10163_v15  ;;  %5744 = vmatprep.mubr.bf16.mxu0 %v8325_v59 }
0x1f2b   : > { %5714 = vmatprep.subr.bf16.mxu0 %v10169_v51 }
0x1f2e   : > { %5715 = vmatpush1.bf16.msra.mxu0 %v10172_v24 }
0x1f2f   : > { %5716 = vmatprep.subr.bf16.mxu0 %v10176_v35 }
0x1f32   : > { %5717 = vmatpush1.bf16.msra.mxu0 %v10181_v2 }
0x1f33   : > { %5718 = vmatprep.subr.bf16.mxu0 %v10185_v41 }
0x1f36   : > { %5719 = vmatpush1.bf16.msra.mxu0 %v10189_v4  ;;  %v5613_v4 = vrot.slane %v5542_v29, 6 }
0x1f37   : > { %5865 = vmatprep.subr.bf16.mxu0 %v10166_v14 }
0x1ffc   : > { %v5586_v13 = vpop.f32.mrb[24].mxu0 }
0x1ffd   : > { %v5595_v18 = vrot.slane %v5586_v13, 6  ;;  %v5588_v50 = vpop.f32.mrb[25].mxu0 }
0x1ffe   : > { %v5590_v15 = vpop.f32.mrb[26].mxu0  ;;  %v5596_v24 = vrot.slane %v5588_v50, 6 }
0x1fff   : > { %v5599_v33 = vadd.f32 %v5595_v18, %v10390_v58  ;;  %v5591_v1 = vpop.f32.mrb[27].mxu0 }
0x2000   : > { %v5600_v35 = vadd.f32 %v5596_v24, %v10395_v17 }
0x2001   : > { %v5601_v51 = vsub.f32 0.0, %v5599_v33 }
0x2002   : > { %v5602_v60 = vsub.f32 0.0, %v5600_v35 }
0x2003   : > { %v5603_v55 = vmul.f32 1.442695, %v5601_v51 }
0x2004   : > { %v5605_v25 = vmul.f32 1.442695, %v5602_v60 }
0x2005   : > { %8151 = vpow2.f32 %v5603_v55 }
0x2006   : > { %8153 = vtanh.f32 %v5600_v35 }
0x200f   : > { %v8152_v2 = vpop.eup %8151 }
0x2010   : > { %v5607_v40 = vadd.f32 1.0, %v8152_v2  ;;  %v8154_v41 = vpop.eup %8153 }
0x2012   : > { %8155 = vrcp.f32 %v5607_v40 }
0x2013   : > { %8157 = vpow2.f32 %v5605_v25 }
0x201c   : > { %v8156_v14 = vpop.eup %8155 }
0x201d   : > { %v5616_v28 = vmul.f32 %v8156_v14, %v8154_v41  ;;  %v5615_v46 = vmul.f32 %v8156_v14, %v5613_v4  ;;  %v8158_v61 = vpop.eup %8157 }
0x201e   : > { %v5608_v43 = vadd.f32 1.0, %v8158_v61 }
0x201f   : > { %5618 = vrot.lane.b32.xlu0 %v5616_v28, %s8326_s1 }
0x2020   : > { %8159 = vrcp.f32 %v5608_v43 }
0x202a   : > { %v8160_v56 = vpop.eup %8159 }
0x2091   : > { %v5619_v63 = vpop.permute.xlu0 %5618 }
0x2092   : > { %v5621_v6 = vadd.f32 %v5619_v63, %v5615_v46 }
0x2094   : > { %8161 = vtanh.f32 %v5621_v6  ;;  %v5693_v57 = vrot.slane %v5621_v6, 6 }
0x209e   : > { %v8162_v7 = vpop.eup %8161 }
0x209f   : > { %v5623_v5 = vmul.f32 %v8162_v7, %v8160_v56 }
0x20a1   : > { %v5624_v62 = vpack.c.bf16 %v5623_v5, %v5623_v5  ;;  %v6103_v41 = vsel %vm121_vm2, %v10399_v45, %v5623_v5 }
0x20a3   : > { %v5626_v11 = vrot.slane %v5624_v62, 1 }
0x20a5   : > { %5627 = vrot.lane.b32.xlu1 %v5626_v11, %s8326_s1 }
0x2117   : > { %v5628_v47 = vpop.permute.xlu1 %5627 }
0x2118   : > { %7077 = vmatmul.mubr.msk.bf16.vlgmr.msra.gmra.mrb[20].mxu1 %vm364_vm9, %v5628_v47 }
0x2119   : > { %5793 = vmatpush1.bf16.msra.mxu1 %v10420_v10  ;;  %5824 = vmatprep.mubr.bf16.mxu1 %v8325_v59 }
0x211a   : > { %5794 = vmatprep.subr.bf16.mxu1 %v10425_v19 }
0x211d   : > { %5795 = vmatpush1.bf16.msra.mxu1 %v10429_v38 }
0x211e   : > { %5796 = vmatprep.subr.bf16.mxu1 %v10433_v22 }
0x2121   : > { %5797 = vmatpush1.bf16.msra.mxu1 %v10437_v37 }
0x2122   : > { %5798 = vmatprep.subr.bf16.mxu1 %v10441_v16 }
0x2125   : > { %5799 = vmatpush1.bf16.msra.mxu1 %v10445_v52 }
0x2126   : > { %5945 = vmatprep.subr.bf16.mxu1 %v8242_v0 }
0x21eb   : > { %v5666_v12 = vpop.f32.mrb[20].mxu1 }
0x21ec   : > { %v5675_v23 = vrot.slane %v5666_v12, 4  ;;  %v5668_v31 = vpop.f32.mrb[21].mxu1 }
0x21ed   : > { %v5670_v42 = vpop.f32.mrb[22].mxu1  ;;  %v5676_v26 = vrot.slane %v5668_v31, 4 }
0x21ee   : > { %v5679_v27 = vadd.f32 %v5675_v23, %v10390_v58  ;;  %v5671_v34 = vpop.f32.mrb[23].mxu1 }
0x21ef   : > { %v5680_v29 = vadd.f32 %v5676_v26, %v10395_v17 }
0x21f0   : > { %v5681_v54 = vsub.f32 0.0, %v5679_v27 }
0x21f1   : > { %v5682_v15 = vsub.f32 0.0, %v5680_v29 }
0x21f2   : > { %v5683_v30 = vmul.f32 1.442695, %v5681_v54 }
0x21f3   : > { %v5685_v33 = vmul.f32 1.442695, %v5682_v15 }
0x21f4   : > { %8163 = vpow2.f32 %v5683_v30 }
0x21f5   : > { %8165 = vtanh.f32 %v5680_v29 }
0x21fe   : > { %v8164_v49 = vpop.eup %8163 }
0x21ff   : > { %v5687_v44 = vadd.f32 1.0, %v8164_v49  ;;  %v8166_v32 = vpop.eup %8165 }
0x2201   : > { %8167 = vrcp.f32 %v5687_v44 }
0x2202   : > { %8169 = vpow2.f32 %v5685_v33 }
0x220b   : > { %v8168_v13 = vpop.eup %8167 }
0x220c   : > { %v5696_v18 = vmul.f32 %v8168_v13, %v8166_v32  ;;  %v5695_v50 = vmul.f32 %v8168_v13, %v5693_v57  ;;  %v8170_v1 = vpop.eup %8169  ;;  %v10483_v13 = vadd.f32 %v10252_v21, %v10221_v36 }
0x220d   : > { %v5688_v51 = vadd.f32 1.0, %v8170_v1 }
0x220e   : > { %5698 = vrot.lane.b32.xlu0 %v5696_v18, %s8326_s1 }
0x220f   : > { %8171 = vrcp.f32 %v5688_v51 }
0x2219   : > { %v8172_v35 = vpop.eup %8171 }
0x2280   : > { %v5699_v55 = vpop.permute.xlu0 %5698 }
0x2281   : > { %v5701_v24 = vadd.f32 %v5699_v55, %v5695_v50 }
0x2283   : > { %8173 = vtanh.f32 %v5701_v24  ;;  %v5773_v12 = vrot.slane %v5701_v24, 6  ;;  %v10488_v24 = vadd.f32 %v10254_v39, %v10232_v3 }
0x228d   : > { %v8174_v2 = vpop.eup %8173 }
0x228e   : > { %v5703_v40 = vmul.f32 %v8174_v2, %v8172_v35 }
0x2290   : > { %v5704_v4 = vpack.c.bf16 %v5703_v40, %v5703_v40  ;;  %v6104_v14 = vsel %vm61_vm0, %v6103_v41, %v5703_v40 }
0x2292   : > { %v5706_v28 = vrot.slane %v5704_v4, 2 }
0x2294   : > { %5707 = vrot.lane.b32.xlu1 %v5706_v28, %s8326_s1 }
0x2306   : > { %v5708_v46 = vpop.permute.xlu1 %5707 }
0x2307   : > { %7078 = vmatmul.mubr.msk.bf16.vlgmr.msra.gmra.mrb[28].mxu0 %vm364_vm9, %v5708_v46 }
0x2308   : > { %5866 = vmatpush1.bf16.msra.mxu0 %v10420_v10  ;;  %5897 = vmatprep.mubr.bf16.mxu0 %v8325_v59 }
0x2309   : > { %5867 = vmatprep.subr.bf16.mxu0 %v10425_v19 }
0x230c   : > { %5868 = vmatpush1.bf16.msra.mxu0 %v10429_v38 }
0x230d   : > { %5869 = vmatprep.subr.bf16.mxu0 %v10433_v22 }
0x2310   : > { %5870 = vmatpush1.bf16.msra.mxu0 %v10437_v37 }
0x2311   : > { %5871 = vmatprep.subr.bf16.mxu0 %v10441_v16 }
0x2314   : > { %5872 = vmatpush1.bf16.msra.mxu0 %v10445_v52 }
0x2315   : > { %6025 = vmatprep.subr.bf16.mxu0 %v8242_v0 }
0x23da   : > { %v5746_v45 = vpop.f32.mrb[28].mxu0 }
0x23db   : > { %v5755_v60 = vrot.slane %v5746_v45, 2  ;;  %v5748_v25 = vpop.f32.mrb[29].mxu0 }
0x23dc   : > { %v5750_v61 = vpop.f32.mrb[30].mxu0  ;;  %v5756_v7 = vrot.slane %v5748_v25, 2 }
0x23dd   : > { %v5759_v43 = vadd.f32 %v5755_v60, %v10390_v58  ;;  %v5751_v63 = vpop.f32.mrb[31].mxu0 }
0x23de   : > { %v5760_v5 = vadd.f32 %v5756_v7, %v10395_v17 }
0x23df   : > { %v5761_v6 = vsub.f32 0.0, %v5759_v43 }
0x23e0   : > { %v5762_v42 = vsub.f32 0.0, %v5760_v5 }
0x23e1   : > { %v5763_v56 = vmul.f32 1.442695, %v5761_v6 }
0x23e2   : > { %v5765_v58 = vmul.f32 1.442695, %v5762_v42 }
0x23e3   : > { %8175 = vpow2.f32 %v5763_v56 }
0x23e4   : > { %8177 = vtanh.f32 %v5760_v5 }
0x23ed   : > { %v8176_v62 = vpop.eup %8175 }
0x23ee   : > { %v5767_v11 = vadd.f32 1.0, %v8176_v62  ;;  %v8178_v47 = vpop.eup %8177 }
0x23f0   : > { %8179 = vrcp.f32 %v5767_v11 }
0x23f1   : > { %8181 = vpow2.f32 %v5765_v58 }
0x23fa   : > { %v8180_v0 = vpop.eup %8179 }
0x23fb   : > { %v5776_v23 = vmul.f32 %v8180_v0, %v8178_v47  ;;  %v5775_v31 = vmul.f32 %v8180_v0, %v5773_v12  ;;  %v8182_v27 = vpop.eup %8181 }
0x23fc   : > { %v5768_v34 = vadd.f32 1.0, %v8182_v27 }
0x23fd   : > { %5778 = vrot.lane.b32.xlu0 %v5776_v23, %s8326_s1 }
0x23fe   : > { %8183 = vrcp.f32 %v5768_v34 }
0x2408   : > { %v8184_v17 = vpop.eup %8183 }
0x246f   : > { %v5779_v54 = vpop.permute.xlu0 %5778 }
0x2470   : > { %v5781_v30 = vadd.f32 %v5779_v54, %v5775_v31 }
0x2472   : > { %8185 = vtanh.f32 %v5781_v30  ;;  %v5847_v21 = vrot.slane %v5781_v30, 6 }
0x247c   : > { %v8186_v26 = vpop.eup %8185 }
0x247d   : > { %v5783_v29 = vmul.f32 %v8186_v26, %v8184_v17 }
0x247f   : > { %v5784_v49 = vpack.c.bf16 %v5783_v29, %v5783_v29  ;;  %v10469_v44 = vsel %vm78_vm1, %v6104_v14, %v5783_v29 }
0x2481   : > { %v5786_v32 = vrot.slane %v5784_v49, 3 }
0x2483   : > { %5787 = vrot.lane.b32.xlu1 %v5786_v32, %s8326_s1 }
0x24f5   : > { %v5788_v57 = vpop.permute.xlu1 %5787 }
0x24f6   : > { %7079 = vmatmul.mubr.msk.bf16.vlgmr.msra.gmra.mrb[24].mxu1 %vm364_vm9, %v5788_v57 }
0x24f7   : > { %5946 = vmatpush1.bf16.msra.mxu1 %v10420_v10  ;;  %5977 = vmatprep.mubr.bf16.mxu1 %v8325_v59 }
0x24f8   : > { %5947 = vmatprep.subr.bf16.mxu1 %v10425_v19 }
0x24fb   : > { %5948 = vmatpush1.bf16.msra.mxu1 %v10429_v38 }
0x24fc   : > { %5949 = vmatprep.subr.bf16.mxu1 %v10433_v22 }
0x24ff   : > { %5950 = vmatpush1.bf16.msra.mxu1 %v10437_v37 }
0x2500   : > { %5951 = vmatprep.subr.bf16.mxu1 %v10441_v16 }
0x2503   : > { %5952 = vmatpush1.bf16.msra.mxu1 %v10445_v52 }
0x25c9   : > { %v5826_v18 = vpop.f32.mrb[24].mxu1 }
0x25ca   : > { %v5833_v50 = vadd.f32 %v5826_v18, %v10483_v13  ;;  %v5828_v15 = vpop.f32.mrb[25].mxu1 }
0x25cb   : > { %v5830_v33 = vpop.f32.mrb[26].mxu1  ;;  %v5834_v35 = vadd.f32 %v5828_v15, %v10488_v24 }
0x25cc   : > { %v5835_v1 = vsub.f32 0.0, %v5833_v50  ;;  %v5831_v51 = vpop.f32.mrb[27].mxu1 }
0x25cd   : > { %v5836_v28 = vsub.f32 0.0, %v5834_v35 }
0x25ce   : > { %v5837_v55 = vmul.f32 1.442695, %v5835_v1 }
0x25cf   : > { %v5839_v46 = vmul.f32 1.442695, %v5836_v28 }
0x25d0   : > { %8187 = vpow2.f32 %v5837_v55 }
0x25d1   : > { %8189 = vtanh.f32 %v5834_v35 }
0x25da   : > { %v8188_v2 = vpop.eup %8187 }
0x25db   : > { %v5841_v40 = vadd.f32 1.0, %v8188_v2  ;;  %v8190_v36 = vpop.eup %8189 }
0x25dd   : > { %8191 = vrcp.f32 %v5841_v40 }
0x25de   : > { %8193 = vpow2.f32 %v5839_v46 }
0x25e7   : > { %v8192_v41 = vpop.eup %8191 }
0x25e8   : > { %v5850_v4 = vmul.f32 %v8192_v41, %v8190_v36  ;;  %v5849_v14 = vmul.f32 %v8192_v41, %v5847_v21  ;;  %v8194_v45 = vpop.eup %8193 }
0x25e9   : > { %v5842_v60 = vadd.f32 1.0, %v8194_v45 }
0x25ea   : > { %5852 = vrot.lane.b32.xlu0 %v5850_v4, %s8326_s1 }
0x25eb   : > { %8195 = vrcp.f32 %v5842_v60 }
0x25f5   : > { %v8196_v25 = vpop.eup %8195 }
0x265c   : > { %v5853_v3 = vpop.permute.xlu0 %5852 }
0x265d   : > { %v5855_v39 = vadd.f32 %v5853_v3, %v5849_v14 }
0x265f   : > { %8197 = vtanh.f32 %v5855_v39 }
0x2669   : > { %v8198_v61 = vpop.eup %8197 }
0x266a   : > { %v10492_v43 = vmul.f32 %v8198_v61, %v8196_v25 }
0x266c   : > { %v5858_v63 = vpack.c.bf16 %v10492_v43, %v10492_v43 }
0x266e   : > { %5860 = vrot.lane.b32.xlu1 %v5858_v63, %s8326_s1 }
0x26e0   : > { %v5861_v6 = vpop.permute.xlu1 %5860 }
0x26e1   : > { %7080 = vmatmul.mubr.msk.bf16.vlgmr.msra.gmra.mrb[32].mxu0 %vm364_vm9, %v5861_v6 }
0x26e2   : > { %6026 = vmatpush1.bf16.msra.mxu0 %v10420_v10  ;;  %6057 = vmatprep.mubr.bf16.mxu0 %v8325_v59 }
0x26e3   : > { %6027 = vmatprep.subr.bf16.mxu0 %v10425_v19 }
0x26e6   : > { %6028 = vmatpush1.bf16.msra.mxu0 %v10429_v38 }
0x26e7   : > { %6029 = vmatprep.subr.bf16.mxu0 %v10433_v22 }
0x26ea   : > { %6030 = vmatpush1.bf16.msra.mxu0 %v10437_v37 }
0x26eb   : > { %6031 = vmatprep.subr.bf16.mxu0 %v10441_v16  ;;  %v5926_v16 = vrot.slane %v5855_v39, 6 }
0x26ee   : > { %6032 = vmatpush1.bf16.msra.mxu0 %v10445_v52 }
0x26ef   :  { %7444 = vmatprep.subr.bf16.mxu0 (%p4669_p0), %v8323_v48 }
0x27b4   : > { %v5899_v56 = vpop.f32.mrb[32].mxu0 }
0x27b5   : > { %v5908_v7 = vrot.slane %v5899_v56, 6  ;;  %v5901_v5 = vpop.f32.mrb[33].mxu0 }
0x27b6   : > { %v5903_v62 = vpop.f32.mrb[34].mxu0  ;;  %v5909_v19 = vrot.slane %v5901_v5, 6 }
0x27b7   : > { %v5912_v10 = vadd.f32 %v5908_v7, %v10483_v13  ;;  %v5904_v11 = vpop.f32.mrb[35].mxu0 }
0x27b8   : > { %v5913_v38 = vadd.f32 %v5909_v19, %v10488_v24 }
0x27b9   : > { %v5914_v59 = vsub.f32 0.0, %v5912_v10 }
0x27ba   : > { %v5915_v31 = vsub.f32 0.0, %v5913_v38 }
0x27bb   : > { %v5916_v47 = vmul.f32 1.442695, %v5914_v59 }
0x27bc   : > { %v5918_v42 = vmul.f32 1.442695, %v5915_v31 }
0x27bd   : > { %8199 = vpow2.f32 %v5916_v47 }
0x27be   : > { %8201 = vtanh.f32 %v5913_v38 }
0x27c7   : > { %v8200_v22 = vpop.eup %8199 }
0x27c8   : > { %v5920_v12 = vadd.f32 1.0, %v8200_v22  ;;  %v8202_v37 = vpop.eup %8201 }
0x27ca   : > { %8203 = vrcp.f32 %v5920_v12 }
0x27cb   : > { %8205 = vpow2.f32 %v5918_v42 }
0x27d4   : > { %v8204_v52 = vpop.eup %8203 }
0x27d5   : > { %v5929_v0 = vmul.f32 %v8204_v52, %v8202_v37  ;;  %v5928_v23 = vmul.f32 %v8204_v52, %v5926_v16  ;;  %v8206_v58 = vpop.eup %8205 }
0x27d6   : > { %v5921_v27 = vadd.f32 1.0, %v8206_v58 }
0x27d7   : > { %5931 = vrot.lane.b32.xlu0 %v5929_v0, %s8326_s1 }
0x27d8   : > { %8207 = vrcp.f32 %v5921_v27 }
0x27e2   : > { %v8208_v30 = vpop.eup %8207 }
0x2849   : > { %v5932_v34 = vpop.permute.xlu0 %5931 }
0x284a   : > { %v5934_v54 = vadd.f32 %v5932_v34, %v5928_v23 }
0x284c   : > { %8209 = vtanh.f32 %v5934_v54  ;;  %v6006_v41 = vrot.slane %v5934_v54, 6 }
0x2856   : > { %v8210_v17 = vpop.eup %8209 }
0x2857   : > { %v5936_v26 = vmul.f32 %v8210_v17, %v8208_v30 }
0x2859   : > { %v5937_v29 = vpack.c.bf16 %v5936_v26, %v5936_v26  ;;  %v6106_v56 = vsel %vm121_vm2, %v10492_v43, %v5936_v26 }
0x285b   : > { %v5939_v49 = vrot.slane %v5937_v29, 1 }
0x285d   : > { %5940 = vrot.lane.b32.xlu1 %v5939_v49, %s8326_s1 }
0x28cf   : > { %v5941_v32 = vpop.permute.xlu1 %5940 }
0x28d0   : > { %7081 = vmatmul.mubr.msk.bf16.vlgmr.msra.gmra.mrb[28].mxu1 %vm364_vm9, %v5941_v32 }
0x29a3   : > { %v5979_v57 = vpop.f32.mrb[28].mxu1 }
0x29a4   : > { %v5988_v18 = vrot.slane %v5979_v57, 4  ;;  %v5981_v50 = vpop.f32.mrb[29].mxu1 }
0x29a5   : > { %v5983_v15 = vpop.f32.mrb[30].mxu1  ;;  %v5989_v35 = vrot.slane %v5981_v50, 4  ;;  %v7083_v50 = vld [vmem:[%s10590_s13] ss:$0 sm:$0xff] (%p4669_p0) }
0x29a6   : > { %v5992_v33 = vadd.f32 %v5988_v18, %v10483_v13  ;;  %v5984_v1 = vpop.f32.mrb[31].mxu1  ;;  %v8244_v18 = vld [vmem:[%s10589_s12 + $0x8] sm:$0xff] (%p4669_p0)  }
0x29a7   : > { %v5993_v2 = vadd.f32 %v5989_v35, %v10488_v24 }
0x29a8   : > { %v5994_v51 = vsub.f32 0.0, %v5992_v33 }
0x29a9   : > { %v5995_v46 = vsub.f32 0.0, %v5993_v2 }
0x29aa   : > { %v5996_v55 = vmul.f32 1.442695, %v5994_v51 }
0x29ab   : > { %v5998_v45 = vmul.f32 1.442695, %v5995_v46 }
0x29ac   : > { %8211 = vpow2.f32 %v5996_v55 }
0x29ad   : > { %8213 = vtanh.f32 %v5993_v2 }
0x29b6   : > { %v8212_v40 = vpop.eup %8211 }
0x29b7   : > { %v6000_v36 = vadd.f32 1.0, %v8212_v40  ;;  %v8214_v21 = vpop.eup %8213 }
0x29b9   : > { %8215 = vrcp.f32 %v6000_v36 }
0x29ba   : > { %8217 = vpow2.f32 %v5998_v45 }
0x29c3   : > { %v8216_v4 = vpop.eup %8215 }
0x29c4   : > { %v6009_v14 = vmul.f32 %v8216_v4, %v8214_v21  ;;  %v6008_v28 = vmul.f32 %v8216_v4, %v6006_v41  ;;  %v8218_v60 = vpop.eup %8217 }
0x29c5   : > { %v6001_v3 = vadd.f32 1.0, %v8218_v60 }
0x29c6   : > { %6011 = vrot.lane.b32.xlu0 %v6009_v14, %s8326_s1 }
0x29c7   : > { %8219 = vrcp.f32 %v6001_v3 }
0x29d1   : > { %v8220_v61 = vpop.eup %8219 }
0x2a38   : > { %v6012_v39 = vpop.permute.xlu0 %6011 }
0x2a39   : > { %v6014_v25 = vadd.f32 %v6012_v39, %v6008_v28 }
0x2a3b   : > { %8221 = vtanh.f32 %v6014_v25  ;;  %v6086_v31 = vrot.slane %v6014_v25, 6 }
0x2a45   : > { %v8222_v63 = vpop.eup %8221 }
0x2a46   : > { %v6016_v6 = vmul.f32 %v8222_v63, %v8220_v61 }
0x2a48   : > { %v6017_v7 = vpack.c.bf16 %v6016_v6, %v6016_v6  ;;  %v6107_v5 = vsel %vm61_vm0, %v6106_v56, %v6016_v6 }
0x2a4a   : > { %v6019_v62 = vrot.slane %v6017_v7, 2 }
0x2a4c   : > { %6020 = vrot.lane.b32.xlu1 %v6019_v62, %s8326_s1 }
0x2a50   : > { %6113 = vrot.lane.b32.xlu1 %v10301_v53, %s8326_s1 }
0x2a54   : > { %6117 = vrot.lane.b32.xlu1 %v10469_v44, %s8326_s1 }
0x2abe   : > { %v6021_v10 = vpop.permute.xlu1 %6020 }
0x2abf   : > { %7082 = vmatmul.mubr.msk.bf16.vlgmr.msra.gmra.mrb[36].mxu0 %vm364_vm9, %v6021_v10 }
0x2ac0   :  { %7452 = vmatprep.mubr.msk.bf16.mxu0 (%p4669_p0), %vm8327_vm14, %v8323_v48 }
0x2ac2   : > { %v6114_v19 = vpop.permute.xlu1 %6113  }
0x2ac3   :  { %v8246_v19 = vld [vmem:[%s10589_s12 + $0x18] sm:$0xff] (%p4669_p0)  }
0x2ac6   : > { %v6118_v37 = vpop.permute.xlu1 %6117  }
0x2b92   : > { %v6059_v11 = vpop.f32.mrb[36].mxu0 }
0x2b93   : > { %v6068_v59 = vrot.slane %v6059_v11, 2  ;;  %v6061_v43 = vpop.f32.mrb[37].mxu0 }
0x2b94   : > { %v6063_v47 = vpop.f32.mrb[38].mxu0  ;;  %v6069_v52 = vrot.slane %v6061_v43, 2 }
0x2b95   : > { %v6072_v38 = vadd.f32 %v6068_v59, %v10483_v13  ;;  %v6064_v22 = vpop.f32.mrb[39].mxu0 }
0x2b96   : > { %v6073_v53 = vadd.f32 %v6069_v52, %v10488_v24 }
0x2b97   : > { %v6074_v12 = vsub.f32 0.0, %v6072_v38 }
0x2b98   : > { %v6075_v13 = vsub.f32 0.0, %v6073_v53 }
0x2b99   : > { %v6076_v16 = vmul.f32 1.442695, %v6074_v12 }
0x2b9a   : > { %v6078_v34 = vmul.f32 1.442695, %v6075_v13 }
0x2b9b   : > { %8223 = vpow2.f32 %v6076_v16 }
0x2b9c   : > { %8225 = vtanh.f32 %v6073_v53 }
0x2ba5   : > { %v8224_v0 = vpop.eup %8223 }
0x2ba6   : > { %v6080_v44 = vadd.f32 1.0, %v8224_v0  ;;  %v8226_v23 = vpop.eup %8225 }
0x2ba8   : > { %8227 = vrcp.f32 %v6080_v44 }
0x2ba9   : > { %8229 = vpow2.f32 %v6078_v34 }
0x2bb2   : > { %v8228_v42 = vpop.eup %8227 }
0x2bb3   : > { %v6089_v58 = vmul.f32 %v8228_v42, %v8226_v23  ;;  %v6088_v27 = vmul.f32 %v8228_v42, %v6086_v31  ;;  %v8230_v54 = vpop.eup %8229 }
0x2bb4   : > { %v6081_v30 = vadd.f32 1.0, %v8230_v54 }
0x2bb5   : > { %6091 = vrot.lane.b32.xlu0 %v6089_v58, %s8326_s1 }
0x2bb6   : > { %8231 = vrcp.f32 %v6081_v30 }
0x2bb9   : > { %6115 = vrot.lane.b32.xlu0 %v10375_v8, %s8326_s1  ;;  %v8243_v8 = vld [vmem:[%s10589_s12] sm:$0xff] (%p4669_p0)   ;;  %s8328_s12 = smov (%p4669_p0), [#allocation2]  }
0x2bba   :  { %7445 = vmatpush3.bf16.msra.mxu0 (%p4669_p0), %v8243_v8  ;;  %s6230_s13 = sshll.u32 (%p4669_p0), %s8328_s12, 4  ;;  %s6231_s13 = int_to_ptr.vmem [resolvable:$true] %s6230_s13 }
0x2bbb   :  { %7446 = vmatprep.subr.bf16.mxu0 (%p4669_p0), %v8323_v48  ;;  %s8251_s30 = scalar_lea.vmem (%p4669_p0), %s6231_s13, 32  ;;  %p8256_p2 = scmp.lt.s32.totalorder (%p4669_p0), %s6231_s13, %s6231_s13 }
0x2bbc   :  { %p8252_p1 = scmp.ne.s32.totalorder (%p4669_p0), %s6231_s13, %s8251_s30  ;;  %p8257_p3 = scmp.lt.s32.totalorder (%p4669_p0), %s8251_s30, %s8251_s30 }
0x2bbe   :  { %7447 = vmatpush3.bf16.msra.mxu0 (%p4669_p0), %v8244_v18  ;;  %p8258_p4 = por (%p4669_p0), %p8257_p3, %p8256_p2 }
0x2bbf   :  { %7448 = vmatprep.subr.bf16.mxu0 (%p4669_p0), %v8323_v48 }
0x2bc0   : > { %v8232_v26 = vpop.eup %8231  ;;  %p8259_p5 = pnand (%p4669_p0), %p8258_p4, %p8252_p1 }
0x2bc2   :  { %7449 = vmatpush3.bf16.msra.mxu0 (%p4669_p0), %v8245_v9 }
0x2bc3   :  { %7450 = vmatprep.subr.bf16.mxu0 (%p4669_p0), %v8323_v48 }
0x2bc6   :  { %7451 = vmatpush3.bf16.msra.mxu0 (%p4669_p0), %v8246_v19 }
0x2c27   : > { %v6092_v24 = vpop.permute.xlu0 %6091 }
0x2c28   : > { %v6094_v17 = vadd.f32 %v6092_v24, %v6088_v27 }
0x2c2a   : > { %8233 = vtanh.f32 %v6094_v17 }
0x2c2b   : > { %v6116_v22 = vpop.permute.xlu0 %6115  }
0x2c34   : > { %v8234_v29 = vpop.eup %8233 }
0x2c35   : > { %v6096_v49 = vmul.f32 %v8234_v29, %v8232_v26 }
0x2c37   : > { %v6108_v32 = vsel %vm78_vm1, %v6107_v5, %v6096_v49 }
0x2c38   : > { %6119 = vrot.lane.b32.xlu0 %v6108_v32, %s8326_s1 }
0x2ca5   :  { %4671 = sbr.rel (!%p4669_p0) target bundleno = 3513 (0xdb9), region = 106 }
0x2caa   : > { %v6120_v57 = vpop.permute.xlu0 %6119  }
0x2cab   : > { %v10594_v53 = vmov %v6120_v57  ;;  %v6125_v20 = vpack.c.bf16 (%p4669_p0), %v6120_v57, %v6120_v57 }
0x2cad   :  { %v6142_v37 = vrot.slane %v6125_v20, 3 }
0x2caf   :  { %7453 = vmatmul.mubr.msk.bf16.vlgmr.msra.gmra.mrb[0].mxu0 %vm364_vm9, %v6142_v37 }
0x2d82   :  { %v6204_v15 = vpop.f32.mrb[0].mxu0 }
0x2d83   :  { %v6205_v33 = vadd.f32 %v7083_v50, %v6204_v15  ;;  %v7454_v1 = vpop.f32.mrb[1].mxu0 }
0x2d84   :  { %v6207_v51 = vpop.f32.mrb[2].mxu0 }
0x2d85   :  { %v7455_v55 = vpop.f32.mrb[3].mxu0  ;;  %v6211_v35 = vsel %vm6210_vm15, %v6205_v33, -inf }
0x2d86   :  { %6212 = vmax.xlane.f32.xlu0 %v6211_v35 }
0x2e13   :  { %v6213_v2 = vpop.xlane.xlu0 %6212 }
0x2e14   :  { %v6214_v40 = vsub.f32 %v6205_v33, %v6213_v2 }
0x2e16   :  { %v6215_v48 = vmul.f32 1.442695, %v6214_v40 }
0x2e18   :  { %8247 = vpow2.f32 %v6215_v48 }
0x2e22   :  { %v8248_v36 = vpop.eup %8247 }
0x2e23   :  { %v6217_v21 = vsel %vm6210_vm15, %v8248_v36, 0.0 }
0x2e24   :  { %6218 = vadd.xlane.f32.xlu0 %v6217_v21 }
0x2eb1   :  { %v6219_v41 = vpop.xlane.xlu0 %6218 }
0x2eb2   :  { %8249 = vlog2.f32 %v6219_v41 }
0x2ebc   :  { %v8250_v4 = vpop.eup %8249 }
0x2ebd   :  { %v6221_v14 = vmul.f32 0.6931472, %v8250_v4 }
0x2ebf   :  { %v6222_v28 = vsub.f32 %v6214_v40, %v6221_v14 }
0x2ec1   :  { %6223 = vst.msk [vmem:[#allocation2] sm:$0x3] %vm6210_vm15, %v6222_v28 }
0x2ec2   :  { %8262 = shalt.err (!%p8259_p5)
}
0x2ec3   :  { %s8263_s7 = scalar_lea.hbm %s10591_s14, 32 }
0x2ec4   :  { %p8264_p6 = scmp.ne.s32.totalorder %s10591_s14, %s8263_s7  ;;  %p8267_p7 = scmp.lt.u32.totalorder %s8263_s7, %s10591_s14 }
0x2ec6   :  { %p8269_p8 = pnand %p8267_p7, %p8264_p6 }
0x2ec8   :  { %8272 = shalt.err (!%p8269_p8)
}
0x2ec9   :  { %6233 = dma.vmem_to_hbm [thread:$0]  %s6231_s13, 32, %s10591_s14, [#allocation3]  }
0x2eca   :  { %8293 = dma.done.wait [#allocation3], 32  }
0x2ecb   :  { %8294 = vsyncadd [#allocation3], 4294967264 }
0x2ecc   :  { %6237 = vsyncpa [#allocation3], 1 }

</bundles_post_ra>
